<compile_context>
chip_gen: v7x
topology: tpu7x:2x2x1
jax: 0.10.0
libtpu: 0.0.40
codegen_flags: <defaults>
</compile_context>

<pallas_src>
import jax
import jax.numpy as jnp
from jax import lax
from jax.experimental import pallas as pl
from jax.experimental.pallas import tpu as pltpu  # noqa: F401  (TPU backend)

# ---- hyper-parameters (small, deterministic synthetic config) ----
B = 2          # batch
FREQ = 16      # number of mel bins ("freq" ctor arg)
T = 8          # audio time frames
T_TEXT = 8     # text length
H = 32         # hp.model.hidden
HH = H // 2    # text BiLSTM hidden per direction
M_GMM = 4      # hp.model.gmm  (attention mixtures)
K = 4          # output GMM mixtures (== hp.model.gmm)
VOCAB = 12     # synthetic symbol table size
N_LAYERS = 2   # number of DelayedRNN layers (identity TODO)


# ----------------------------------------------------------------------------
# The single fused kernel.
# ----------------------------------------------------------------------------
def tts_kernel(x2_ref, xc_ref, xg_ref, len_ref,
               mtheta_ref, btheta_ref, wc0_ref, bc0_ref,
               whh_ref, wihx_ref, wch_ref, batt_ref, wg_ref, bwg_ref,
               theta_ref, ctx_ref, align_ref):
    f32 = jnp.float32

    # ---------------- (1) theta = W_theta(W_f_0(freq-shifted x)) ------------
    # Composed Linear(1, 3K) applied per scalar, expressed lane-dense as a
    # matmul against the precomputed block-diagonal kron(I_T, w) weight.
    x2 = x2_ref[...]                                      # [B*FREQ, T]
    zrow = jnp.zeros((1, T), f32)
    parts = []
    for b in range(B):                                    # freq shift (pad 1, drop last)
        parts.append(zrow)
        parts.append(x2[b * FREQ:(b + 1) * FREQ - 1, :])
    xf2 = jnp.concatenate(parts, axis=0)                  # [B*FREQ, T]
    theta_ref[...] = (jnp.dot(xf2, mtheta_ref[...],
                              preferred_element_type=f32) + btheta_ref[...])

    # ---------------- (2) h_c = W_c_0(time-shifted x) -----------------------
    # xc_ref rows are (t, b) so the attention loop slices contiguous [B, *].
    hc_tb = (jnp.dot(xc_ref[...], wc0_ref[...], preferred_element_type=f32)
             + bc0_ref[...])                              # [T*B, H]
    # Hoisted h_c-side LSTMCell input projection (full bias folded in).
    xproj_att = (jnp.dot(hc_tb, wihx_ref[...], preferred_element_type=f32)
                 + batt_ref[...])                         # [T*B, 4H]

    # ---------------- (3) text BiLSTM (pack/pad semantics) ------------------
    # Input-side projections + biases are pre-folded into the embedding table
    # (done once at init), so xg_ref already holds the per-token gate inputs:
    # columns [:4HH] forward direction, [4HH:] backward, rows ordered (t, b).
    xg = xg_ref[...]                                      # [T_TEXT*B, 8*HH]
    whh_blk = whh_ref[...]                                # [2*HH, 8*HH] block-diag
    lens = len_ref[...]                                   # [B, 1] int32
    t_iota = lax.broadcasted_iota(jnp.int32, (B, T_TEXT), 1)
    valid = (t_iota < lens).astype(f32)                   # [B, T_TEXT], hoisted

    h_cat = jnp.zeros((B, 2 * HH), f32)                   # [h_fwd | h_bwd]
    c_cat = jnp.zeros((B, 2 * HH), f32)
    fwd_rows = [None] * T_TEXT
    bwd_rows = [None] * T_TEXT
    for s in range(T_TEXT):
        tb = T_TEXT - 1 - s                               # backward time index
        xg_s = jnp.concatenate(
            [xg[s * B:(s + 1) * B, :4 * HH],
             xg[tb * B:(tb + 1) * B, 4 * HH:]], axis=-1)  # [B, 8*HH]
        mask = jnp.concatenate(
            [jnp.broadcast_to(valid[:, s:s + 1], (B, HH)),
             jnp.broadcast_to(valid[:, tb:tb + 1], (B, HH))], axis=-1)
        # ONE recurrent matmul for both directions (block-diagonal weight).
        gates = xg_s + jnp.dot(h_cat, whh_blk, preferred_element_type=f32)
        sg = jax.nn.sigmoid(gates)                        # one 128-lane EUP pass
        th = jnp.tanh(gates)                              # one 128-lane EUP pass
        i_g = jnp.concatenate([sg[:, 0 * HH:1 * HH], sg[:, 4 * HH:5 * HH]], axis=-1)
        f_g = jnp.concatenate([sg[:, 1 * HH:2 * HH], sg[:, 5 * HH:6 * HH]], axis=-1)
        g_g = jnp.concatenate([th[:, 2 * HH:3 * HH], th[:, 6 * HH:7 * HH]], axis=-1)
        o_g = jnp.concatenate([sg[:, 3 * HH:4 * HH], sg[:, 7 * HH:8 * HH]], axis=-1)
        c_new = f_g * c_cat + i_g * g_g
        h_new = o_g * jnp.tanh(c_new)
        h_out = h_new * mask                              # zero past length (pad_packed)
        fwd_rows[s] = h_out[:, :HH]
        bwd_rows[tb] = h_out[:, HH:]
        keep = 1.0 - mask                                 # freeze state past length
        h_cat = mask * h_new + keep * h_cat
        c_cat = mask * c_new + keep * c_cat

    # memory[b, t, :] = [fwd_t ; bwd_t]  (stays in VMEM/registers, never to HBM)
    mem_rows = [jnp.concatenate([fwd_rows[t], bwd_rows[t]], axis=-1)
                for t in range(T_TEXT)]                   # each [B, H]
    mem_b = []
    for b in range(B):
        mem_b.append(jnp.concatenate([r[b:b + 1, :] for r in mem_rows], axis=0))
    mem = jnp.concatenate([m[None, :, :] for m in mem_b], axis=0)   # [B, S, H]

    # ---------------- (4) GMM location attention recurrence -----------------
    wch = wch_ref[...]            # [[W_ih rows for context]; [W_hh]]  -> [2H, 4H]
    wg = wg_ref[...]              # [H, 3M]
    bg = jnp.broadcast_to(bwg_ref[...], (B, 3 * M_GMM))               # hoisted
    u = lax.broadcasted_iota(jnp.int32, (B, M_GMM, T_TEXT), 2).astype(f32)
    u_rl = jnp.concatenate([u + 1.5, u + 0.5], axis=-1)               # [B, M, 2S]
    lane3m = lax.broadcasted_iota(jnp.int32, (1, 3 * M_GMM), 1)
    sgn = jnp.where((lane3m >= M_GMM) & (lane3m < 2 * M_GMM), -1.0, 1.0)
    msk_pi = (lane3m >= 2 * M_GMM).astype(f32)

    h = jnp.zeros((B, H), f32)
    c = jnp.zeros((B, H), f32)
    ctx = jnp.zeros((B, H), f32)
    ksi = jnp.zeros((B, M_GMM), f32)
    ctx_list = [None] * T
    w_list = [None] * T
    for t in range(T):
        # LSTMCell(cat([h_c_t, ctx]), (h, c)); the h_c part is hoisted in
        # xproj_att, the [ctx | h] part is ONE merged matmul.
        gates = (xproj_att[t * B:(t + 1) * B, :]
                 + jnp.dot(jnp.concatenate([ctx, h], axis=-1), wch,
                           preferred_element_type=f32))
        sg = jax.nn.sigmoid(gates)
        th = jnp.tanh(gates)
        c = sg[:, H:2 * H] * c + sg[:, :H] * th[:, 2 * H:3 * H]
        h = sg[:, 3 * H:] * jnp.tanh(c)

        phi = jnp.dot(h, wg, preferred_element_type=f32) + bg         # [B, 3M]
        amax = jnp.max(phi[:, 2 * M_GMM:], axis=-1, keepdims=True)
        # single fused exp: [exp(phi_ksi) | exp(-phi_beta) | exp(phi_pi - max)]
        ephi = jnp.exp(phi * sgn - amax * msk_pi)
        ksi = ksi + ephi[:, :M_GMM]
        inv_beta = ephi[:, M_GMM:2 * M_GMM]                            # 1/beta
        e_a = ephi[:, 2 * M_GMM:]
        alpha = e_a / jnp.sum(e_a, axis=-1, keepdims=True)             # softmax

        srl = jax.nn.sigmoid((u_rl - ksi[:, :, None]) * inv_beta[:, :, None])
        w_t = jnp.sum(alpha[:, :, None]
                      * (srl[:, :, :T_TEXT] - srl[:, :, T_TEXT:]), axis=1)  # [B,S]
        ctx = jnp.sum(w_t[:, :, None] * mem, axis=1)                        # [B,H]
        # contexts = cat(contexts, dim=1) + input_h_c  (residual fused here)
        ctx_list[t] = ctx + hc_tb[t * B:(t + 1) * B, :]
        w_list[t] = w_t

    # Single lane-dense stores (no per-timestep masked stores).
    ctx_ref[...] = jnp.concatenate(ctx_list, axis=-1)      # [B, T*H]  = [2, 256]
    align_ref[...] = jnp.concatenate(w_list, axis=-1)      # [B, T*S]  = [2, 64]


# ----------------------------------------------------------------------------
# Parameter preparation: all kernel-ready constants, computed ONCE at init.
# ----------------------------------------------------------------------------
def prepare_params(p):
    eye_t = jnp.eye(T, dtype=jnp.float32)
    # Composed W_theta o W_f_0 (Linear(1, 3K)) in lane-dense kron form.
    w_ft = p["W_f0_w"] @ p["W_theta_w"]                        # [1, 3K]
    b_ft = p["W_f0_b"] @ p["W_theta_w"] + p["W_theta_b"]       # [1, 3K]
    m_theta = jnp.kron(eye_t, w_ft)                            # [T, T*3K]
    b_theta = jnp.tile(b_ft, (1, T))                           # [1, T*3K]
    # Embedding table pre-multiplied by BiLSTM input weights, biases folded.
    text_table = jnp.concatenate(
        [p["emb"] @ p["lstm_f_wih"] + p["lstm_f_b"],
         p["emb"] @ p["lstm_b_wih"] + p["lstm_b_b"]], axis=-1)  # [VOCAB, 8*HH]
    # Block-diagonal recurrent weight: [h_fwd | h_bwd] -> [fwd gates | bwd gates]
    whh_blk = jnp.zeros((2 * HH, 8 * HH), jnp.float32)
    whh_blk = whh_blk.at[:HH, :4 * HH].set(p["lstm_f_whh"])
    whh_blk = whh_blk.at[HH:, 4 * HH:].set(p["lstm_b_whh"])
    # Attention LSTMCell input is cat([h_c, context]); rows [:H] act on h_c,
    # rows [H:] on the recurrent context (stacked with W_hh for one matmul).
    att_wih_x = p["att_wih"][:H]                               # [H, 4H]
    att_w_ch = jnp.concatenate([p["att_wih"][H:], p["att_whh"]], axis=0)  # [2H, 4H]
    return {
        "m_theta": m_theta, "b_theta": b_theta,
        "wc0": p["W_c0_w"], "bc0": p["W_c0_b"],
        "text_table": text_table, "whh_blk": whh_blk,
        "att_wih_x": att_wih_x, "att_w_ch": att_w_ch, "att_b": p["att_b"],
        "att_wg": p["att_wg"], "att_wg_b": p["att_wg_b"],
    }


# ----------------------------------------------------------------------------
# TTS forward: thin wrapper (gather + free reshapes + one tiny pad/transpose
# fusion) around the single pallas_call.
# ----------------------------------------------------------------------------
@jax.jit
def tts_forward(x, text, text_lengths, audio_lengths, pp):
    del audio_lengths  # only consumed by DelayedRNN (identity TODO)

    # Free row-major reshape: [B, FREQ, T] -> [B*FREQ, T]
    x2 = x.reshape(B * FREQ, T)
    # F.pad(x, [1, -1]).transpose(1, 2) in (t, b) row order: [T*B, FREQ]
    x_tshift = jnp.pad(x, ((0, 0), (0, 0), (1, 0)))[:, :, :T]
    xc_tb = jnp.transpose(x_tshift, (2, 0, 1)).reshape(T * B, FREQ)
    # Embedding gather against the pre-projected table, rows ordered (t, b).
    xg_tb = jnp.take(pp["text_table"], text.T, axis=0).reshape(T_TEXT * B, 8 * HH)
    lens = text_lengths.reshape(B, 1).astype(jnp.int32)

    theta_ld, ctx_ld, align_ld = pl.pallas_call(
        tts_kernel,
        out_shape=(jax.ShapeDtypeStruct((B * FREQ, T * 3 * K), jnp.float32),
                   jax.ShapeDtypeStruct((B, T * H), jnp.float32),
                   jax.ShapeDtypeStruct((B, T * T_TEXT), jnp.float32)),
    )(x2, xc_tb, xg_tb, lens,
      pp["m_theta"], pp["b_theta"], pp["wc0"], pp["bc0"],
      pp["whh_blk"], pp["att_wih_x"], pp["att_w_ch"], pp["att_b"],
      pp["att_wg"], pp["att_wg_b"])

    theta = theta_ld.reshape(B, FREQ, T, 3 * K)            # free reshape
    mu = theta[..., :K]
    std = theta[..., K:2 * K]
    pi = theta[..., 2 * K:]
    alignment = align_ld.reshape(B, T, T_TEXT)             # free reshape
    # ctx_ld.reshape(B, T, H) is h_c after the attention layer; it would feed
    # the remaining DelayedRNN layers.
    # TODO(synk): DelayedRNN not provided in reference; identity pass-through.
    _ = ctx_ld
    return mu, std, pi, alignment


# ----------------------------------------------------------------------------
# Deterministic parameter init (weights stored pre-transposed: [in, out]).
# ----------------------------------------------------------------------------
def init_params(key):
    ks = jax.random.split(key, 20)

    def w(k, shape, scale=0.1):
        return (jax.random.normal(k, shape, jnp.float32) * scale).astype(jnp.float32)

    return {
        # W_t_0 is only consumed by DelayedRNN layers (identity TODO) -> unused.
        "W_t0_w": w(ks[0], (1, H)), "W_t0_b": w(ks[1], (1, H)),
        "W_f0_w": w(ks[2], (1, H)), "W_f0_b": w(ks[3], (1, H)),
        "W_c0_w": w(ks[4], (FREQ, H)), "W_c0_b": w(ks[5], (1, H)),
        "W_theta_w": w(ks[6], (H, 3 * K)), "W_theta_b": w(ks[7], (1, 3 * K)),
        "emb": w(ks[8], (VOCAB, H)),
        # text BiLSTM (forward / backward directions), gate order i,f,g,o
        "lstm_f_wih": w(ks[9], (H, 4 * HH)), "lstm_f_whh": w(ks[10], (HH, 4 * HH)),
        "lstm_f_b": w(ks[11], (1, 4 * HH)),
        "lstm_b_wih": w(ks[12], (H, 4 * HH)), "lstm_b_whh": w(ks[13], (HH, 4 * HH)),
        "lstm_b_b": w(ks[14], (1, 4 * HH)),
        # attention LSTMCell (input = [h_c, context] = 2H) and W_g
        "att_wih": w(ks[15], (2 * H, 4 * H)), "att_whh": w(ks[16], (H, 4 * H)),
        "att_b": w(ks[17], (1, 4 * H)),
        "att_wg": w(ks[18], (H, 3 * M_GMM)), "att_wg_b": w(ks[19], (1, 3 * M_GMM)),
    }


if __name__ == "__main__":
    key = jax.random.PRNGKey(0)
    kx, kt, kp = jax.random.split(key, 3)

    x = jax.random.normal(kx, (B, FREQ, T), jnp.float32)
    text = jax.random.randint(kt, (B, T_TEXT), 0, VOCAB, jnp.int32)
    text_lengths = jnp.array([T_TEXT, T_TEXT - 3], jnp.int32)
    audio_lengths = jnp.array([T, T - 2], jnp.int32)

    params = init_params(kp)
    prepared = prepare_params(params)   # one-time, kernel-ready constants

    mu, std, pi, alignment = tts_forward(x, text, text_lengths,
                                         audio_lengths, prepared)
    jax.block_until_ready((mu, std, pi, alignment))

    assert mu.shape == (B, FREQ, T, K)
    assert std.shape == (B, FREQ, T, K)
    assert pi.shape == (B, FREQ, T, K)
    assert alignment.shape == (B, T, T_TEXT)
    print("KERNEL_OK")
</pallas_src>

<mosaic_0001>
module attributes {stable_mosaic.version = 11 : i64} {
  func.func @tts_kernel(%arg0: memref<32x8xf32, #tpu.memory_space<vmem>>, %arg1: memref<16x16xf32, #tpu.memory_space<vmem>>, %arg2: memref<16x128xf32, #tpu.memory_space<vmem>>, %arg3: memref<2x1xi32, #tpu.memory_space<vmem>>, %arg4: memref<8x96xf32, #tpu.memory_space<vmem>>, %arg5: memref<1x96xf32, #tpu.memory_space<vmem>>, %arg6: memref<16x32xf32, #tpu.memory_space<vmem>>, %arg7: memref<1x32xf32, #tpu.memory_space<vmem>>, %arg8: memref<32x128xf32, #tpu.memory_space<vmem>>, %arg9: memref<32x128xf32, #tpu.memory_space<vmem>>, %arg10: memref<64x128xf32, #tpu.memory_space<vmem>>, %arg11: memref<1x128xf32, #tpu.memory_space<vmem>>, %arg12: memref<32x12xf32, #tpu.memory_space<vmem>>, %arg13: memref<1x12xf32, #tpu.memory_space<vmem>>, %arg14: memref<32x96xf32, #tpu.memory_space<vmem>>, %arg15: memref<2x256xf32, #tpu.memory_space<vmem>>, %arg16: memref<2x64xf32, #tpu.memory_space<vmem>>) attributes {dimension_semantics = [], scalar_prefetch = 0 : i64, scratch_operands = 0 : i64, tpu.core_type = #tpu.core_type<tc>} {
    %c0 = arith.constant 0 : index
    %c0_0 = arith.constant 0 : index
    %0 = vector.load %arg0[%c0, %c0_0] : memref<32x8xf32, #tpu.memory_space<vmem>>, vector<32x8xf32>
    %cst = arith.constant 0.000000e+00 : f32
    %1 = vector.broadcast %cst : f32 to vector<1x8xf32>
    %2 = vector.extract_strided_slice %0 {offsets = [0, 0], sizes = [15, 8], strides = [1, 1]} : vector<32x8xf32> to vector<15x8xf32>
    %3 = vector.extract_strided_slice %0 {offsets = [16, 0], sizes = [15, 8], strides = [1, 1]} : vector<32x8xf32> to vector<15x8xf32>
    %4 = tpu.concatenate %1, %2, %1, %3 in 0 : vector<1x8xf32>, vector<15x8xf32>, vector<1x8xf32>, vector<15x8xf32> -> vector<32x8xf32>
    %c0_1 = arith.constant 0 : index
    %c0_2 = arith.constant 0 : index
    %5 = vector.load %arg4[%c0_1, %c0_2] : memref<8x96xf32, #tpu.memory_space<vmem>>, vector<8x96xf32>
    %cst_3 = arith.constant dense<0.000000e+00> : vector<32x96xf32>
    %6 = tpu.matmul %4, %5, %cst_3 {dimension_numbers = #tpu.dot_dimension_numbers<[1], [0], [0], [1], [0, 0, 1, 1], [], []>} : vector<32x8xf32>, vector<8x96xf32>, vector<32x96xf32> -> vector<32x96xf32>
    %c0_4 = arith.constant 0 : index
    %c0_5 = arith.constant 0 : index
    %7 = vector.load %arg5[%c0_4, %c0_5] : memref<1x96xf32, #tpu.memory_space<vmem>>, vector<1x96xf32>
    %8 = vector.broadcast %7 : vector<1x96xf32> to vector<32x96xf32>
    %9 = arith.addf %6, %8 : vector<32x96xf32>
    %c0_6 = arith.constant 0 : index
    %c0_7 = arith.constant 0 : index
    %10 = vector.load %arg14[%c0_6, %c0_7] : memref<32x96xf32, #tpu.memory_space<vmem>>, vector<32x96xf32>
    tpu.vector_store %arg14[%c0_6, %c0_7], %9 {strides = array<i32>} : memref<32x96xf32, #tpu.memory_space<vmem>>, vector<32x96xf32>,
    %c0_8 = arith.constant 0 : index
    %c0_9 = arith.constant 0 : index
    %11 = vector.load %arg1[%c0_8, %c0_9] : memref<16x16xf32, #tpu.memory_space<vmem>>, vector<16x16xf32>
    %c0_10 = arith.constant 0 : index
    %c0_11 = arith.constant 0 : index
    %12 = vector.load %arg6[%c0_10, %c0_11] : memref<16x32xf32, #tpu.memory_space<vmem>>, vector<16x32xf32>
    %cst_12 = arith.constant dense<0.000000e+00> : vector<16x32xf32>
    %13 = tpu.matmul %11, %12, %cst_12 {dimension_numbers = #tpu.dot_dimension_numbers<[1], [0], [0], [1], [0, 0, 1, 1], [], []>} : vector<16x16xf32>, vector<16x32xf32>, vector<16x32xf32> -> vector<16x32xf32>
    %c0_13 = arith.constant 0 : index
    %c0_14 = arith.constant 0 : index
    %14 = vector.load %arg7[%c0_13, %c0_14] : memref<1x32xf32, #tpu.memory_space<vmem>>, vector<1x32xf32>
    %15 = vector.broadcast %14 : vector<1x32xf32> to vector<16x32xf32>
    %16 = arith.addf %13, %15 : vector<16x32xf32>
    %c0_15 = arith.constant 0 : index
    %c0_16 = arith.constant 0 : index
    %17 = vector.load %arg9[%c0_15, %c0_16] : memref<32x128xf32, #tpu.memory_space<vmem>>, vector<32x128xf32>
    %cst_17 = arith.constant dense<0.000000e+00> : vector<16x128xf32>
    %18 = tpu.matmul %16, %17, %cst_17 {dimension_numbers = #tpu.dot_dimension_numbers<[1], [0], [0], [1], [0, 0, 1, 1], [], []>} : vector<16x32xf32>, vector<32x128xf32>, vector<16x128xf32> -> vector<16x128xf32>
    %c0_18 = arith.constant 0 : index
    %c0_19 = arith.constant 0 : index
    %19 = vector.load %arg11[%c0_18, %c0_19] : memref<1x128xf32, #tpu.memory_space<vmem>>, vector<1x128xf32>
    %20 = vector.broadcast %19 : vector<1x128xf32> to vector<16x128xf32>
    %21 = arith.addf %18, %20 : vector<16x128xf32>
    %c0_20 = arith.constant 0 : index
    %c0_21 = arith.constant 0 : index
    %22 = vector.load %arg2[%c0_20, %c0_21] : memref<16x128xf32, #tpu.memory_space<vmem>>, vector<16x128xf32>
    %c0_22 = arith.constant 0 : index
    %c0_23 = arith.constant 0 : index
    %23 = vector.load %arg8[%c0_22, %c0_23] : memref<32x128xf32, #tpu.memory_space<vmem>>, vector<32x128xf32>
    %c0_24 = arith.constant 0 : index
    %c0_25 = arith.constant 0 : index
    %24 = vector.load %arg3[%c0_24, %c0_25] : memref<2x1xi32, #tpu.memory_space<vmem>>, vector<2x1xi32>
    %25 = tpu.iota {dimensions = array<i32: 1>} : vector<2x8xi32>
    %26 = vector.broadcast %24 : vector<2x1xi32> to vector<2x8xi32>
    %27 = arith.cmpi slt, %25, %26 : vector<2x8xi32>
    %28 = arith.extui %27 : vector<2x8xi1> to vector<2x8xi32>
    %29 = arith.sitofp %28 : vector<2x8xi32> to vector<2x8xf32>
    %cst_26 = arith.constant 0.000000e+00 : f32
    %30 = vector.broadcast %cst_26 : f32 to vector<2x32xf32>
    %cst_27 = arith.constant 0.000000e+00 : f32
    %31 = vector.broadcast %cst_27 : f32 to vector<2x32xf32>
    %32 = vector.extract_strided_slice %22 {offsets = [0, 0], sizes = [2, 64], strides = [1, 1]} : vector<16x128xf32> to vector<2x64xf32>
    %33 = vector.extract_strided_slice %22 {offsets = [14, 64], sizes = [2, 64], strides = [1, 1]} : vector<16x128xf32> to vector<2x64xf32>
    %34 = tpu.concatenate %32, %33 in 1 : vector<2x64xf32>, vector<2x64xf32> -> vector<2x128xf32>
    %35 = vector.extract_strided_slice %29 {offsets = [0, 0], sizes = [2, 1], strides = [1, 1]} : vector<2x8xf32> to vector<2x1xf32>
    %36 = vector.shape_cast %35 : vector<2x1xf32> to vector<2x1xf32>
    %37 = vector.broadcast %36 : vector<2x1xf32> to vector<2x16xf32>
    %38 = vector.extract_strided_slice %29 {offsets = [0, 7], sizes = [2, 1], strides = [1, 1]} : vector<2x8xf32> to vector<2x1xf32>
    %39 = vector.shape_cast %38 : vector<2x1xf32> to vector<2x1xf32>
    %40 = vector.broadcast %39 : vector<2x1xf32> to vector<2x16xf32>
    %41 = tpu.concatenate %37, %40 in 1 : vector<2x16xf32>, vector<2x16xf32> -> vector<2x32xf32>
    %cst_28 = arith.constant dense<0.000000e+00> : vector<2x128xf32>
    %42 = tpu.matmul %30, %23, %cst_28 {dimension_numbers = #tpu.dot_dimension_numbers<[1], [0], [0], [1], [0, 0, 1, 1], [], []>} : vector<2x32xf32>, vector<32x128xf32>, vector<2x128xf32> -> vector<2x128xf32>
    %43 = arith.addf %34, %42 : vector<2x128xf32>
    %44 = arith.negf %43 : vector<2x128xf32>
    %45 = math.exp %44 : vector<2x128xf32>
    %cst_29 = arith.constant 1.000000e+00 : f32
    %46 = vector.broadcast %cst_29 : f32 to vector<2x128xf32>
    %47 = arith.addf %46, %45 : vector<2x128xf32>
    %48 = arith.divf %46, %47 : vector<2x128xf32>
    %49 = math.tanh %43 : vector<2x128xf32>
    %50 = vector.extract_strided_slice %48 {offsets = [0, 0], sizes = [2, 16], strides = [1, 1]} : vector<2x128xf32> to vector<2x16xf32>
    %51 = vector.extract_strided_slice %48 {offsets = [0, 64], sizes = [2, 16], strides = [1, 1]} : vector<2x128xf32> to vector<2x16xf32>
    %52 = tpu.concatenate %50, %51 in 1 : vector<2x16xf32>, vector<2x16xf32> -> vector<2x32xf32>
    %53 = vector.extract_strided_slice %48 {offsets = [0, 16], sizes = [2, 16], strides = [1, 1]} : vector<2x128xf32> to vector<2x16xf32>
    %54 = vector.extract_strided_slice %48 {offsets = [0, 80], sizes = [2, 16], strides = [1, 1]} : vector<2x128xf32> to vector<2x16xf32>
    %55 = tpu.concatenate %53, %54 in 1 : vector<2x16xf32>, vector<2x16xf32> -> vector<2x32xf32>
    %56 = vector.extract_strided_slice %49 {offsets = [0, 32], sizes = [2, 16], strides = [1, 1]} : vector<2x128xf32> to vector<2x16xf32>
    %57 = vector.extract_strided_slice %49 {offsets = [0, 96], sizes = [2, 16], strides = [1, 1]} : vector<2x128xf32> to vector<2x16xf32>
    %58 = tpu.concatenate %56, %57 in 1 : vector<2x16xf32>, vector<2x16xf32> -> vector<2x32xf32>
    %59 = vector.extract_strided_slice %48 {offsets = [0, 48], sizes = [2, 16], strides = [1, 1]} : vector<2x128xf32> to vector<2x16xf32>
    %60 = vector.extract_strided_slice %48 {offsets = [0, 112], sizes = [2, 16], strides = [1, 1]} : vector<2x128xf32> to vector<2x16xf32>
    %61 = tpu.concatenate %59, %60 in 1 : vector<2x16xf32>, vector<2x16xf32> -> vector<2x32xf32>
    %62 = arith.mulf %55, %31 : vector<2x32xf32>
    %63 = arith.mulf %52, %58 : vector<2x32xf32>
    %64 = arith.addf %62, %63 : vector<2x32xf32>
    %65 = math.tanh %64 : vector<2x32xf32>
    %66 = arith.mulf %61, %65 : vector<2x32xf32>
    %67 = arith.mulf %66, %41 : vector<2x32xf32>
    %68 = vector.extract_strided_slice %67 {offsets = [0, 0], sizes = [2, 16], strides = [1, 1]} : vector<2x32xf32> to vector<2x16xf32>
    %69 = vector.extract_strided_slice %67 {offsets = [0, 16], sizes = [2, 16], strides = [1, 1]} : vector<2x32xf32> to vector<2x16xf32>
    %cst_30 = arith.constant 1.000000e+00 : f32
    %70 = vector.broadcast %cst_30 : f32 to vector<2x32xf32>
    %71 = arith.subf %70, %41 : vector<2x32xf32>
    %72 = arith.mulf %41, %66 : vector<2x32xf32>
    %73 = arith.mulf %71, %30 : vector<2x32xf32>
    %74 = arith.addf %72, %73 : vector<2x32xf32>
    %75 = arith.mulf %41, %64 : vector<2x32xf32>
    %76 = arith.mulf %71, %31 : vector<2x32xf32>
    %77 = arith.addf %75, %76 : vector<2x32xf32>
    %78 = vector.extract_strided_slice %22 {offsets = [2, 0], sizes = [2, 64], strides = [1, 1]} : vector<16x128xf32> to vector<2x64xf32>
    %79 = vector.extract_strided_slice %22 {offsets = [12, 64], sizes = [2, 64], strides = [1, 1]} : vector<16x128xf32> to vector<2x64xf32>
    %80 = tpu.concatenate %78, %79 in 1 : vector<2x64xf32>, vector<2x64xf32> -> vector<2x128xf32>
    %81 = vector.extract_strided_slice %29 {offsets = [0, 1], sizes = [2, 1], strides = [1, 1]} : vector<2x8xf32> to vector<2x1xf32>
    %82 = vector.shape_cast %81 : vector<2x1xf32> to vector<2x1xf32>
    %83 = vector.broadcast %82 : vector<2x1xf32> to vector<2x16xf32>
    %84 = vector.extract_strided_slice %29 {offsets = [0, 6], sizes = [2, 1], strides = [1, 1]} : vector<2x8xf32> to vector<2x1xf32>
    %85 = vector.shape_cast %84 : vector<2x1xf32> to vector<2x1xf32>
    %86 = vector.broadcast %85 : vector<2x1xf32> to vector<2x16xf32>
    %87 = tpu.concatenate %83, %86 in 1 : vector<2x16xf32>, vector<2x16xf32> -> vector<2x32xf32>
    %cst_31 = arith.constant dense<0.000000e+00> : vector<2x128xf32>
    %88 = tpu.matmul %74, %23, %cst_31 {dimension_numbers = #tpu.dot_dimension_numbers<[1], [0], [0], [1], [0, 0, 1, 1], [], []>} : vector<2x32xf32>, vector<32x128xf32>, vector<2x128xf32> -> vector<2x128xf32>
    %89 = arith.addf %80, %88 : vector<2x128xf32>
    %90 = arith.negf %89 : vector<2x128xf32>
    %91 = math.exp %90 : vector<2x128xf32>
    %cst_32 = arith.constant 1.000000e+00 : f32
    %92 = vector.broadcast %cst_32 : f32 to vector<2x128xf32>
    %93 = arith.addf %92, %91 : vector<2x128xf32>
    %94 = arith.divf %92, %93 : vector<2x128xf32>
    %95 = math.tanh %89 : vector<2x128xf32>
    %96 = vector.extract_strided_slice %94 {offsets = [0, 0], sizes = [2, 16], strides = [1, 1]} : vector<2x128xf32> to vector<2x16xf32>
    %97 = vector.extract_strided_slice %94 {offsets = [0, 64], sizes = [2, 16], strides = [1, 1]} : vector<2x128xf32> to vector<2x16xf32>
    %98 = tpu.concatenate %96, %97 in 1 : vector<2x16xf32>, vector<2x16xf32> -> vector<2x32xf32>
    %99 = vector.extract_strided_slice %94 {offsets = [0, 16], sizes = [2, 16], strides = [1, 1]} : vector<2x128xf32> to vector<2x16xf32>
    %100 = vector.extract_strided_slice %94 {offsets = [0, 80], sizes = [2, 16], strides = [1, 1]} : vector<2x128xf32> to vector<2x16xf32>
    %101 = tpu.concatenate %99, %100 in 1 : vector<2x16xf32>, vector<2x16xf32> -> vector<2x32xf32>
    %102 = vector.extract_strided_slice %95 {offsets = [0, 32], sizes = [2, 16], strides = [1, 1]} : vector<2x128xf32> to vector<2x16xf32>
    %103 = vector.extract_strided_slice %95 {offsets = [0, 96], sizes = [2, 16], strides = [1, 1]} : vector<2x128xf32> to vector<2x16xf32>
    %104 = tpu.concatenate %102, %103 in 1 : vector<2x16xf32>, vector<2x16xf32> -> vector<2x32xf32>
    %105 = vector.extract_strided_slice %94 {offsets = [0, 48], sizes = [2, 16], strides = [1, 1]} : vector<2x128xf32> to vector<2x16xf32>
    %106 = vector.extract_strided_slice %94 {offsets = [0, 112], sizes = [2, 16], strides = [1, 1]} : vector<2x128xf32> to vector<2x16xf32>
    %107 = tpu.concatenate %105, %106 in 1 : vector<2x16xf32>, vector<2x16xf32> -> vector<2x32xf32>
    %108 = arith.mulf %101, %77 : vector<2x32xf32>
    %109 = arith.mulf %98, %104 : vector<2x32xf32>
    %110 = arith.addf %108, %109 : vector<2x32xf32>
    %111 = math.tanh %110 : vector<2x32xf32>
    %112 = arith.mulf %107, %111 : vector<2x32xf32>
    %113 = arith.mulf %112, %87 : vector<2x32xf32>
    %114 = vector.extract_strided_slice %113 {offsets = [0, 0], sizes = [2, 16], strides = [1, 1]} : vector<2x32xf32> to vector<2x16xf32>
    %115 = vector.extract_strided_slice %113 {offsets = [0, 16], sizes = [2, 16], strides = [1, 1]} : vector<2x32xf32> to vector<2x16xf32>
    %cst_33 = arith.constant 1.000000e+00 : f32
    %116 = vector.broadcast %cst_33 : f32 to vector<2x32xf32>
    %117 = arith.subf %116, %87 : vector<2x32xf32>
    %118 = arith.mulf %87, %112 : vector<2x32xf32>
    %119 = arith.mulf %117, %74 : vector<2x32xf32>
    %120 = arith.addf %118, %119 : vector<2x32xf32>
    %121 = arith.mulf %87, %110 : vector<2x32xf32>
    %122 = arith.mulf %117, %77 : vector<2x32xf32>
    %123 = arith.addf %121, %122 : vector<2x32xf32>
    %124 = vector.extract_strided_slice %22 {offsets = [4, 0], sizes = [2, 64], strides = [1, 1]} : vector<16x128xf32> to vector<2x64xf32>
    %125 = vector.extract_strided_slice %22 {offsets = [10, 64], sizes = [2, 64], strides = [1, 1]} : vector<16x128xf32> to vector<2x64xf32>
    %126 = tpu.concatenate %124, %125 in 1 : vector<2x64xf32>, vector<2x64xf32> -> vector<2x128xf32>
    %127 = vector.extract_strided_slice %29 {offsets = [0, 2], sizes = [2, 1], strides = [1, 1]} : vector<2x8xf32> to vector<2x1xf32>
    %128 = vector.shape_cast %127 : vector<2x1xf32> to vector<2x1xf32>
    %129 = vector.broadcast %128 : vector<2x1xf32> to vector<2x16xf32>
    %130 = vector.extract_strided_slice %29 {offsets = [0, 5], sizes = [2, 1], strides = [1, 1]} : vector<2x8xf32> to vector<2x1xf32>
    %131 = vector.shape_cast %130 : vector<2x1xf32> to vector<2x1xf32>
    %132 = vector.broadcast %131 : vector<2x1xf32> to vector<2x16xf32>
    %133 = tpu.concatenate %129, %132 in 1 : vector<2x16xf32>, vector<2x16xf32> -> vector<2x32xf32>
    %cst_34 = arith.constant dense<0.000000e+00> : vector<2x128xf32>
    %134 = tpu.matmul %120, %23, %cst_34 {dimension_numbers = #tpu.dot_dimension_numbers<[1], [0], [0], [1], [0, 0, 1, 1], [], []>} : vector<2x32xf32>, vector<32x128xf32>, vector<2x128xf32> -> vector<2x128xf32>
    %135 = arith.addf %126, %134 : vector<2x128xf32>
    %136 = arith.negf %135 : vector<2x128xf32>
    %137 = math.exp %136 : vector<2x128xf32>
    %cst_35 = arith.constant 1.000000e+00 : f32
    %138 = vector.broadcast %cst_35 : f32 to vector<2x128xf32>
    %139 = arith.addf %138, %137 : vector<2x128xf32>
    %140 = arith.divf %138, %139 : vector<2x128xf32>
    %141 = math.tanh %135 : vector<2x128xf32>
    %142 = vector.extract_strided_slice %140 {offsets = [0, 0], sizes = [2, 16], strides = [1, 1]} : vector<2x128xf32> to vector<2x16xf32>
    %143 = vector.extract_strided_slice %140 {offsets = [0, 64], sizes = [2, 16], strides = [1, 1]} : vector<2x128xf32> to vector<2x16xf32>
    %144 = tpu.concatenate %142, %143 in 1 : vector<2x16xf32>, vector<2x16xf32> -> vector<2x32xf32>
    %145 = vector.extract_strided_slice %140 {offsets = [0, 16], sizes = [2, 16], strides = [1, 1]} : vector<2x128xf32> to vector<2x16xf32>
    %146 = vector.extract_strided_slice %140 {offsets = [0, 80], sizes = [2, 16], strides = [1, 1]} : vector<2x128xf32> to vector<2x16xf32>
    %147 = tpu.concatenate %145, %146 in 1 : vector<2x16xf32>, vector<2x16xf32> -> vector<2x32xf32>
    %148 = vector.extract_strided_slice %141 {offsets = [0, 32], sizes = [2, 16], strides = [1, 1]} : vector<2x128xf32> to vector<2x16xf32>
    %149 = vector.extract_strided_slice %141 {offsets = [0, 96], sizes = [2, 16], strides = [1, 1]} : vector<2x128xf32> to vector<2x16xf32>
    %150 = tpu.concatenate %148, %149 in 1 : vector<2x16xf32>, vector<2x16xf32> -> vector<2x32xf32>
    %151 = vector.extract_strided_slice %140 {offsets = [0, 48], sizes = [2, 16], strides = [1, 1]} : vector<2x128xf32> to vector<2x16xf32>
    %152 = vector.extract_strided_slice %140 {offsets = [0, 112], sizes = [2, 16], strides = [1, 1]} : vector<2x128xf32> to vector<2x16xf32>
    %153 = tpu.concatenate %151, %152 in 1 : vector<2x16xf32>, vector<2x16xf32> -> vector<2x32xf32>
    %154 = arith.mulf %147, %123 : vector<2x32xf32>
    %155 = arith.mulf %144, %150 : vector<2x32xf32>
    %156 = arith.addf %154, %155 : vector<2x32xf32>
    %157 = math.tanh %156 : vector<2x32xf32>
    %158 = arith.mulf %153, %157 : vector<2x32xf32>
    %159 = arith.mulf %158, %133 : vector<2x32xf32>
    %160 = vector.extract_strided_slice %159 {offsets = [0, 0], sizes = [2, 16], strides = [1, 1]} : vector<2x32xf32> to vector<2x16xf32>
    %161 = vector.extract_strided_slice %159 {offsets = [0, 16], sizes = [2, 16], strides = [1, 1]} : vector<2x32xf32> to vector<2x16xf32>
    %cst_36 = arith.constant 1.000000e+00 : f32
    %162 = vector.broadcast %cst_36 : f32 to vector<2x32xf32>
    %163 = arith.subf %162, %133 : vector<2x32xf32>
    %164 = arith.mulf %133, %158 : vector<2x32xf32>
    %165 = arith.mulf %163, %120 : vector<2x32xf32>
    %166 = arith.addf %164, %165 : vector<2x32xf32>
    %167 = arith.mulf %133, %156 : vector<2x32xf32>
    %168 = arith.mulf %163, %123 : vector<2x32xf32>
    %169 = arith.addf %167, %168 : vector<2x32xf32>
    %170 = vector.extract_strided_slice %22 {offsets = [6, 0], sizes = [2, 64], strides = [1, 1]} : vector<16x128xf32> to vector<2x64xf32>
    %171 = vector.extract_strided_slice %22 {offsets = [8, 64], sizes = [2, 64], strides = [1, 1]} : vector<16x128xf32> to vector<2x64xf32>
    %172 = tpu.concatenate %170, %171 in 1 : vector<2x64xf32>, vector<2x64xf32> -> vector<2x128xf32>
    %173 = vector.extract_strided_slice %29 {offsets = [0, 3], sizes = [2, 1], strides = [1, 1]} : vector<2x8xf32> to vector<2x1xf32>
    %174 = vector.shape_cast %173 : vector<2x1xf32> to vector<2x1xf32>
    %175 = vector.broadcast %174 : vector<2x1xf32> to vector<2x16xf32>
    %176 = vector.extract_strided_slice %29 {offsets = [0, 4], sizes = [2, 1], strides = [1, 1]} : vector<2x8xf32> to vector<2x1xf32>
    %177 = vector.shape_cast %176 : vector<2x1xf32> to vector<2x1xf32>
    %178 = vector.broadcast %177 : vector<2x1xf32> to vector<2x16xf32>
    %179 = tpu.concatenate %175, %178 in 1 : vector<2x16xf32>, vector<2x16xf32> -> vector<2x32xf32>
    %cst_37 = arith.constant dense<0.000000e+00> : vector<2x128xf32>
    %180 = tpu.matmul %166, %23, %cst_37 {dimension_numbers = #tpu.dot_dimension_numbers<[1], [0], [0], [1], [0, 0, 1, 1], [], []>} : vector<2x32xf32>, vector<32x128xf32>, vector<2x128xf32> -> vector<2x128xf32>
    %181 = arith.addf %172, %180 : vector<2x128xf32>
    %182 = arith.negf %181 : vector<2x128xf32>
    %183 = math.exp %182 : vector<2x128xf32>
    %cst_38 = arith.constant 1.000000e+00 : f32
    %184 = vector.broadcast %cst_38 : f32 to vector<2x128xf32>
    %185 = arith.addf %184, %183 : vector<2x128xf32>
    %186 = arith.divf %184, %185 : vector<2x128xf32>
    %187 = math.tanh %181 : vector<2x128xf32>
    %188 = vector.extract_strided_slice %186 {offsets = [0, 0], sizes = [2, 16], strides = [1, 1]} : vector<2x128xf32> to vector<2x16xf32>
    %189 = vector.extract_strided_slice %186 {offsets = [0, 64], sizes = [2, 16], strides = [1, 1]} : vector<2x128xf32> to vector<2x16xf32>
    %190 = tpu.concatenate %188, %189 in 1 : vector<2x16xf32>, vector<2x16xf32> -> vector<2x32xf32>
    %191 = vector.extract_strided_slice %186 {offsets = [0, 16], sizes = [2, 16], strides = [1, 1]} : vector<2x128xf32> to vector<2x16xf32>
    %192 = vector.extract_strided_slice %186 {offsets = [0, 80], sizes = [2, 16], strides = [1, 1]} : vector<2x128xf32> to vector<2x16xf32>
    %193 = tpu.concatenate %191, %192 in 1 : vector<2x16xf32>, vector<2x16xf32> -> vector<2x32xf32>
    %194 = vector.extract_strided_slice %187 {offsets = [0, 32], sizes = [2, 16], strides = [1, 1]} : vector<2x128xf32> to vector<2x16xf32>
    %195 = vector.extract_strided_slice %187 {offsets = [0, 96], sizes = [2, 16], strides = [1, 1]} : vector<2x128xf32> to vector<2x16xf32>
    %196 = tpu.concatenate %194, %195 in 1 : vector<2x16xf32>, vector<2x16xf32> -> vector<2x32xf32>
    %197 = vector.extract_strided_slice %186 {offsets = [0, 48], sizes = [2, 16], strides = [1, 1]} : vector<2x128xf32> to vector<2x16xf32>
    %198 = vector.extract_strided_slice %186 {offsets = [0, 112], sizes = [2, 16], strides = [1, 1]} : vector<2x128xf32> to vector<2x16xf32>
    %199 = tpu.concatenate %197, %198 in 1 : vector<2x16xf32>, vector<2x16xf32> -> vector<2x32xf32>
    %200 = arith.mulf %193, %169 : vector<2x32xf32>
    %201 = arith.mulf %190, %196 : vector<2x32xf32>
    %202 = arith.addf %200, %201 : vector<2x32xf32>
    %203 = math.tanh %202 : vector<2x32xf32>
    %204 = arith.mulf %199, %203 : vector<2x32xf32>
    %205 = arith.mulf %204, %179 : vector<2x32xf32>
    %206 = vector.extract_strided_slice %205 {offsets = [0, 0], sizes = [2, 16], strides = [1, 1]} : vector<2x32xf32> to vector<2x16xf32>
    %207 = vector.extract_strided_slice %205 {offsets = [0, 16], sizes = [2, 16], strides = [1, 1]} : vector<2x32xf32> to vector<2x16xf32>
    %cst_39 = arith.constant 1.000000e+00 : f32
    %208 = vector.broadcast %cst_39 : f32 to vector<2x32xf32>
    %209 = arith.subf %208, %179 : vector<2x32xf32>
    %210 = arith.mulf %179, %204 : vector<2x32xf32>
    %211 = arith.mulf %209, %166 : vector<2x32xf32>
    %212 = arith.addf %210, %211 : vector<2x32xf32>
    %213 = arith.mulf %179, %202 : vector<2x32xf32>
    %214 = arith.mulf %209, %169 : vector<2x32xf32>
    %215 = arith.addf %213, %214 : vector<2x32xf32>
    %216 = vector.extract_strided_slice %22 {offsets = [8, 0], sizes = [2, 64], strides = [1, 1]} : vector<16x128xf32> to vector<2x64xf32>
    %217 = vector.extract_strided_slice %22 {offsets = [6, 64], sizes = [2, 64], strides = [1, 1]} : vector<16x128xf32> to vector<2x64xf32>
    %218 = tpu.concatenate %216, %217 in 1 : vector<2x64xf32>, vector<2x64xf32> -> vector<2x128xf32>
    %219 = vector.extract_strided_slice %29 {offsets = [0, 4], sizes = [2, 1], strides = [1, 1]} : vector<2x8xf32> to vector<2x1xf32>
    %220 = vector.shape_cast %219 : vector<2x1xf32> to vector<2x1xf32>
    %221 = vector.broadcast %220 : vector<2x1xf32> to vector<2x16xf32>
    %222 = vector.extract_strided_slice %29 {offsets = [0, 3], sizes = [2, 1], strides = [1, 1]} : vector<2x8xf32> to vector<2x1xf32>
    %223 = vector.shape_cast %222 : vector<2x1xf32> to vector<2x1xf32>
    %224 = vector.broadcast %223 : vector<2x1xf32> to vector<2x16xf32>
    %225 = tpu.concatenate %221, %224 in 1 : vector<2x16xf32>, vector<2x16xf32> -> vector<2x32xf32>
    %cst_40 = arith.constant dense<0.000000e+00> : vector<2x128xf32>
    %226 = tpu.matmul %212, %23, %cst_40 {dimension_numbers = #tpu.dot_dimension_numbers<[1], [0], [0], [1], [0, 0, 1, 1], [], []>} : vector<2x32xf32>, vector<32x128xf32>, vector<2x128xf32> -> vector<2x128xf32>
    %227 = arith.addf %218, %226 : vector<2x128xf32>
    %228 = arith.negf %227 : vector<2x128xf32>
    %229 = math.exp %228 : vector<2x128xf32>
    %cst_41 = arith.constant 1.000000e+00 : f32
    %230 = vector.broadcast %cst_41 : f32 to vector<2x128xf32>
    %231 = arith.addf %230, %229 : vector<2x128xf32>
    %232 = arith.divf %230, %231 : vector<2x128xf32>
    %233 = math.tanh %227 : vector<2x128xf32>
    %234 = vector.extract_strided_slice %232 {offsets = [0, 0], sizes = [2, 16], strides = [1, 1]} : vector<2x128xf32> to vector<2x16xf32>
    %235 = vector.extract_strided_slice %232 {offsets = [0, 64], sizes = [2, 16], strides = [1, 1]} : vector<2x128xf32> to vector<2x16xf32>
    %236 = tpu.concatenate %234, %235 in 1 : vector<2x16xf32>, vector<2x16xf32> -> vector<2x32xf32>
    %237 = vector.extract_strided_slice %232 {offsets = [0, 16], sizes = [2, 16], strides = [1, 1]} : vector<2x128xf32> to vector<2x16xf32>
    %238 = vector.extract_strided_slice %232 {offsets = [0, 80], sizes = [2, 16], strides = [1, 1]} : vector<2x128xf32> to vector<2x16xf32>
    %239 = tpu.concatenate %237, %238 in 1 : vector<2x16xf32>, vector<2x16xf32> -> vector<2x32xf32>
    %240 = vector.extract_strided_slice %233 {offsets = [0, 32], sizes = [2, 16], strides = [1, 1]} : vector<2x128xf32> to vector<2x16xf32>
    %241 = vector.extract_strided_slice %233 {offsets = [0, 96], sizes = [2, 16], strides = [1, 1]} : vector<2x128xf32> to vector<2x16xf32>
    %242 = tpu.concatenate %240, %241 in 1 : vector<2x16xf32>, vector<2x16xf32> -> vector<2x32xf32>
    %243 = vector.extract_strided_slice %232 {offsets = [0, 48], sizes = [2, 16], strides = [1, 1]} : vector<2x128xf32> to vector<2x16xf32>
    %244 = vector.extract_strided_slice %232 {offsets = [0, 112], sizes = [2, 16], strides = [1, 1]} : vector<2x128xf32> to vector<2x16xf32>
    %245 = tpu.concatenate %243, %244 in 1 : vector<2x16xf32>, vector<2x16xf32> -> vector<2x32xf32>
    %246 = arith.mulf %239, %215 : vector<2x32xf32>
    %247 = arith.mulf %236, %242 : vector<2x32xf32>
    %248 = arith.addf %246, %247 : vector<2x32xf32>
    %249 = math.tanh %248 : vector<2x32xf32>
    %250 = arith.mulf %245, %249 : vector<2x32xf32>
    %251 = arith.mulf %250, %225 : vector<2x32xf32>
    %252 = vector.extract_strided_slice %251 {offsets = [0, 0], sizes = [2, 16], strides = [1, 1]} : vector<2x32xf32> to vector<2x16xf32>
    %253 = vector.extract_strided_slice %251 {offsets = [0, 16], sizes = [2, 16], strides = [1, 1]} : vector<2x32xf32> to vector<2x16xf32>
    %cst_42 = arith.constant 1.000000e+00 : f32
    %254 = vector.broadcast %cst_42 : f32 to vector<2x32xf32>
    %255 = arith.subf %254, %225 : vector<2x32xf32>
    %256 = arith.mulf %225, %250 : vector<2x32xf32>
    %257 = arith.mulf %255, %212 : vector<2x32xf32>
    %258 = arith.addf %256, %257 : vector<2x32xf32>
    %259 = arith.mulf %225, %248 : vector<2x32xf32>
    %260 = arith.mulf %255, %215 : vector<2x32xf32>
    %261 = arith.addf %259, %260 : vector<2x32xf32>
    %262 = vector.extract_strided_slice %22 {offsets = [10, 0], sizes = [2, 64], strides = [1, 1]} : vector<16x128xf32> to vector<2x64xf32>
    %263 = vector.extract_strided_slice %22 {offsets = [4, 64], sizes = [2, 64], strides = [1, 1]} : vector<16x128xf32> to vector<2x64xf32>
    %264 = tpu.concatenate %262, %263 in 1 : vector<2x64xf32>, vector<2x64xf32> -> vector<2x128xf32>
    %265 = vector.extract_strided_slice %29 {offsets = [0, 5], sizes = [2, 1], strides = [1, 1]} : vector<2x8xf32> to vector<2x1xf32>
    %266 = vector.shape_cast %265 : vector<2x1xf32> to vector<2x1xf32>
    %267 = vector.broadcast %266 : vector<2x1xf32> to vector<2x16xf32>
    %268 = vector.extract_strided_slice %29 {offsets = [0, 2], sizes = [2, 1], strides = [1, 1]} : vector<2x8xf32> to vector<2x1xf32>
    %269 = vector.shape_cast %268 : vector<2x1xf32> to vector<2x1xf32>
    %270 = vector.broadcast %269 : vector<2x1xf32> to vector<2x16xf32>
    %271 = tpu.concatenate %267, %270 in 1 : vector<2x16xf32>, vector<2x16xf32> -> vector<2x32xf32>
    %cst_43 = arith.constant dense<0.000000e+00> : vector<2x128xf32>
    %272 = tpu.matmul %258, %23, %cst_43 {dimension_numbers = #tpu.dot_dimension_numbers<[1], [0], [0], [1], [0, 0, 1, 1], [], []>} : vector<2x32xf32>, vector<32x128xf32>, vector<2x128xf32> -> vector<2x128xf32>
    %273 = arith.addf %264, %272 : vector<2x128xf32>
    %274 = arith.negf %273 : vector<2x128xf32>
    %275 = math.exp %274 : vector<2x128xf32>
    %cst_44 = arith.constant 1.000000e+00 : f32
    %276 = vector.broadcast %cst_44 : f32 to vector<2x128xf32>
    %277 = arith.addf %276, %275 : vector<2x128xf32>
    %278 = arith.divf %276, %277 : vector<2x128xf32>
    %279 = math.tanh %273 : vector<2x128xf32>
    %280 = vector.extract_strided_slice %278 {offsets = [0, 0], sizes = [2, 16], strides = [1, 1]} : vector<2x128xf32> to vector<2x16xf32>
    %281 = vector.extract_strided_slice %278 {offsets = [0, 64], sizes = [2, 16], strides = [1, 1]} : vector<2x128xf32> to vector<2x16xf32>
    %282 = tpu.concatenate %280, %281 in 1 : vector<2x16xf32>, vector<2x16xf32> -> vector<2x32xf32>
    %283 = vector.extract_strided_slice %278 {offsets = [0, 16], sizes = [2, 16], strides = [1, 1]} : vector<2x128xf32> to vector<2x16xf32>
    %284 = vector.extract_strided_slice %278 {offsets = [0, 80], sizes = [2, 16], strides = [1, 1]} : vector<2x128xf32> to vector<2x16xf32>
    %285 = tpu.concatenate %283, %284 in 1 : vector<2x16xf32>, vector<2x16xf32> -> vector<2x32xf32>
    %286 = vector.extract_strided_slice %279 {offsets = [0, 32], sizes = [2, 16], strides = [1, 1]} : vector<2x128xf32> to vector<2x16xf32>
    %287 = vector.extract_strided_slice %279 {offsets = [0, 96], sizes = [2, 16], strides = [1, 1]} : vector<2x128xf32> to vector<2x16xf32>
    %288 = tpu.concatenate %286, %287 in 1 : vector<2x16xf32>, vector<2x16xf32> -> vector<2x32xf32>
    %289 = vector.extract_strided_slice %278 {offsets = [0, 48], sizes = [2, 16], strides = [1, 1]} : vector<2x128xf32> to vector<2x16xf32>
    %290 = vector.extract_strided_slice %278 {offsets = [0, 112], sizes = [2, 16], strides = [1, 1]} : vector<2x128xf32> to vector<2x16xf32>
    %291 = tpu.concatenate %289, %290 in 1 : vector<2x16xf32>, vector<2x16xf32> -> vector<2x32xf32>
    %292 = arith.mulf %285, %261 : vector<2x32xf32>
    %293 = arith.mulf %282, %288 : vector<2x32xf32>
    %294 = arith.addf %292, %293 : vector<2x32xf32>
    %295 = math.tanh %294 : vector<2x32xf32>
    %296 = arith.mulf %291, %295 : vector<2x32xf32>
    %297 = arith.mulf %296, %271 : vector<2x32xf32>
    %298 = vector.extract_strided_slice %297 {offsets = [0, 0], sizes = [2, 16], strides = [1, 1]} : vector<2x32xf32> to vector<2x16xf32>
    %299 = vector.extract_strided_slice %297 {offsets = [0, 16], sizes = [2, 16], strides = [1, 1]} : vector<2x32xf32> to vector<2x16xf32>
    %cst_45 = arith.constant 1.000000e+00 : f32
    %300 = vector.broadcast %cst_45 : f32 to vector<2x32xf32>
    %301 = arith.subf %300, %271 : vector<2x32xf32>
    %302 = arith.mulf %271, %296 : vector<2x32xf32>
    %303 = arith.mulf %301, %258 : vector<2x32xf32>
    %304 = arith.addf %302, %303 : vector<2x32xf32>
    %305 = arith.mulf %271, %294 : vector<2x32xf32>
    %306 = arith.mulf %301, %261 : vector<2x32xf32>
    %307 = arith.addf %305, %306 : vector<2x32xf32>
    %308 = vector.extract_strided_slice %22 {offsets = [12, 0], sizes = [2, 64], strides = [1, 1]} : vector<16x128xf32> to vector<2x64xf32>
    %309 = vector.extract_strided_slice %22 {offsets = [2, 64], sizes = [2, 64], strides = [1, 1]} : vector<16x128xf32> to vector<2x64xf32>
    %310 = tpu.concatenate %308, %309 in 1 : vector<2x64xf32>, vector<2x64xf32> -> vector<2x128xf32>
    %311 = vector.extract_strided_slice %29 {offsets = [0, 6], sizes = [2, 1], strides = [1, 1]} : vector<2x8xf32> to vector<2x1xf32>
    %312 = vector.shape_cast %311 : vector<2x1xf32> to vector<2x1xf32>
    %313 = vector.broadcast %312 : vector<2x1xf32> to vector<2x16xf32>
    %314 = vector.extract_strided_slice %29 {offsets = [0, 1], sizes = [2, 1], strides = [1, 1]} : vector<2x8xf32> to vector<2x1xf32>
    %315 = vector.shape_cast %314 : vector<2x1xf32> to vector<2x1xf32>
    %316 = vector.broadcast %315 : vector<2x1xf32> to vector<2x16xf32>
    %317 = tpu.concatenate %313, %316 in 1 : vector<2x16xf32>, vector<2x16xf32> -> vector<2x32xf32>
    %cst_46 = arith.constant dense<0.000000e+00> : vector<2x128xf32>
    %318 = tpu.matmul %304, %23, %cst_46 {dimension_numbers = #tpu.dot_dimension_numbers<[1], [0], [0], [1], [0, 0, 1, 1], [], []>} : vector<2x32xf32>, vector<32x128xf32>, vector<2x128xf32> -> vector<2x128xf32>
    %319 = arith.addf %310, %318 : vector<2x128xf32>
    %320 = arith.negf %319 : vector<2x128xf32>
    %321 = math.exp %320 : vector<2x128xf32>
    %cst_47 = arith.constant 1.000000e+00 : f32
    %322 = vector.broadcast %cst_47 : f32 to vector<2x128xf32>
    %323 = arith.addf %322, %321 : vector<2x128xf32>
    %324 = arith.divf %322, %323 : vector<2x128xf32>
    %325 = math.tanh %319 : vector<2x128xf32>
    %326 = vector.extract_strided_slice %324 {offsets = [0, 0], sizes = [2, 16], strides = [1, 1]} : vector<2x128xf32> to vector<2x16xf32>
    %327 = vector.extract_strided_slice %324 {offsets = [0, 64], sizes = [2, 16], strides = [1, 1]} : vector<2x128xf32> to vector<2x16xf32>
    %328 = tpu.concatenate %326, %327 in 1 : vector<2x16xf32>, vector<2x16xf32> -> vector<2x32xf32>
    %329 = vector.extract_strided_slice %324 {offsets = [0, 16], sizes = [2, 16], strides = [1, 1]} : vector<2x128xf32> to vector<2x16xf32>
    %330 = vector.extract_strided_slice %324 {offsets = [0, 80], sizes = [2, 16], strides = [1, 1]} : vector<2x128xf32> to vector<2x16xf32>
    %331 = tpu.concatenate %329, %330 in 1 : vector<2x16xf32>, vector<2x16xf32> -> vector<2x32xf32>
    %332 = vector.extract_strided_slice %325 {offsets = [0, 32], sizes = [2, 16], strides = [1, 1]} : vector<2x128xf32> to vector<2x16xf32>
    %333 = vector.extract_strided_slice %325 {offsets = [0, 96], sizes = [2, 16], strides = [1, 1]} : vector<2x128xf32> to vector<2x16xf32>
    %334 = tpu.concatenate %332, %333 in 1 : vector<2x16xf32>, vector<2x16xf32> -> vector<2x32xf32>
    %335 = vector.extract_strided_slice %324 {offsets = [0, 48], sizes = [2, 16], strides = [1, 1]} : vector<2x128xf32> to vector<2x16xf32>
    %336 = vector.extract_strided_slice %324 {offsets = [0, 112], sizes = [2, 16], strides = [1, 1]} : vector<2x128xf32> to vector<2x16xf32>
    %337 = tpu.concatenate %335, %336 in 1 : vector<2x16xf32>, vector<2x16xf32> -> vector<2x32xf32>
    %338 = arith.mulf %331, %307 : vector<2x32xf32>
    %339 = arith.mulf %328, %334 : vector<2x32xf32>
    %340 = arith.addf %338, %339 : vector<2x32xf32>
    %341 = math.tanh %340 : vector<2x32xf32>
    %342 = arith.mulf %337, %341 : vector<2x32xf32>
    %343 = arith.mulf %342, %317 : vector<2x32xf32>
    %344 = vector.extract_strided_slice %343 {offsets = [0, 0], sizes = [2, 16], strides = [1, 1]} : vector<2x32xf32> to vector<2x16xf32>
    %345 = vector.extract_strided_slice %343 {offsets = [0, 16], sizes = [2, 16], strides = [1, 1]} : vector<2x32xf32> to vector<2x16xf32>
    %cst_48 = arith.constant 1.000000e+00 : f32
    %346 = vector.broadcast %cst_48 : f32 to vector<2x32xf32>
    %347 = arith.subf %346, %317 : vector<2x32xf32>
    %348 = arith.mulf %317, %342 : vector<2x32xf32>
    %349 = arith.mulf %347, %304 : vector<2x32xf32>
    %350 = arith.addf %348, %349 : vector<2x32xf32>
    %351 = arith.mulf %317, %340 : vector<2x32xf32>
    %352 = arith.mulf %347, %307 : vector<2x32xf32>
    %353 = arith.addf %351, %352 : vector<2x32xf32>
    %354 = vector.extract_strided_slice %22 {offsets = [14, 0], sizes = [2, 64], strides = [1, 1]} : vector<16x128xf32> to vector<2x64xf32>
    %355 = vector.extract_strided_slice %22 {offsets = [0, 64], sizes = [2, 64], strides = [1, 1]} : vector<16x128xf32> to vector<2x64xf32>
    %356 = tpu.concatenate %354, %355 in 1 : vector<2x64xf32>, vector<2x64xf32> -> vector<2x128xf32>
    %357 = vector.extract_strided_slice %29 {offsets = [0, 7], sizes = [2, 1], strides = [1, 1]} : vector<2x8xf32> to vector<2x1xf32>
    %358 = vector.shape_cast %357 : vector<2x1xf32> to vector<2x1xf32>
    %359 = vector.broadcast %358 : vector<2x1xf32> to vector<2x16xf32>
    %360 = vector.extract_strided_slice %29 {offsets = [0, 0], sizes = [2, 1], strides = [1, 1]} : vector<2x8xf32> to vector<2x1xf32>
    %361 = vector.shape_cast %360 : vector<2x1xf32> to vector<2x1xf32>
    %362 = vector.broadcast %361 : vector<2x1xf32> to vector<2x16xf32>
    %363 = tpu.concatenate %359, %362 in 1 : vector<2x16xf32>, vector<2x16xf32> -> vector<2x32xf32>
    %cst_49 = arith.constant dense<0.000000e+00> : vector<2x128xf32>
    %364 = tpu.matmul %350, %23, %cst_49 {dimension_numbers = #tpu.dot_dimension_numbers<[1], [0], [0], [1], [0, 0, 1, 1], [], []>} : vector<2x32xf32>, vector<32x128xf32>, vector<2x128xf32> -> vector<2x128xf32>
    %365 = arith.addf %356, %364 : vector<2x128xf32>
    %366 = arith.negf %365 : vector<2x128xf32>
    %367 = math.exp %366 : vector<2x128xf32>
    %cst_50 = arith.constant 1.000000e+00 : f32
    %368 = vector.broadcast %cst_50 : f32 to vector<2x128xf32>
    %369 = arith.addf %368, %367 : vector<2x128xf32>
    %370 = arith.divf %368, %369 : vector<2x128xf32>
    %371 = math.tanh %365 : vector<2x128xf32>
    %372 = vector.extract_strided_slice %370 {offsets = [0, 0], sizes = [2, 16], strides = [1, 1]} : vector<2x128xf32> to vector<2x16xf32>
    %373 = vector.extract_strided_slice %370 {offsets = [0, 64], sizes = [2, 16], strides = [1, 1]} : vector<2x128xf32> to vector<2x16xf32>
    %374 = tpu.concatenate %372, %373 in 1 : vector<2x16xf32>, vector<2x16xf32> -> vector<2x32xf32>
    %375 = vector.extract_strided_slice %370 {offsets = [0, 16], sizes = [2, 16], strides = [1, 1]} : vector<2x128xf32> to vector<2x16xf32>
    %376 = vector.extract_strided_slice %370 {offsets = [0, 80], sizes = [2, 16], strides = [1, 1]} : vector<2x128xf32> to vector<2x16xf32>
    %377 = tpu.concatenate %375, %376 in 1 : vector<2x16xf32>, vector<2x16xf32> -> vector<2x32xf32>
    %378 = vector.extract_strided_slice %371 {offsets = [0, 32], sizes = [2, 16], strides = [1, 1]} : vector<2x128xf32> to vector<2x16xf32>
    %379 = vector.extract_strided_slice %371 {offsets = [0, 96], sizes = [2, 16], strides = [1, 1]} : vector<2x128xf32> to vector<2x16xf32>
    %380 = tpu.concatenate %378, %379 in 1 : vector<2x16xf32>, vector<2x16xf32> -> vector<2x32xf32>
    %381 = vector.extract_strided_slice %370 {offsets = [0, 48], sizes = [2, 16], strides = [1, 1]} : vector<2x128xf32> to vector<2x16xf32>
    %382 = vector.extract_strided_slice %370 {offsets = [0, 112], sizes = [2, 16], strides = [1, 1]} : vector<2x128xf32> to vector<2x16xf32>
    %383 = tpu.concatenate %381, %382 in 1 : vector<2x16xf32>, vector<2x16xf32> -> vector<2x32xf32>
    %384 = arith.mulf %377, %353 : vector<2x32xf32>
    %385 = arith.mulf %374, %380 : vector<2x32xf32>
    %386 = arith.addf %384, %385 : vector<2x32xf32>
    %387 = math.tanh %386 : vector<2x32xf32>
    %388 = arith.mulf %383, %387 : vector<2x32xf32>
    %389 = arith.mulf %388, %363 : vector<2x32xf32>
    %390 = vector.extract_strided_slice %389 {offsets = [0, 0], sizes = [2, 16], strides = [1, 1]} : vector<2x32xf32> to vector<2x16xf32>
    %391 = vector.extract_strided_slice %389 {offsets = [0, 16], sizes = [2, 16], strides = [1, 1]} : vector<2x32xf32> to vector<2x16xf32>
    %392 = tpu.concatenate %68, %391 in 1 : vector<2x16xf32>, vector<2x16xf32> -> vector<2x32xf32>
    %393 = tpu.concatenate %114, %345 in 1 : vector<2x16xf32>, vector<2x16xf32> -> vector<2x32xf32>
    %394 = tpu.concatenate %160, %299 in 1 : vector<2x16xf32>, vector<2x16xf32> -> vector<2x32xf32>
    %395 = tpu.concatenate %206, %253 in 1 : vector<2x16xf32>, vector<2x16xf32> -> vector<2x32xf32>
    %396 = tpu.concatenate %252, %207 in 1 : vector<2x16xf32>, vector<2x16xf32> -> vector<2x32xf32>
    %397 = tpu.concatenate %298, %161 in 1 : vector<2x16xf32>, vector<2x16xf32> -> vector<2x32xf32>
    %398 = tpu.concatenate %344, %115 in 1 : vector<2x16xf32>, vector<2x16xf32> -> vector<2x32xf32>
    %399 = tpu.concatenate %390, %69 in 1 : vector<2x16xf32>, vector<2x16xf32> -> vector<2x32xf32>
    %400 = vector.extract_strided_slice %392 {offsets = [0, 0], sizes = [1, 32], strides = [1, 1]} : vector<2x32xf32> to vector<1x32xf32>
    %401 = vector.extract_strided_slice %393 {offsets = [0, 0], sizes = [1, 32], strides = [1, 1]} : vector<2x32xf32> to vector<1x32xf32>
    %402 = vector.extract_strided_slice %394 {offsets = [0, 0], sizes = [1, 32], strides = [1, 1]} : vector<2x32xf32> to vector<1x32xf32>
    %403 = vector.extract_strided_slice %395 {offsets = [0, 0], sizes = [1, 32], strides = [1, 1]} : vector<2x32xf32> to vector<1x32xf32>
    %404 = vector.extract_strided_slice %396 {offsets = [0, 0], sizes = [1, 32], strides = [1, 1]} : vector<2x32xf32> to vector<1x32xf32>
    %405 = vector.extract_strided_slice %397 {offsets = [0, 0], sizes = [1, 32], strides = [1, 1]} : vector<2x32xf32> to vector<1x32xf32>
    %406 = vector.extract_strided_slice %398 {offsets = [0, 0], sizes = [1, 32], strides = [1, 1]} : vector<2x32xf32> to vector<1x32xf32>
    %407 = vector.extract_strided_slice %399 {offsets = [0, 0], sizes = [1, 32], strides = [1, 1]} : vector<2x32xf32> to vector<1x32xf32>
    %408 = tpu.concatenate %400, %401, %402, %403, %404, %405, %406, %407 in 0 : vector<1x32xf32>, vector<1x32xf32>, vector<1x32xf32>, vector<1x32xf32>, vector<1x32xf32>, vector<1x32xf32>, vector<1x32xf32>, vector<1x32xf32> -> vector<8x32xf32>
    %409 = vector.extract_strided_slice %392 {offsets = [1, 0], sizes = [1, 32], strides = [1, 1]} : vector<2x32xf32> to vector<1x32xf32>
    %410 = vector.extract_strided_slice %393 {offsets = [1, 0], sizes = [1, 32], strides = [1, 1]} : vector<2x32xf32> to vector<1x32xf32>
    %411 = vector.extract_strided_slice %394 {offsets = [1, 0], sizes = [1, 32], strides = [1, 1]} : vector<2x32xf32> to vector<1x32xf32>
    %412 = vector.extract_strided_slice %395 {offsets = [1, 0], sizes = [1, 32], strides = [1, 1]} : vector<2x32xf32> to vector<1x32xf32>
    %413 = vector.extract_strided_slice %396 {offsets = [1, 0], sizes = [1, 32], strides = [1, 1]} : vector<2x32xf32> to vector<1x32xf32>
    %414 = vector.extract_strided_slice %397 {offsets = [1, 0], sizes = [1, 32], strides = [1, 1]} : vector<2x32xf32> to vector<1x32xf32>
    %415 = vector.extract_strided_slice %398 {offsets = [1, 0], sizes = [1, 32], strides = [1, 1]} : vector<2x32xf32> to vector<1x32xf32>
    %416 = vector.extract_strided_slice %399 {offsets = [1, 0], sizes = [1, 32], strides = [1, 1]} : vector<2x32xf32> to vector<1x32xf32>
    %417 = tpu.concatenate %409, %410, %411, %412, %413, %414, %415, %416 in 0 : vector<1x32xf32>, vector<1x32xf32>, vector<1x32xf32>, vector<1x32xf32>, vector<1x32xf32>, vector<1x32xf32>, vector<1x32xf32>, vector<1x32xf32> -> vector<8x32xf32>
    %418 = vector.shape_cast %408 : vector<8x32xf32> to vector<1x8x32xf32>
    %419 = vector.shape_cast %417 : vector<8x32xf32> to vector<1x8x32xf32>
    %420 = tpu.concatenate %418, %419 in 0 : vector<1x8x32xf32>, vector<1x8x32xf32> -> vector<2x8x32xf32>
    %c0_51 = arith.constant 0 : index
    %c0_52 = arith.constant 0 : index
    %421 = vector.load %arg10[%c0_51, %c0_52] : memref<64x128xf32, #tpu.memory_space<vmem>>, vector<64x128xf32>
    %c0_53 = arith.constant 0 : index
    %c0_54 = arith.constant 0 : index
    %422 = vector.load %arg12[%c0_53, %c0_54] : memref<32x12xf32, #tpu.memory_space<vmem>>, vector<32x12xf32>
    %c0_55 = arith.constant 0 : index
    %c0_56 = arith.constant 0 : index
    %423 = vector.load %arg13[%c0_55, %c0_56] : memref<1x12xf32, #tpu.memory_space<vmem>>, vector<1x12xf32>
    %424 = vector.shape_cast %423 : vector<1x12xf32> to vector<1x12xf32>
    %425 = vector.broadcast %424 : vector<1x12xf32> to vector<2x12xf32>
    %426 = tpu.iota {dimensions = array<i32: 2>} : vector<2x4x8xi32>
    %427 = arith.sitofp %426 : vector<2x4x8xi32> to vector<2x4x8xf32>
    %cst_57 = arith.constant 1.500000e+00 : f32
    %428 = vector.broadcast %cst_57 : f32 to vector<2x4x8xf32>
    %429 = arith.addf %427, %428 : vector<2x4x8xf32>
    %cst_58 = arith.constant 5.000000e-01 : f32
    %430 = vector.broadcast %cst_58 : f32 to vector<2x4x8xf32>
    %431 = arith.addf %427, %430 : vector<2x4x8xf32>
    %432 = tpu.concatenate %429, %431 in 2 : vector<2x4x8xf32>, vector<2x4x8xf32> -> vector<2x4x16xf32>
    %433 = tpu.iota {dimensions = array<i32: 1>} : vector<1x12xi32>
    %c4_i32 = arith.constant 4 : i32
    %434 = vector.broadcast %c4_i32 : i32 to vector<1x12xi32>
    %435 = arith.cmpi sge, %433, %434 : vector<1x12xi32>
    %c8_i32 = arith.constant 8 : i32
    %436 = vector.broadcast %c8_i32 : i32 to vector<1x12xi32>
    %437 = arith.cmpi slt, %433, %436 : vector<1x12xi32>
    %438 = arith.andi %435, %437 : vector<1x12xi1>
    %cst_59 = arith.constant -1.000000e+00 : f32
    %cst_60 = arith.constant 1.000000e+00 : f32
    %439 = vector.broadcast %cst_59 : f32 to vector<1x12xf32>
    %440 = vector.broadcast %cst_60 : f32 to vector<1x12xf32>
    %441 = arith.select %438, %439, %440 : vector<1x12xi1>, vector<1x12xf32>
    %c8_i32_61 = arith.constant 8 : i32
    %442 = vector.broadcast %c8_i32_61 : i32 to vector<1x12xi32>
    %443 = arith.cmpi sge, %433, %442 : vector<1x12xi32>
    %444 = arith.extui %443 : vector<1x12xi1> to vector<1x12xi32>
    %445 = arith.sitofp %444 : vector<1x12xi32> to vector<1x12xf32>
    %cst_62 = arith.constant 0.000000e+00 : f32
    %446 = vector.broadcast %cst_62 : f32 to vector<2x32xf32>
    %cst_63 = arith.constant 0.000000e+00 : f32
    %447 = vector.broadcast %cst_63 : f32 to vector<2x32xf32>
    %cst_64 = arith.constant 0.000000e+00 : f32
    %448 = vector.broadcast %cst_64 : f32 to vector<2x32xf32>
    %cst_65 = arith.constant 0.000000e+00 : f32
    %449 = vector.broadcast %cst_65 : f32 to vector<2x4xf32>
    %450 = vector.extract_strided_slice %21 {offsets = [0, 0], sizes = [2, 128], strides = [1, 1]} : vector<16x128xf32> to vector<2x128xf32>
    %451 = tpu.concatenate %448, %446 in 1 : vector<2x32xf32>, vector<2x32xf32> -> vector<2x64xf32>
    %cst_66 = arith.constant dense<0.000000e+00> : vector<2x128xf32>
    %452 = tpu.matmul %451, %421, %cst_66 {dimension_numbers = #tpu.dot_dimension_numbers<[1], [0], [0], [1], [0, 0, 1, 1], [], []>} : vector<2x64xf32>, vector<64x128xf32>, vector<2x128xf32> -> vector<2x128xf32>
    %453 = arith.addf %450, %452 : vector<2x128xf32>
    %454 = arith.negf %453 : vector<2x128xf32>
    %455 = math.exp %454 : vector<2x128xf32>
    %cst_67 = arith.constant 1.000000e+00 : f32
    %456 = vector.broadcast %cst_67 : f32 to vector<2x128xf32>
    %457 = arith.addf %456, %455 : vector<2x128xf32>
    %458 = arith.divf %456, %457 : vector<2x128xf32>
    %459 = math.tanh %453 : vector<2x128xf32>
    %460 = vector.extract_strided_slice %458 {offsets = [0, 32], sizes = [2, 32], strides = [1, 1]} : vector<2x128xf32> to vector<2x32xf32>
    %461 = arith.mulf %460, %447 : vector<2x32xf32>
    %462 = vector.extract_strided_slice %458 {offsets = [0, 0], sizes = [2, 32], strides = [1, 1]} : vector<2x128xf32> to vector<2x32xf32>
    %463 = vector.extract_strided_slice %459 {offsets = [0, 64], sizes = [2, 32], strides = [1, 1]} : vector<2x128xf32> to vector<2x32xf32>
    %464 = arith.mulf %462, %463 : vector<2x32xf32>
    %465 = arith.addf %461, %464 : vector<2x32xf32>
    %466 = vector.extract_strided_slice %458 {offsets = [0, 96], sizes = [2, 32], strides = [1, 1]} : vector<2x128xf32> to vector<2x32xf32>
    %467 = math.tanh %465 : vector<2x32xf32>
    %468 = arith.mulf %466, %467 : vector<2x32xf32>
    %cst_68 = arith.constant dense<0.000000e+00> : vector<2x12xf32>
    %469 = tpu.matmul %468, %422, %cst_68 {dimension_numbers = #tpu.dot_dimension_numbers<[1], [0], [0], [1], [0, 0, 1, 1], [], []>} : vector<2x32xf32>, vector<32x12xf32>, vector<2x12xf32> -> vector<2x12xf32>
    %470 = arith.addf %469, %425 : vector<2x12xf32>
    %471 = vector.extract_strided_slice %470 {offsets = [0, 8], sizes = [2, 4], strides = [1, 1]} : vector<2x12xf32> to vector<2x4xf32>
    %cst_69 = arith.constant dense<0xFF800000> : vector<2xf32>
    %472 = vector.multi_reduction <maximumf>, %471, %cst_69 [1] : vector<2x4xf32> to vector<2xf32>
    %473 = vector.shape_cast %472 : vector<2xf32> to vector<2x1xf32>
    %474 = vector.broadcast %441 : vector<1x12xf32> to vector<2x12xf32>
    %475 = arith.mulf %470, %474 : vector<2x12xf32>
    %476 = vector.broadcast %473 : vector<2x1xf32> to vector<2x12xf32>
    %477 = vector.broadcast %445 : vector<1x12xf32> to vector<2x12xf32>
    %478 = arith.mulf %476, %477 : vector<2x12xf32>
    %479 = arith.subf %475, %478 : vector<2x12xf32>
    %480 = math.exp %479 : vector<2x12xf32>
    %481 = vector.extract_strided_slice %480 {offsets = [0, 0], sizes = [2, 4], strides = [1, 1]} : vector<2x12xf32> to vector<2x4xf32>
    %482 = arith.addf %449, %481 : vector<2x4xf32>
    %483 = vector.extract_strided_slice %480 {offsets = [0, 4], sizes = [2, 4], strides = [1, 1]} : vector<2x12xf32> to vector<2x4xf32>
    %484 = vector.extract_strided_slice %480 {offsets = [0, 8], sizes = [2, 4], strides = [1, 1]} : vector<2x12xf32> to vector<2x4xf32>
    %cst_70 = arith.constant dense<0.000000e+00> : vector<2xf32>
    %485 = vector.multi_reduction <add>, %484, %cst_70 [1] : vector<2x4xf32> to vector<2xf32>
    %486 = vector.shape_cast %485 : vector<2xf32> to vector<2x1xf32>
    %487 = vector.broadcast %486 : vector<2x1xf32> to vector<2x4xf32>
    %488 = arith.divf %484, %487 : vector<2x4xf32>
    %489 = vector.shape_cast %482 : vector<2x4xf32> to vector<2x4x1xf32>
    %490 = vector.broadcast %489 : vector<2x4x1xf32> to vector<2x4x16xf32>
    %491 = arith.subf %432, %490 : vector<2x4x16xf32>
    %492 = vector.shape_cast %483 : vector<2x4xf32> to vector<2x4x1xf32>
    %493 = vector.broadcast %492 : vector<2x4x1xf32> to vector<2x4x16xf32>
    %494 = arith.mulf %491, %493 : vector<2x4x16xf32>
    %495 = arith.negf %494 : vector<2x4x16xf32>
    %496 = math.exp %495 : vector<2x4x16xf32>
    %cst_71 = arith.constant 1.000000e+00 : f32
    %497 = vector.broadcast %cst_71 : f32 to vector<2x4x16xf32>
    %498 = arith.addf %497, %496 : vector<2x4x16xf32>
    %499 = arith.divf %497, %498 : vector<2x4x16xf32>
    %500 = vector.shape_cast %488 : vector<2x4xf32> to vector<2x4x1xf32>
    %501 = vector.extract_strided_slice %499 {offsets = [0, 0, 0], sizes = [2, 4, 8], strides = [1, 1, 1]} : vector<2x4x16xf32> to vector<2x4x8xf32>
    %502 = vector.extract_strided_slice %499 {offsets = [0, 0, 8], sizes = [2, 4, 8], strides = [1, 1, 1]} : vector<2x4x16xf32> to vector<2x4x8xf32>
    %503 = arith.subf %501, %502 : vector<2x4x8xf32>
    %504 = vector.broadcast %500 : vector<2x4x1xf32> to vector<2x4x8xf32>
    %505 = arith.mulf %504, %503 : vector<2x4x8xf32>
    %cst_72 = arith.constant dense<0.000000e+00> : vector<2x8xf32>
    %506 = vector.multi_reduction <add>, %505, %cst_72 [1] : vector<2x4x8xf32> to vector<2x8xf32>
    %507 = vector.shape_cast %506 : vector<2x8xf32> to vector<2x8x1xf32>
    %508 = vector.broadcast %507 : vector<2x8x1xf32> to vector<2x8x32xf32>
    %509 = arith.mulf %508, %420 : vector<2x8x32xf32>
    %cst_73 = arith.constant dense<0.000000e+00> : vector<2x32xf32>
    %510 = vector.multi_reduction <add>, %509, %cst_73 [1] : vector<2x8x32xf32> to vector<2x32xf32>
    %511 = vector.extract_strided_slice %16 {offsets = [0, 0], sizes = [2, 32], strides = [1, 1]} : vector<16x32xf32> to vector<2x32xf32>
    %512 = arith.addf %510, %511 : vector<2x32xf32>
    %513 = vector.extract_strided_slice %21 {offsets = [2, 0], sizes = [2, 128], strides = [1, 1]} : vector<16x128xf32> to vector<2x128xf32>
    %514 = tpu.concatenate %510, %468 in 1 : vector<2x32xf32>, vector<2x32xf32> -> vector<2x64xf32>
    %cst_74 = arith.constant dense<0.000000e+00> : vector<2x128xf32>
    %515 = tpu.matmul %514, %421, %cst_74 {dimension_numbers = #tpu.dot_dimension_numbers<[1], [0], [0], [1], [0, 0, 1, 1], [], []>} : vector<2x64xf32>, vector<64x128xf32>, vector<2x128xf32> -> vector<2x128xf32>
    %516 = arith.addf %513, %515 : vector<2x128xf32>
    %517 = arith.negf %516 : vector<2x128xf32>
    %518 = math.exp %517 : vector<2x128xf32>
    %cst_75 = arith.constant 1.000000e+00 : f32
    %519 = vector.broadcast %cst_75 : f32 to vector<2x128xf32>
    %520 = arith.addf %519, %518 : vector<2x128xf32>
    %521 = arith.divf %519, %520 : vector<2x128xf32>
    %522 = math.tanh %516 : vector<2x128xf32>
    %523 = vector.extract_strided_slice %521 {offsets = [0, 32], sizes = [2, 32], strides = [1, 1]} : vector<2x128xf32> to vector<2x32xf32>
    %524 = arith.mulf %523, %465 : vector<2x32xf32>
    %525 = vector.extract_strided_slice %521 {offsets = [0, 0], sizes = [2, 32], strides = [1, 1]} : vector<2x128xf32> to vector<2x32xf32>
    %526 = vector.extract_strided_slice %522 {offsets = [0, 64], sizes = [2, 32], strides = [1, 1]} : vector<2x128xf32> to vector<2x32xf32>
    %527 = arith.mulf %525, %526 : vector<2x32xf32>
    %528 = arith.addf %524, %527 : vector<2x32xf32>
    %529 = vector.extract_strided_slice %521 {offsets = [0, 96], sizes = [2, 32], strides = [1, 1]} : vector<2x128xf32> to vector<2x32xf32>
    %530 = math.tanh %528 : vector<2x32xf32>
    %531 = arith.mulf %529, %530 : vector<2x32xf32>
    %cst_76 = arith.constant dense<0.000000e+00> : vector<2x12xf32>
    %532 = tpu.matmul %531, %422, %cst_76 {dimension_numbers = #tpu.dot_dimension_numbers<[1], [0], [0], [1], [0, 0, 1, 1], [], []>} : vector<2x32xf32>, vector<32x12xf32>, vector<2x12xf32> -> vector<2x12xf32>
    %533 = arith.addf %532, %425 : vector<2x12xf32>
    %534 = vector.extract_strided_slice %533 {offsets = [0, 8], sizes = [2, 4], strides = [1, 1]} : vector<2x12xf32> to vector<2x4xf32>
    %cst_77 = arith.constant dense<0xFF800000> : vector<2xf32>
    %535 = vector.multi_reduction <maximumf>, %534, %cst_77 [1] : vector<2x4xf32> to vector<2xf32>
    %536 = vector.shape_cast %535 : vector<2xf32> to vector<2x1xf32>
    %537 = vector.broadcast %441 : vector<1x12xf32> to vector<2x12xf32>
    %538 = arith.mulf %533, %537 : vector<2x12xf32>
    %539 = vector.broadcast %536 : vector<2x1xf32> to vector<2x12xf32>
    %540 = vector.broadcast %445 : vector<1x12xf32> to vector<2x12xf32>
    %541 = arith.mulf %539, %540 : vector<2x12xf32>
    %542 = arith.subf %538, %541 : vector<2x12xf32>
    %543 = math.exp %542 : vector<2x12xf32>
    %544 = vector.extract_strided_slice %543 {offsets = [0, 0], sizes = [2, 4], strides = [1, 1]} : vector<2x12xf32> to vector<2x4xf32>
    %545 = arith.addf %482, %544 : vector<2x4xf32>
    %546 = vector.extract_strided_slice %543 {offsets = [0, 4], sizes = [2, 4], strides = [1, 1]} : vector<2x12xf32> to vector<2x4xf32>
    %547 = vector.extract_strided_slice %543 {offsets = [0, 8], sizes = [2, 4], strides = [1, 1]} : vector<2x12xf32> to vector<2x4xf32>
    %cst_78 = arith.constant dense<0.000000e+00> : vector<2xf32>
    %548 = vector.multi_reduction <add>, %547, %cst_78 [1] : vector<2x4xf32> to vector<2xf32>
    %549 = vector.shape_cast %548 : vector<2xf32> to vector<2x1xf32>
    %550 = vector.broadcast %549 : vector<2x1xf32> to vector<2x4xf32>
    %551 = arith.divf %547, %550 : vector<2x4xf32>
    %552 = vector.shape_cast %545 : vector<2x4xf32> to vector<2x4x1xf32>
    %553 = vector.broadcast %552 : vector<2x4x1xf32> to vector<2x4x16xf32>
    %554 = arith.subf %432, %553 : vector<2x4x16xf32>
    %555 = vector.shape_cast %546 : vector<2x4xf32> to vector<2x4x1xf32>
    %556 = vector.broadcast %555 : vector<2x4x1xf32> to vector<2x4x16xf32>
    %557 = arith.mulf %554, %556 : vector<2x4x16xf32>
    %558 = arith.negf %557 : vector<2x4x16xf32>
    %559 = math.exp %558 : vector<2x4x16xf32>
    %cst_79 = arith.constant 1.000000e+00 : f32
    %560 = vector.broadcast %cst_79 : f32 to vector<2x4x16xf32>
    %561 = arith.addf %560, %559 : vector<2x4x16xf32>
    %562 = arith.divf %560, %561 : vector<2x4x16xf32>
    %563 = vector.shape_cast %551 : vector<2x4xf32> to vector<2x4x1xf32>
    %564 = vector.extract_strided_slice %562 {offsets = [0, 0, 0], sizes = [2, 4, 8], strides = [1, 1, 1]} : vector<2x4x16xf32> to vector<2x4x8xf32>
    %565 = vector.extract_strided_slice %562 {offsets = [0, 0, 8], sizes = [2, 4, 8], strides = [1, 1, 1]} : vector<2x4x16xf32> to vector<2x4x8xf32>
    %566 = arith.subf %564, %565 : vector<2x4x8xf32>
    %567 = vector.broadcast %563 : vector<2x4x1xf32> to vector<2x4x8xf32>
    %568 = arith.mulf %567, %566 : vector<2x4x8xf32>
    %cst_80 = arith.constant dense<0.000000e+00> : vector<2x8xf32>
    %569 = vector.multi_reduction <add>, %568, %cst_80 [1] : vector<2x4x8xf32> to vector<2x8xf32>
    %570 = vector.shape_cast %569 : vector<2x8xf32> to vector<2x8x1xf32>
    %571 = vector.broadcast %570 : vector<2x8x1xf32> to vector<2x8x32xf32>
    %572 = arith.mulf %571, %420 : vector<2x8x32xf32>
    %cst_81 = arith.constant dense<0.000000e+00> : vector<2x32xf32>
    %573 = vector.multi_reduction <add>, %572, %cst_81 [1] : vector<2x8x32xf32> to vector<2x32xf32>
    %574 = vector.extract_strided_slice %16 {offsets = [2, 0], sizes = [2, 32], strides = [1, 1]} : vector<16x32xf32> to vector<2x32xf32>
    %575 = arith.addf %573, %574 : vector<2x32xf32>
    %576 = vector.extract_strided_slice %21 {offsets = [4, 0], sizes = [2, 128], strides = [1, 1]} : vector<16x128xf32> to vector<2x128xf32>
    %577 = tpu.concatenate %573, %531 in 1 : vector<2x32xf32>, vector<2x32xf32> -> vector<2x64xf32>
    %cst_82 = arith.constant dense<0.000000e+00> : vector<2x128xf32>
    %578 = tpu.matmul %577, %421, %cst_82 {dimension_numbers = #tpu.dot_dimension_numbers<[1], [0], [0], [1], [0, 0, 1, 1], [], []>} : vector<2x64xf32>, vector<64x128xf32>, vector<2x128xf32> -> vector<2x128xf32>
    %579 = arith.addf %576, %578 : vector<2x128xf32>
    %580 = arith.negf %579 : vector<2x128xf32>
    %581 = math.exp %580 : vector<2x128xf32>
    %cst_83 = arith.constant 1.000000e+00 : f32
    %582 = vector.broadcast %cst_83 : f32 to vector<2x128xf32>
    %583 = arith.addf %582, %581 : vector<2x128xf32>
    %584 = arith.divf %582, %583 : vector<2x128xf32>
    %585 = math.tanh %579 : vector<2x128xf32>
    %586 = vector.extract_strided_slice %584 {offsets = [0, 32], sizes = [2, 32], strides = [1, 1]} : vector<2x128xf32> to vector<2x32xf32>
    %587 = arith.mulf %586, %528 : vector<2x32xf32>
    %588 = vector.extract_strided_slice %584 {offsets = [0, 0], sizes = [2, 32], strides = [1, 1]} : vector<2x128xf32> to vector<2x32xf32>
    %589 = vector.extract_strided_slice %585 {offsets = [0, 64], sizes = [2, 32], strides = [1, 1]} : vector<2x128xf32> to vector<2x32xf32>
    %590 = arith.mulf %588, %589 : vector<2x32xf32>
    %591 = arith.addf %587, %590 : vector<2x32xf32>
    %592 = vector.extract_strided_slice %584 {offsets = [0, 96], sizes = [2, 32], strides = [1, 1]} : vector<2x128xf32> to vector<2x32xf32>
    %593 = math.tanh %591 : vector<2x32xf32>
    %594 = arith.mulf %592, %593 : vector<2x32xf32>
    %cst_84 = arith.constant dense<0.000000e+00> : vector<2x12xf32>
    %595 = tpu.matmul %594, %422, %cst_84 {dimension_numbers = #tpu.dot_dimension_numbers<[1], [0], [0], [1], [0, 0, 1, 1], [], []>} : vector<2x32xf32>, vector<32x12xf32>, vector<2x12xf32> -> vector<2x12xf32>
    %596 = arith.addf %595, %425 : vector<2x12xf32>
    %597 = vector.extract_strided_slice %596 {offsets = [0, 8], sizes = [2, 4], strides = [1, 1]} : vector<2x12xf32> to vector<2x4xf32>
    %cst_85 = arith.constant dense<0xFF800000> : vector<2xf32>
    %598 = vector.multi_reduction <maximumf>, %597, %cst_85 [1] : vector<2x4xf32> to vector<2xf32>
    %599 = vector.shape_cast %598 : vector<2xf32> to vector<2x1xf32>
    %600 = vector.broadcast %441 : vector<1x12xf32> to vector<2x12xf32>
    %601 = arith.mulf %596, %600 : vector<2x12xf32>
    %602 = vector.broadcast %599 : vector<2x1xf32> to vector<2x12xf32>
    %603 = vector.broadcast %445 : vector<1x12xf32> to vector<2x12xf32>
    %604 = arith.mulf %602, %603 : vector<2x12xf32>
    %605 = arith.subf %601, %604 : vector<2x12xf32>
    %606 = math.exp %605 : vector<2x12xf32>
    %607 = vector.extract_strided_slice %606 {offsets = [0, 0], sizes = [2, 4], strides = [1, 1]} : vector<2x12xf32> to vector<2x4xf32>
    %608 = arith.addf %545, %607 : vector<2x4xf32>
    %609 = vector.extract_strided_slice %606 {offsets = [0, 4], sizes = [2, 4], strides = [1, 1]} : vector<2x12xf32> to vector<2x4xf32>
    %610 = vector.extract_strided_slice %606 {offsets = [0, 8], sizes = [2, 4], strides = [1, 1]} : vector<2x12xf32> to vector<2x4xf32>
    %cst_86 = arith.constant dense<0.000000e+00> : vector<2xf32>
    %611 = vector.multi_reduction <add>, %610, %cst_86 [1] : vector<2x4xf32> to vector<2xf32>
    %612 = vector.shape_cast %611 : vector<2xf32> to vector<2x1xf32>
    %613 = vector.broadcast %612 : vector<2x1xf32> to vector<2x4xf32>
    %614 = arith.divf %610, %613 : vector<2x4xf32>
    %615 = vector.shape_cast %608 : vector<2x4xf32> to vector<2x4x1xf32>
    %616 = vector.broadcast %615 : vector<2x4x1xf32> to vector<2x4x16xf32>
    %617 = arith.subf %432, %616 : vector<2x4x16xf32>
    %618 = vector.shape_cast %609 : vector<2x4xf32> to vector<2x4x1xf32>
    %619 = vector.broadcast %618 : vector<2x4x1xf32> to vector<2x4x16xf32>
    %620 = arith.mulf %617, %619 : vector<2x4x16xf32>
    %621 = arith.negf %620 : vector<2x4x16xf32>
    %622 = math.exp %621 : vector<2x4x16xf32>
    %cst_87 = arith.constant 1.000000e+00 : f32
    %623 = vector.broadcast %cst_87 : f32 to vector<2x4x16xf32>
    %624 = arith.addf %623, %622 : vector<2x4x16xf32>
    %625 = arith.divf %623, %624 : vector<2x4x16xf32>
    %626 = vector.shape_cast %614 : vector<2x4xf32> to vector<2x4x1xf32>
    %627 = vector.extract_strided_slice %625 {offsets = [0, 0, 0], sizes = [2, 4, 8], strides = [1, 1, 1]} : vector<2x4x16xf32> to vector<2x4x8xf32>
    %628 = vector.extract_strided_slice %625 {offsets = [0, 0, 8], sizes = [2, 4, 8], strides = [1, 1, 1]} : vector<2x4x16xf32> to vector<2x4x8xf32>
    %629 = arith.subf %627, %628 : vector<2x4x8xf32>
    %630 = vector.broadcast %626 : vector<2x4x1xf32> to vector<2x4x8xf32>
    %631 = arith.mulf %630, %629 : vector<2x4x8xf32>
    %cst_88 = arith.constant dense<0.000000e+00> : vector<2x8xf32>
    %632 = vector.multi_reduction <add>, %631, %cst_88 [1] : vector<2x4x8xf32> to vector<2x8xf32>
    %633 = vector.shape_cast %632 : vector<2x8xf32> to vector<2x8x1xf32>
    %634 = vector.broadcast %633 : vector<2x8x1xf32> to vector<2x8x32xf32>
    %635 = arith.mulf %634, %420 : vector<2x8x32xf32>
    %cst_89 = arith.constant dense<0.000000e+00> : vector<2x32xf32>
    %636 = vector.multi_reduction <add>, %635, %cst_89 [1] : vector<2x8x32xf32> to vector<2x32xf32>
    %637 = vector.extract_strided_slice %16 {offsets = [4, 0], sizes = [2, 32], strides = [1, 1]} : vector<16x32xf32> to vector<2x32xf32>
    %638 = arith.addf %636, %637 : vector<2x32xf32>
    %639 = vector.extract_strided_slice %21 {offsets = [6, 0], sizes = [2, 128], strides = [1, 1]} : vector<16x128xf32> to vector<2x128xf32>
    %640 = tpu.concatenate %636, %594 in 1 : vector<2x32xf32>, vector<2x32xf32> -> vector<2x64xf32>
    %cst_90 = arith.constant dense<0.000000e+00> : vector<2x128xf32>
    %641 = tpu.matmul %640, %421, %cst_90 {dimension_numbers = #tpu.dot_dimension_numbers<[1], [0], [0], [1], [0, 0, 1, 1], [], []>} : vector<2x64xf32>, vector<64x128xf32>, vector<2x128xf32> -> vector<2x128xf32>
    %642 = arith.addf %639, %641 : vector<2x128xf32>
    %643 = arith.negf %642 : vector<2x128xf32>
    %644 = math.exp %643 : vector<2x128xf32>
    %cst_91 = arith.constant 1.000000e+00 : f32
    %645 = vector.broadcast %cst_91 : f32 to vector<2x128xf32>
    %646 = arith.addf %645, %644 : vector<2x128xf32>
    %647 = arith.divf %645, %646 : vector<2x128xf32>
    %648 = math.tanh %642 : vector<2x128xf32>
    %649 = vector.extract_strided_slice %647 {offsets = [0, 32], sizes = [2, 32], strides = [1, 1]} : vector<2x128xf32> to vector<2x32xf32>
    %650 = arith.mulf %649, %591 : vector<2x32xf32>
    %651 = vector.extract_strided_slice %647 {offsets = [0, 0], sizes = [2, 32], strides = [1, 1]} : vector<2x128xf32> to vector<2x32xf32>
    %652 = vector.extract_strided_slice %648 {offsets = [0, 64], sizes = [2, 32], strides = [1, 1]} : vector<2x128xf32> to vector<2x32xf32>
    %653 = arith.mulf %651, %652 : vector<2x32xf32>
    %654 = arith.addf %650, %653 : vector<2x32xf32>
    %655 = vector.extract_strided_slice %647 {offsets = [0, 96], sizes = [2, 32], strides = [1, 1]} : vector<2x128xf32> to vector<2x32xf32>
    %656 = math.tanh %654 : vector<2x32xf32>
    %657 = arith.mulf %655, %656 : vector<2x32xf32>
    %cst_92 = arith.constant dense<0.000000e+00> : vector<2x12xf32>
    %658 = tpu.matmul %657, %422, %cst_92 {dimension_numbers = #tpu.dot_dimension_numbers<[1], [0], [0], [1], [0, 0, 1, 1], [], []>} : vector<2x32xf32>, vector<32x12xf32>, vector<2x12xf32> -> vector<2x12xf32>
    %659 = arith.addf %658, %425 : vector<2x12xf32>
    %660 = vector.extract_strided_slice %659 {offsets = [0, 8], sizes = [2, 4], strides = [1, 1]} : vector<2x12xf32> to vector<2x4xf32>
    %cst_93 = arith.constant dense<0xFF800000> : vector<2xf32>
    %661 = vector.multi_reduction <maximumf>, %660, %cst_93 [1] : vector<2x4xf32> to vector<2xf32>
    %662 = vector.shape_cast %661 : vector<2xf32> to vector<2x1xf32>
    %663 = vector.broadcast %441 : vector<1x12xf32> to vector<2x12xf32>
    %664 = arith.mulf %659, %663 : vector<2x12xf32>
    %665 = vector.broadcast %662 : vector<2x1xf32> to vector<2x12xf32>
    %666 = vector.broadcast %445 : vector<1x12xf32> to vector<2x12xf32>
    %667 = arith.mulf %665, %666 : vector<2x12xf32>
    %668 = arith.subf %664, %667 : vector<2x12xf32>
    %669 = math.exp %668 : vector<2x12xf32>
    %670 = vector.extract_strided_slice %669 {offsets = [0, 0], sizes = [2, 4], strides = [1, 1]} : vector<2x12xf32> to vector<2x4xf32>
    %671 = arith.addf %608, %670 : vector<2x4xf32>
    %672 = vector.extract_strided_slice %669 {offsets = [0, 4], sizes = [2, 4], strides = [1, 1]} : vector<2x12xf32> to vector<2x4xf32>
    %673 = vector.extract_strided_slice %669 {offsets = [0, 8], sizes = [2, 4], strides = [1, 1]} : vector<2x12xf32> to vector<2x4xf32>
    %cst_94 = arith.constant dense<0.000000e+00> : vector<2xf32>
    %674 = vector.multi_reduction <add>, %673, %cst_94 [1] : vector<2x4xf32> to vector<2xf32>
    %675 = vector.shape_cast %674 : vector<2xf32> to vector<2x1xf32>
    %676 = vector.broadcast %675 : vector<2x1xf32> to vector<2x4xf32>
    %677 = arith.divf %673, %676 : vector<2x4xf32>
    %678 = vector.shape_cast %671 : vector<2x4xf32> to vector<2x4x1xf32>
    %679 = vector.broadcast %678 : vector<2x4x1xf32> to vector<2x4x16xf32>
    %680 = arith.subf %432, %679 : vector<2x4x16xf32>
    %681 = vector.shape_cast %672 : vector<2x4xf32> to vector<2x4x1xf32>
    %682 = vector.broadcast %681 : vector<2x4x1xf32> to vector<2x4x16xf32>
    %683 = arith.mulf %680, %682 : vector<2x4x16xf32>
    %684 = arith.negf %683 : vector<2x4x16xf32>
    %685 = math.exp %684 : vector<2x4x16xf32>
    %cst_95 = arith.constant 1.000000e+00 : f32
    %686 = vector.broadcast %cst_95 : f32 to vector<2x4x16xf32>
    %687 = arith.addf %686, %685 : vector<2x4x16xf32>
    %688 = arith.divf %686, %687 : vector<2x4x16xf32>
    %689 = vector.shape_cast %677 : vector<2x4xf32> to vector<2x4x1xf32>
    %690 = vector.extract_strided_slice %688 {offsets = [0, 0, 0], sizes = [2, 4, 8], strides = [1, 1, 1]} : vector<2x4x16xf32> to vector<2x4x8xf32>
    %691 = vector.extract_strided_slice %688 {offsets = [0, 0, 8], sizes = [2, 4, 8], strides = [1, 1, 1]} : vector<2x4x16xf32> to vector<2x4x8xf32>
    %692 = arith.subf %690, %691 : vector<2x4x8xf32>
    %693 = vector.broadcast %689 : vector<2x4x1xf32> to vector<2x4x8xf32>
    %694 = arith.mulf %693, %692 : vector<2x4x8xf32>
    %cst_96 = arith.constant dense<0.000000e+00> : vector<2x8xf32>
    %695 = vector.multi_reduction <add>, %694, %cst_96 [1] : vector<2x4x8xf32> to vector<2x8xf32>
    %696 = vector.shape_cast %695 : vector<2x8xf32> to vector<2x8x1xf32>
    %697 = vector.broadcast %696 : vector<2x8x1xf32> to vector<2x8x32xf32>
    %698 = arith.mulf %697, %420 : vector<2x8x32xf32>
    %cst_97 = arith.constant dense<0.000000e+00> : vector<2x32xf32>
    %699 = vector.multi_reduction <add>, %698, %cst_97 [1] : vector<2x8x32xf32> to vector<2x32xf32>
    %700 = vector.extract_strided_slice %16 {offsets = [6, 0], sizes = [2, 32], strides = [1, 1]} : vector<16x32xf32> to vector<2x32xf32>
    %701 = arith.addf %699, %700 : vector<2x32xf32>
    %702 = vector.extract_strided_slice %21 {offsets = [8, 0], sizes = [2, 128], strides = [1, 1]} : vector<16x128xf32> to vector<2x128xf32>
    %703 = tpu.concatenate %699, %657 in 1 : vector<2x32xf32>, vector<2x32xf32> -> vector<2x64xf32>
    %cst_98 = arith.constant dense<0.000000e+00> : vector<2x128xf32>
    %704 = tpu.matmul %703, %421, %cst_98 {dimension_numbers = #tpu.dot_dimension_numbers<[1], [0], [0], [1], [0, 0, 1, 1], [], []>} : vector<2x64xf32>, vector<64x128xf32>, vector<2x128xf32> -> vector<2x128xf32>
    %705 = arith.addf %702, %704 : vector<2x128xf32>
    %706 = arith.negf %705 : vector<2x128xf32>
    %707 = math.exp %706 : vector<2x128xf32>
    %cst_99 = arith.constant 1.000000e+00 : f32
    %708 = vector.broadcast %cst_99 : f32 to vector<2x128xf32>
    %709 = arith.addf %708, %707 : vector<2x128xf32>
    %710 = arith.divf %708, %709 : vector<2x128xf32>
    %711 = math.tanh %705 : vector<2x128xf32>
    %712 = vector.extract_strided_slice %710 {offsets = [0, 32], sizes = [2, 32], strides = [1, 1]} : vector<2x128xf32> to vector<2x32xf32>
    %713 = arith.mulf %712, %654 : vector<2x32xf32>
    %714 = vector.extract_strided_slice %710 {offsets = [0, 0], sizes = [2, 32], strides = [1, 1]} : vector<2x128xf32> to vector<2x32xf32>
    %715 = vector.extract_strided_slice %711 {offsets = [0, 64], sizes = [2, 32], strides = [1, 1]} : vector<2x128xf32> to vector<2x32xf32>
    %716 = arith.mulf %714, %715 : vector<2x32xf32>
    %717 = arith.addf %713, %716 : vector<2x32xf32>
    %718 = vector.extract_strided_slice %710 {offsets = [0, 96], sizes = [2, 32], strides = [1, 1]} : vector<2x128xf32> to vector<2x32xf32>
    %719 = math.tanh %717 : vector<2x32xf32>
    %720 = arith.mulf %718, %719 : vector<2x32xf32>
    %cst_100 = arith.constant dense<0.000000e+00> : vector<2x12xf32>
    %721 = tpu.matmul %720, %422, %cst_100 {dimension_numbers = #tpu.dot_dimension_numbers<[1], [0], [0], [1], [0, 0, 1, 1], [], []>} : vector<2x32xf32>, vector<32x12xf32>, vector<2x12xf32> -> vector<2x12xf32>
    %722 = arith.addf %721, %425 : vector<2x12xf32>
    %723 = vector.extract_strided_slice %722 {offsets = [0, 8], sizes = [2, 4], strides = [1, 1]} : vector<2x12xf32> to vector<2x4xf32>
    %cst_101 = arith.constant dense<0xFF800000> : vector<2xf32>
    %724 = vector.multi_reduction <maximumf>, %723, %cst_101 [1] : vector<2x4xf32> to vector<2xf32>
    %725 = vector.shape_cast %724 : vector<2xf32> to vector<2x1xf32>
    %726 = vector.broadcast %441 : vector<1x12xf32> to vector<2x12xf32>
    %727 = arith.mulf %722, %726 : vector<2x12xf32>
    %728 = vector.broadcast %725 : vector<2x1xf32> to vector<2x12xf32>
    %729 = vector.broadcast %445 : vector<1x12xf32> to vector<2x12xf32>
    %730 = arith.mulf %728, %729 : vector<2x12xf32>
    %731 = arith.subf %727, %730 : vector<2x12xf32>
    %732 = math.exp %731 : vector<2x12xf32>
    %733 = vector.extract_strided_slice %732 {offsets = [0, 0], sizes = [2, 4], strides = [1, 1]} : vector<2x12xf32> to vector<2x4xf32>
    %734 = arith.addf %671, %733 : vector<2x4xf32>
    %735 = vector.extract_strided_slice %732 {offsets = [0, 4], sizes = [2, 4], strides = [1, 1]} : vector<2x12xf32> to vector<2x4xf32>
    %736 = vector.extract_strided_slice %732 {offsets = [0, 8], sizes = [2, 4], strides = [1, 1]} : vector<2x12xf32> to vector<2x4xf32>
    %cst_102 = arith.constant dense<0.000000e+00> : vector<2xf32>
    %737 = vector.multi_reduction <add>, %736, %cst_102 [1] : vector<2x4xf32> to vector<2xf32>
    %738 = vector.shape_cast %737 : vector<2xf32> to vector<2x1xf32>
    %739 = vector.broadcast %738 : vector<2x1xf32> to vector<2x4xf32>
    %740 = arith.divf %736, %739 : vector<2x4xf32>
    %741 = vector.shape_cast %734 : vector<2x4xf32> to vector<2x4x1xf32>
    %742 = vector.broadcast %741 : vector<2x4x1xf32> to vector<2x4x16xf32>
    %743 = arith.subf %432, %742 : vector<2x4x16xf32>
    %744 = vector.shape_cast %735 : vector<2x4xf32> to vector<2x4x1xf32>
    %745 = vector.broadcast %744 : vector<2x4x1xf32> to vector<2x4x16xf32>
    %746 = arith.mulf %743, %745 : vector<2x4x16xf32>
    %747 = arith.negf %746 : vector<2x4x16xf32>
    %748 = math.exp %747 : vector<2x4x16xf32>
    %cst_103 = arith.constant 1.000000e+00 : f32
    %749 = vector.broadcast %cst_103 : f32 to vector<2x4x16xf32>
    %750 = arith.addf %749, %748 : vector<2x4x16xf32>
    %751 = arith.divf %749, %750 : vector<2x4x16xf32>
    %752 = vector.shape_cast %740 : vector<2x4xf32> to vector<2x4x1xf32>
    %753 = vector.extract_strided_slice %751 {offsets = [0, 0, 0], sizes = [2, 4, 8], strides = [1, 1, 1]} : vector<2x4x16xf32> to vector<2x4x8xf32>
    %754 = vector.extract_strided_slice %751 {offsets = [0, 0, 8], sizes = [2, 4, 8], strides = [1, 1, 1]} : vector<2x4x16xf32> to vector<2x4x8xf32>
    %755 = arith.subf %753, %754 : vector<2x4x8xf32>
    %756 = vector.broadcast %752 : vector<2x4x1xf32> to vector<2x4x8xf32>
    %757 = arith.mulf %756, %755 : vector<2x4x8xf32>
    %cst_104 = arith.constant dense<0.000000e+00> : vector<2x8xf32>
    %758 = vector.multi_reduction <add>, %757, %cst_104 [1] : vector<2x4x8xf32> to vector<2x8xf32>
    %759 = vector.shape_cast %758 : vector<2x8xf32> to vector<2x8x1xf32>
    %760 = vector.broadcast %759 : vector<2x8x1xf32> to vector<2x8x32xf32>
    %761 = arith.mulf %760, %420 : vector<2x8x32xf32>
    %cst_105 = arith.constant dense<0.000000e+00> : vector<2x32xf32>
    %762 = vector.multi_reduction <add>, %761, %cst_105 [1] : vector<2x8x32xf32> to vector<2x32xf32>
    %763 = vector.extract_strided_slice %16 {offsets = [8, 0], sizes = [2, 32], strides = [1, 1]} : vector<16x32xf32> to vector<2x32xf32>
    %764 = arith.addf %762, %763 : vector<2x32xf32>
    %765 = vector.extract_strided_slice %21 {offsets = [10, 0], sizes = [2, 128], strides = [1, 1]} : vector<16x128xf32> to vector<2x128xf32>
    %766 = tpu.concatenate %762, %720 in 1 : vector<2x32xf32>, vector<2x32xf32> -> vector<2x64xf32>
    %cst_106 = arith.constant dense<0.000000e+00> : vector<2x128xf32>
    %767 = tpu.matmul %766, %421, %cst_106 {dimension_numbers = #tpu.dot_dimension_numbers<[1], [0], [0], [1], [0, 0, 1, 1], [], []>} : vector<2x64xf32>, vector<64x128xf32>, vector<2x128xf32> -> vector<2x128xf32>
    %768 = arith.addf %765, %767 : vector<2x128xf32>
    %769 = arith.negf %768 : vector<2x128xf32>
    %770 = math.exp %769 : vector<2x128xf32>
    %cst_107 = arith.constant 1.000000e+00 : f32
    %771 = vector.broadcast %cst_107 : f32 to vector<2x128xf32>
    %772 = arith.addf %771, %770 : vector<2x128xf32>
    %773 = arith.divf %771, %772 : vector<2x128xf32>
    %774 = math.tanh %768 : vector<2x128xf32>
    %775 = vector.extract_strided_slice %773 {offsets = [0, 32], sizes = [2, 32], strides = [1, 1]} : vector<2x128xf32> to vector<2x32xf32>
    %776 = arith.mulf %775, %717 : vector<2x32xf32>
    %777 = vector.extract_strided_slice %773 {offsets = [0, 0], sizes = [2, 32], strides = [1, 1]} : vector<2x128xf32> to vector<2x32xf32>
    %778 = vector.extract_strided_slice %774 {offsets = [0, 64], sizes = [2, 32], strides = [1, 1]} : vector<2x128xf32> to vector<2x32xf32>
    %779 = arith.mulf %777, %778 : vector<2x32xf32>
    %780 = arith.addf %776, %779 : vector<2x32xf32>
    %781 = vector.extract_strided_slice %773 {offsets = [0, 96], sizes = [2, 32], strides = [1, 1]} : vector<2x128xf32> to vector<2x32xf32>
    %782 = math.tanh %780 : vector<2x32xf32>
    %783 = arith.mulf %781, %782 : vector<2x32xf32>
    %cst_108 = arith.constant dense<0.000000e+00> : vector<2x12xf32>
    %784 = tpu.matmul %783, %422, %cst_108 {dimension_numbers = #tpu.dot_dimension_numbers<[1], [0], [0], [1], [0, 0, 1, 1], [], []>} : vector<2x32xf32>, vector<32x12xf32>, vector<2x12xf32> -> vector<2x12xf32>
    %785 = arith.addf %784, %425 : vector<2x12xf32>
    %786 = vector.extract_strided_slice %785 {offsets = [0, 8], sizes = [2, 4], strides = [1, 1]} : vector<2x12xf32> to vector<2x4xf32>
    %cst_109 = arith.constant dense<0xFF800000> : vector<2xf32>
    %787 = vector.multi_reduction <maximumf>, %786, %cst_109 [1] : vector<2x4xf32> to vector<2xf32>
    %788 = vector.shape_cast %787 : vector<2xf32> to vector<2x1xf32>
    %789 = vector.broadcast %441 : vector<1x12xf32> to vector<2x12xf32>
    %790 = arith.mulf %785, %789 : vector<2x12xf32>
    %791 = vector.broadcast %788 : vector<2x1xf32> to vector<2x12xf32>
    %792 = vector.broadcast %445 : vector<1x12xf32> to vector<2x12xf32>
    %793 = arith.mulf %791, %792 : vector<2x12xf32>
    %794 = arith.subf %790, %793 : vector<2x12xf32>
    %795 = math.exp %794 : vector<2x12xf32>
    %796 = vector.extract_strided_slice %795 {offsets = [0, 0], sizes = [2, 4], strides = [1, 1]} : vector<2x12xf32> to vector<2x4xf32>
    %797 = arith.addf %734, %796 : vector<2x4xf32>
    %798 = vector.extract_strided_slice %795 {offsets = [0, 4], sizes = [2, 4], strides = [1, 1]} : vector<2x12xf32> to vector<2x4xf32>
    %799 = vector.extract_strided_slice %795 {offsets = [0, 8], sizes = [2, 4], strides = [1, 1]} : vector<2x12xf32> to vector<2x4xf32>
    %cst_110 = arith.constant dense<0.000000e+00> : vector<2xf32>
    %800 = vector.multi_reduction <add>, %799, %cst_110 [1] : vector<2x4xf32> to vector<2xf32>
    %801 = vector.shape_cast %800 : vector<2xf32> to vector<2x1xf32>
    %802 = vector.broadcast %801 : vector<2x1xf32> to vector<2x4xf32>
    %803 = arith.divf %799, %802 : vector<2x4xf32>
    %804 = vector.shape_cast %797 : vector<2x4xf32> to vector<2x4x1xf32>
    %805 = vector.broadcast %804 : vector<2x4x1xf32> to vector<2x4x16xf32>
    %806 = arith.subf %432, %805 : vector<2x4x16xf32>
    %807 = vector.shape_cast %798 : vector<2x4xf32> to vector<2x4x1xf32>
    %808 = vector.broadcast %807 : vector<2x4x1xf32> to vector<2x4x16xf32>
    %809 = arith.mulf %806, %808 : vector<2x4x16xf32>
    %810 = arith.negf %809 : vector<2x4x16xf32>
    %811 = math.exp %810 : vector<2x4x16xf32>
    %cst_111 = arith.constant 1.000000e+00 : f32
    %812 = vector.broadcast %cst_111 : f32 to vector<2x4x16xf32>
    %813 = arith.addf %812, %811 : vector<2x4x16xf32>
    %814 = arith.divf %812, %813 : vector<2x4x16xf32>
    %815 = vector.shape_cast %803 : vector<2x4xf32> to vector<2x4x1xf32>
    %816 = vector.extract_strided_slice %814 {offsets = [0, 0, 0], sizes = [2, 4, 8], strides = [1, 1, 1]} : vector<2x4x16xf32> to vector<2x4x8xf32>
    %817 = vector.extract_strided_slice %814 {offsets = [0, 0, 8], sizes = [2, 4, 8], strides = [1, 1, 1]} : vector<2x4x16xf32> to vector<2x4x8xf32>
    %818 = arith.subf %816, %817 : vector<2x4x8xf32>
    %819 = vector.broadcast %815 : vector<2x4x1xf32> to vector<2x4x8xf32>
    %820 = arith.mulf %819, %818 : vector<2x4x8xf32>
    %cst_112 = arith.constant dense<0.000000e+00> : vector<2x8xf32>
    %821 = vector.multi_reduction <add>, %820, %cst_112 [1] : vector<2x4x8xf32> to vector<2x8xf32>
    %822 = vector.shape_cast %821 : vector<2x8xf32> to vector<2x8x1xf32>
    %823 = vector.broadcast %822 : vector<2x8x1xf32> to vector<2x8x32xf32>
    %824 = arith.mulf %823, %420 : vector<2x8x32xf32>
    %cst_113 = arith.constant dense<0.000000e+00> : vector<2x32xf32>
    %825 = vector.multi_reduction <add>, %824, %cst_113 [1] : vector<2x8x32xf32> to vector<2x32xf32>
    %826 = vector.extract_strided_slice %16 {offsets = [10, 0], sizes = [2, 32], strides = [1, 1]} : vector<16x32xf32> to vector<2x32xf32>
    %827 = arith.addf %825, %826 : vector<2x32xf32>
    %828 = vector.extract_strided_slice %21 {offsets = [12, 0], sizes = [2, 128], strides = [1, 1]} : vector<16x128xf32> to vector<2x128xf32>
    %829 = tpu.concatenate %825, %783 in 1 : vector<2x32xf32>, vector<2x32xf32> -> vector<2x64xf32>
    %cst_114 = arith.constant dense<0.000000e+00> : vector<2x128xf32>
    %830 = tpu.matmul %829, %421, %cst_114 {dimension_numbers = #tpu.dot_dimension_numbers<[1], [0], [0], [1], [0, 0, 1, 1], [], []>} : vector<2x64xf32>, vector<64x128xf32>, vector<2x128xf32> -> vector<2x128xf32>
    %831 = arith.addf %828, %830 : vector<2x128xf32>
    %832 = arith.negf %831 : vector<2x128xf32>
    %833 = math.exp %832 : vector<2x128xf32>
    %cst_115 = arith.constant 1.000000e+00 : f32
    %834 = vector.broadcast %cst_115 : f32 to vector<2x128xf32>
    %835 = arith.addf %834, %833 : vector<2x128xf32>
    %836 = arith.divf %834, %835 : vector<2x128xf32>
    %837 = math.tanh %831 : vector<2x128xf32>
    %838 = vector.extract_strided_slice %836 {offsets = [0, 32], sizes = [2, 32], strides = [1, 1]} : vector<2x128xf32> to vector<2x32xf32>
    %839 = arith.mulf %838, %780 : vector<2x32xf32>
    %840 = vector.extract_strided_slice %836 {offsets = [0, 0], sizes = [2, 32], strides = [1, 1]} : vector<2x128xf32> to vector<2x32xf32>
    %841 = vector.extract_strided_slice %837 {offsets = [0, 64], sizes = [2, 32], strides = [1, 1]} : vector<2x128xf32> to vector<2x32xf32>
    %842 = arith.mulf %840, %841 : vector<2x32xf32>
    %843 = arith.addf %839, %842 : vector<2x32xf32>
    %844 = vector.extract_strided_slice %836 {offsets = [0, 96], sizes = [2, 32], strides = [1, 1]} : vector<2x128xf32> to vector<2x32xf32>
    %845 = math.tanh %843 : vector<2x32xf32>
    %846 = arith.mulf %844, %845 : vector<2x32xf32>
    %cst_116 = arith.constant dense<0.000000e+00> : vector<2x12xf32>
    %847 = tpu.matmul %846, %422, %cst_116 {dimension_numbers = #tpu.dot_dimension_numbers<[1], [0], [0], [1], [0, 0, 1, 1], [], []>} : vector<2x32xf32>, vector<32x12xf32>, vector<2x12xf32> -> vector<2x12xf32>
    %848 = arith.addf %847, %425 : vector<2x12xf32>
    %849 = vector.extract_strided_slice %848 {offsets = [0, 8], sizes = [2, 4], strides = [1, 1]} : vector<2x12xf32> to vector<2x4xf32>
    %cst_117 = arith.constant dense<0xFF800000> : vector<2xf32>
    %850 = vector.multi_reduction <maximumf>, %849, %cst_117 [1] : vector<2x4xf32> to vector<2xf32>
    %851 = vector.shape_cast %850 : vector<2xf32> to vector<2x1xf32>
    %852 = vector.broadcast %441 : vector<1x12xf32> to vector<2x12xf32>
    %853 = arith.mulf %848, %852 : vector<2x12xf32>
    %854 = vector.broadcast %851 : vector<2x1xf32> to vector<2x12xf32>
    %855 = vector.broadcast %445 : vector<1x12xf32> to vector<2x12xf32>
    %856 = arith.mulf %854, %855 : vector<2x12xf32>
    %857 = arith.subf %853, %856 : vector<2x12xf32>
    %858 = math.exp %857 : vector<2x12xf32>
    %859 = vector.extract_strided_slice %858 {offsets = [0, 0], sizes = [2, 4], strides = [1, 1]} : vector<2x12xf32> to vector<2x4xf32>
    %860 = arith.addf %797, %859 : vector<2x4xf32>
    %861 = vector.extract_strided_slice %858 {offsets = [0, 4], sizes = [2, 4], strides = [1, 1]} : vector<2x12xf32> to vector<2x4xf32>
    %862 = vector.extract_strided_slice %858 {offsets = [0, 8], sizes = [2, 4], strides = [1, 1]} : vector<2x12xf32> to vector<2x4xf32>
    %cst_118 = arith.constant dense<0.000000e+00> : vector<2xf32>
    %863 = vector.multi_reduction <add>, %862, %cst_118 [1] : vector<2x4xf32> to vector<2xf32>
    %864 = vector.shape_cast %863 : vector<2xf32> to vector<2x1xf32>
    %865 = vector.broadcast %864 : vector<2x1xf32> to vector<2x4xf32>
    %866 = arith.divf %862, %865 : vector<2x4xf32>
    %867 = vector.shape_cast %860 : vector<2x4xf32> to vector<2x4x1xf32>
    %868 = vector.broadcast %867 : vector<2x4x1xf32> to vector<2x4x16xf32>
    %869 = arith.subf %432, %868 : vector<2x4x16xf32>
    %870 = vector.shape_cast %861 : vector<2x4xf32> to vector<2x4x1xf32>
    %871 = vector.broadcast %870 : vector<2x4x1xf32> to vector<2x4x16xf32>
    %872 = arith.mulf %869, %871 : vector<2x4x16xf32>
    %873 = arith.negf %872 : vector<2x4x16xf32>
    %874 = math.exp %873 : vector<2x4x16xf32>
    %cst_119 = arith.constant 1.000000e+00 : f32
    %875 = vector.broadcast %cst_119 : f32 to vector<2x4x16xf32>
    %876 = arith.addf %875, %874 : vector<2x4x16xf32>
    %877 = arith.divf %875, %876 : vector<2x4x16xf32>
    %878 = vector.shape_cast %866 : vector<2x4xf32> to vector<2x4x1xf32>
    %879 = vector.extract_strided_slice %877 {offsets = [0, 0, 0], sizes = [2, 4, 8], strides = [1, 1, 1]} : vector<2x4x16xf32> to vector<2x4x8xf32>
    %880 = vector.extract_strided_slice %877 {offsets = [0, 0, 8], sizes = [2, 4, 8], strides = [1, 1, 1]} : vector<2x4x16xf32> to vector<2x4x8xf32>
    %881 = arith.subf %879, %880 : vector<2x4x8xf32>
    %882 = vector.broadcast %878 : vector<2x4x1xf32> to vector<2x4x8xf32>
    %883 = arith.mulf %882, %881 : vector<2x4x8xf32>
    %cst_120 = arith.constant dense<0.000000e+00> : vector<2x8xf32>
    %884 = vector.multi_reduction <add>, %883, %cst_120 [1] : vector<2x4x8xf32> to vector<2x8xf32>
    %885 = vector.shape_cast %884 : vector<2x8xf32> to vector<2x8x1xf32>
    %886 = vector.broadcast %885 : vector<2x8x1xf32> to vector<2x8x32xf32>
    %887 = arith.mulf %886, %420 : vector<2x8x32xf32>
    %cst_121 = arith.constant dense<0.000000e+00> : vector<2x32xf32>
    %888 = vector.multi_reduction <add>, %887, %cst_121 [1] : vector<2x8x32xf32> to vector<2x32xf32>
    %889 = vector.extract_strided_slice %16 {offsets = [12, 0], sizes = [2, 32], strides = [1, 1]} : vector<16x32xf32> to vector<2x32xf32>
    %890 = arith.addf %888, %889 : vector<2x32xf32>
    %891 = vector.extract_strided_slice %21 {offsets = [14, 0], sizes = [2, 128], strides = [1, 1]} : vector<16x128xf32> to vector<2x128xf32>
    %892 = tpu.concatenate %888, %846 in 1 : vector<2x32xf32>, vector<2x32xf32> -> vector<2x64xf32>
    %cst_122 = arith.constant dense<0.000000e+00> : vector<2x128xf32>
    %893 = tpu.matmul %892, %421, %cst_122 {dimension_numbers = #tpu.dot_dimension_numbers<[1], [0], [0], [1], [0, 0, 1, 1], [], []>} : vector<2x64xf32>, vector<64x128xf32>, vector<2x128xf32> -> vector<2x128xf32>
    %894 = arith.addf %891, %893 : vector<2x128xf32>
    %895 = arith.negf %894 : vector<2x128xf32>
    %896 = math.exp %895 : vector<2x128xf32>
    %cst_123 = arith.constant 1.000000e+00 : f32
    %897 = vector.broadcast %cst_123 : f32 to vector<2x128xf32>
    %898 = arith.addf %897, %896 : vector<2x128xf32>
    %899 = arith.divf %897, %898 : vector<2x128xf32>
    %900 = math.tanh %894 : vector<2x128xf32>
    %901 = vector.extract_strided_slice %899 {offsets = [0, 32], sizes = [2, 32], strides = [1, 1]} : vector<2x128xf32> to vector<2x32xf32>
    %902 = arith.mulf %901, %843 : vector<2x32xf32>
    %903 = vector.extract_strided_slice %899 {offsets = [0, 0], sizes = [2, 32], strides = [1, 1]} : vector<2x128xf32> to vector<2x32xf32>
    %904 = vector.extract_strided_slice %900 {offsets = [0, 64], sizes = [2, 32], strides = [1, 1]} : vector<2x128xf32> to vector<2x32xf32>
    %905 = arith.mulf %903, %904 : vector<2x32xf32>
    %906 = arith.addf %902, %905 : vector<2x32xf32>
    %907 = vector.extract_strided_slice %899 {offsets = [0, 96], sizes = [2, 32], strides = [1, 1]} : vector<2x128xf32> to vector<2x32xf32>
    %908 = math.tanh %906 : vector<2x32xf32>
    %909 = arith.mulf %907, %908 : vector<2x32xf32>
    %cst_124 = arith.constant dense<0.000000e+00> : vector<2x12xf32>
    %910 = tpu.matmul %909, %422, %cst_124 {dimension_numbers = #tpu.dot_dimension_numbers<[1], [0], [0], [1], [0, 0, 1, 1], [], []>} : vector<2x32xf32>, vector<32x12xf32>, vector<2x12xf32> -> vector<2x12xf32>
    %911 = arith.addf %910, %425 : vector<2x12xf32>
    %912 = vector.extract_strided_slice %911 {offsets = [0, 8], sizes = [2, 4], strides = [1, 1]} : vector<2x12xf32> to vector<2x4xf32>
    %cst_125 = arith.constant dense<0xFF800000> : vector<2xf32>
    %913 = vector.multi_reduction <maximumf>, %912, %cst_125 [1] : vector<2x4xf32> to vector<2xf32>
    %914 = vector.shape_cast %913 : vector<2xf32> to vector<2x1xf32>
    %915 = vector.broadcast %441 : vector<1x12xf32> to vector<2x12xf32>
    %916 = arith.mulf %911, %915 : vector<2x12xf32>
    %917 = vector.broadcast %914 : vector<2x1xf32> to vector<2x12xf32>
    %918 = vector.broadcast %445 : vector<1x12xf32> to vector<2x12xf32>
    %919 = arith.mulf %917, %918 : vector<2x12xf32>
    %920 = arith.subf %916, %919 : vector<2x12xf32>
    %921 = math.exp %920 : vector<2x12xf32>
    %922 = vector.extract_strided_slice %921 {offsets = [0, 0], sizes = [2, 4], strides = [1, 1]} : vector<2x12xf32> to vector<2x4xf32>
    %923 = arith.addf %860, %922 : vector<2x4xf32>
    %924 = vector.extract_strided_slice %921 {offsets = [0, 4], sizes = [2, 4], strides = [1, 1]} : vector<2x12xf32> to vector<2x4xf32>
    %925 = vector.extract_strided_slice %921 {offsets = [0, 8], sizes = [2, 4], strides = [1, 1]} : vector<2x12xf32> to vector<2x4xf32>
    %cst_126 = arith.constant dense<0.000000e+00> : vector<2xf32>
    %926 = vector.multi_reduction <add>, %925, %cst_126 [1] : vector<2x4xf32> to vector<2xf32>
    %927 = vector.shape_cast %926 : vector<2xf32> to vector<2x1xf32>
    %928 = vector.broadcast %927 : vector<2x1xf32> to vector<2x4xf32>
    %929 = arith.divf %925, %928 : vector<2x4xf32>
    %930 = vector.shape_cast %923 : vector<2x4xf32> to vector<2x4x1xf32>
    %931 = vector.broadcast %930 : vector<2x4x1xf32> to vector<2x4x16xf32>
    %932 = arith.subf %432, %931 : vector<2x4x16xf32>
    %933 = vector.shape_cast %924 : vector<2x4xf32> to vector<2x4x1xf32>
    %934 = vector.broadcast %933 : vector<2x4x1xf32> to vector<2x4x16xf32>
    %935 = arith.mulf %932, %934 : vector<2x4x16xf32>
    %936 = arith.negf %935 : vector<2x4x16xf32>
    %937 = math.exp %936 : vector<2x4x16xf32>
    %cst_127 = arith.constant 1.000000e+00 : f32
    %938 = vector.broadcast %cst_127 : f32 to vector<2x4x16xf32>
    %939 = arith.addf %938, %937 : vector<2x4x16xf32>
    %940 = arith.divf %938, %939 : vector<2x4x16xf32>
    %941 = vector.shape_cast %929 : vector<2x4xf32> to vector<2x4x1xf32>
    %942 = vector.extract_strided_slice %940 {offsets = [0, 0, 0], sizes = [2, 4, 8], strides = [1, 1, 1]} : vector<2x4x16xf32> to vector<2x4x8xf32>
    %943 = vector.extract_strided_slice %940 {offsets = [0, 0, 8], sizes = [2, 4, 8], strides = [1, 1, 1]} : vector<2x4x16xf32> to vector<2x4x8xf32>
    %944 = arith.subf %942, %943 : vector<2x4x8xf32>
    %945 = vector.broadcast %941 : vector<2x4x1xf32> to vector<2x4x8xf32>
    %946 = arith.mulf %945, %944 : vector<2x4x8xf32>
    %cst_128 = arith.constant dense<0.000000e+00> : vector<2x8xf32>
    %947 = vector.multi_reduction <add>, %946, %cst_128 [1] : vector<2x4x8xf32> to vector<2x8xf32>
    %948 = vector.shape_cast %947 : vector<2x8xf32> to vector<2x8x1xf32>
    %949 = vector.broadcast %948 : vector<2x8x1xf32> to vector<2x8x32xf32>
    %950 = arith.mulf %949, %420 : vector<2x8x32xf32>
    %cst_129 = arith.constant dense<0.000000e+00> : vector<2x32xf32>
    %951 = vector.multi_reduction <add>, %950, %cst_129 [1] : vector<2x8x32xf32> to vector<2x32xf32>
    %952 = vector.extract_strided_slice %16 {offsets = [14, 0], sizes = [2, 32], strides = [1, 1]} : vector<16x32xf32> to vector<2x32xf32>
    %953 = arith.addf %951, %952 : vector<2x32xf32>
    %954 = tpu.concatenate %512, %575, %638, %701, %764, %827, %890, %953 in 1 : vector<2x32xf32>, vector<2x32xf32>, vector<2x32xf32>, vector<2x32xf32>, vector<2x32xf32>, vector<2x32xf32>, vector<2x32xf32>, vector<2x32xf32> -> vector<2x256xf32>
    %c0_130 = arith.constant 0 : index
    %c0_131 = arith.constant 0 : index
    %955 = vector.load %arg15[%c0_130, %c0_131] : memref<2x256xf32, #tpu.memory_space<vmem>>, vector<2x256xf32>
    tpu.vector_store %arg15[%c0_130, %c0_131], %954 {strides = array<i32>} : memref<2x256xf32, #tpu.memory_space<vmem>>, vector<2x256xf32>,
    %956 = tpu.concatenate %506, %569, %632, %695, %758, %821, %884, %947 in 1 : vector<2x8xf32>, vector<2x8xf32>, vector<2x8xf32>, vector<2x8xf32>, vector<2x8xf32>, vector<2x8xf32>, vector<2x8xf32>, vector<2x8xf32> -> vector<2x64xf32>
    %c0_132 = arith.constant 0 : index
    %c0_133 = arith.constant 0 : index
    %957 = vector.load %arg16[%c0_132, %c0_133] : memref<2x64xf32, #tpu.memory_space<vmem>>, vector<2x64xf32>
    tpu.vector_store %arg16[%c0_132, %c0_133], %956 {strides = array<i32>} : memref<2x64xf32, #tpu.memory_space<vmem>>, vector<2x64xf32>,
    return
  }
}

</mosaic_0001>

<bundles_post_ra>
// kernel: tts_forward.1
= control target key start
LH: loop header
LB: loop body
LE: loop exit
PB: predicated region body
PF: predicated region fallthrough
CT: control target
= control target key end

     0   :  { %s6574_s0 = inlined_call_operand.vmem [shape: f32[32,8], index: 0, kind: input, shape index: {}]   ;;  %s6575_s1 = inlined_call_operand.vmem [shape: f32[16,16], index: 1, kind: input, shape index: {}]   ;;  %s6576_s2 = inlined_call_operand.vmem [shape: f32[16,128], index: 2, kind: input, shape index: {}]   ;;  %s6577_s3 = inlined_call_operand.vmem [shape: s32[2,1], index: 3, kind: input, shape index: {}]   ;;  %s6578_s4 = inlined_call_operand.vmem [shape: f32[8,96], index: 4, kind: input, shape index: {}]   ;;  %s6579_s5 = inlined_call_operand.vmem [shape: f32[1,96], index: 5, kind: input, shape index: {}]   ;;  %s6580_s6 = inlined_call_operand.vmem [shape: f32[16,32], index: 6, kind: input, shape index: {}]   ;;  %s6581_s7 = inlined_call_operand.vmem [shape: f32[1,32], index: 7, kind: input, shape index: {}]   ;;  %s6582_s8 = inlined_call_operand.vmem [shape: f32[32,128], index: 8, kind: input, shape index: {}]   ;;  %s6583_s9 = inlined_call_operand.vmem [shape: f32[32,128], index: 9, kind: input, shape index: {}]   ;;  %s6584_s10 = inlined_call_operand.vmem [shape: f32[64,128], index: 10, kind: input, shape index: {}]   ;;  %s6585_s11 = inlined_call_operand.vmem [shape: f32[1,128], index: 11, kind: input, shape index: {}]   ;;  %s6586_s12 = inlined_call_operand.vmem [shape: f32[32,12], index: 12, kind: input, shape index: {}]   ;;  %s6587_s13 = inlined_call_operand.vmem [shape: f32[1,12], index: 13, kind: input, shape index: {}]   ;;  %s6588_s14 = inlined_call_operand.vmem [shape: f32[32,96], index: 14, kind: output, shape index: {0}]   ;;  %s6589_s15 = inlined_call_operand.hbm [shape: f32[2,256], index: 15, kind: output, shape index: {1}]   ;;  %s6590_s16 = inlined_call_operand.vmem [shape: f32[2,64], index: 16, kind: output, shape index: {2}]  }
   0x1   :  { %6593 = sst [smem:[#allocation5_spill]] %s6574_s0 }
   0x2   :  { %v181_v0 = vld [vmem:[%s6580_s6] sm:$0xff]  ;;  %v182_v1 = vld [vmem:[%s6580_s6 + $0x8] sm:$0xff]  ;;  %vm190_vm0 = vcmask 130048   ;;  %v5367_v7 = vmov 0   ;;  %s6594_s23 = sld [smem:[#allocation5_spill]]  ;;  %vm57_vm1 = vcmask 1040384  }
   0x3   :  { %v179_v2 = vld [vmem:[%s6575_s1] sm:$0xff]  ;;  %v4879_v3 = vpack.c.bf16 %v182_v1, %v181_v0  ;;  %v368_v5 = vld [vmem:[%s6582_s8 + $0x8] sm:$0xff]  ;;  %5108 = vset.pattern.permute.xlu0 %v5367_v7  ;;  %vm78_vm2 = vcmask 64512   ;;  %v5368_v18 = vmov 0.0|0.0   ;;  %v369_v19 = vld [vmem:[%s6582_s8 + $0x10] sm:$0xff] }
   0x4   :  { %4537 = vmatprep.mubr.msk.f32.mxu1 %vm190_vm0, %v179_v2  ;;  %v367_v4 = vld [vmem:[%s6582_s8] sm:$0xff]  ;;  %v180_v6 = vld [vmem:[%s6575_s1 + $0x8] sm:$0xff]  ;;  %v370_v20 = vld [vmem:[%s6582_s8 + $0x18] sm:$0xff] }
   0x5   :  { %v371_v8 = vld [vmem:[%s6577_s3] sm:$0x3]  ;;  %4880 = vmatprep.subr.bf16.mxu1 %v4879_v3  ;;  %v5508_v12 = vpack.c.bf16 %v368_v5, %v367_v4  ;;  %v273_v16 = vld [vmem:[%s6583_s9 + $0x8] sm:$0xff] }
   0x6   :  { %375 = vperm.xlu0 %5108, %v371_v8   ;;  %v70_v9 = vld [vmem:[%s6578_s4] sm:$0xff]  ;;  %4882 = vmatpush3.bf16.msra.mxu1 %v4879_v3 }
   0x7   :  { %4525 = vmatprep.subr.mxu0 %v70_v9  ;;  %v272_v15 = vld [vmem:[%s6583_s9] sm:$0xff]  ;;  %4891 = vmatprep.subr.bf16.mxu1 %v5368_v18 }
   0x8   :  { %v51_v10 = vld [vmem:[%s6594_s23] sm:$0xff]  ;;  %v52_v11 = vld [vmem:[%s6594_s23 + $0x8] sm:$0xff]  ;;  %v53_v17 = vld [vmem:[%s6594_s23 + $0x10] sm:$0xff]  ;;  %4526 = vmatpush3.msra.mxu0 %v70_v9 }
   0x9   :  { %v58_v13 = vrot.slane %v51_v10, 7  ;;  %v59_v14 = vrot.slane %v52_v11, 7  ;;  %v64_v21 = vrot.slane %v53_v17, 7 }
   0xa   :  { %22 = vsyncpa [#allocation3], 0  ;;  %v4883_v24 = vpack.c.bf16 %v273_v16, %v272_v15  ;;  %4538 = vmatmul.mubr.msk.f32.vlgmr.msra.gmra.mrb[0].mxu1 %vm190_vm0, %v180_v6  ;;  %v5532_v26 = vpack.c.bf16 %v370_v20, %v369_v19  ;;  %vm5369_vm3 = vmmov 0   ;;  %v5370_v27 = vmov 0.0   ;;  %v54_v28 = vld [vmem:[%s6594_s23 + $0x18] sm:$0xff]  ;;  %v274_v30 = vld [vmem:[%s6583_s9 + $0x10] sm:$0xff] }
   0xb   :  { %v68_v22 = vsel %vm57_vm1, 0.0, %v58_v13  ;;  %v60_v23 = vsel %vm57_vm1, %v58_v13, %v59_v14  ;;  %v69_v25 = vsel %vm57_vm1, 0.0, %v64_v21  ;;  %4893 = vmatpush3.bf16.msra.mxu1 %v5508_v12  ;;  %4559 = vmatprep.mubr.msk.f32.mxu1 %vm5369_vm3, %v5370_v27  ;;  %v65_v29 = vrot.slane %v54_v28, 7  ;;  %v275_v31 = vld [vmem:[%s6583_s9 + $0x18] sm:$0xff]  ;;  %v4294_v35 = vld [vmem:[%s6581_s7] ss:$0 sm:$0xff] }
   0xc   :  { %4527 = vmatprep.mubr.msk.f32.mxu0 %vm78_vm2, %v68_v22  ;;  %4894 = vmatprep.subr.bf16.mxu1 %v5368_v18  ;;  %v4887_v32 = vpack.c.bf16 %v275_v31, %v274_v30  ;;  %v5371_v34 = vmov 7   ;;  %v5566_v36 = vld [vmem:[%s6576_s2 + $0x8] sm:$0xff]  ;;  %vm283_vm4 = vcmask 261120   ;;  %v5576_v42 = vld [vmem:[%s6576_s2] sm:$0xff]  ;;  %vm383_vm5 = vcmask 523264   ;;  %s5372_s2 = smov 112  }
   0xd   :  { %4528 = vmatmul.mubr.msk.f32.vlgmr.msra.gmra.mrb[0].mxu0 %vm78_vm2, %v60_v23  ;;  %4884 = vmatprep.subr.bf16.mxu0 %v4883_v24  ;;  %v66_v33 = vsel %vm57_vm1, %v64_v21, %v65_v29  ;;  %v381_v41 = vrot.slane %v5566_v36, 6  ;;  %v372_v50 = vlaneseq  ;;  %s5373_s7 = smov 80   ;;  %s5374_s3 = smov 64   ;;  %v4289_v57 = vld [vmem:[%s6579_s5] ss:$0 sm:$0xff]  ;;  %vm6592_vm7 = vcmask 785408  }
   0xe   :  { %4530 = vmatprep.mubr.msk.f32.mxu0 %vm78_vm2, %v69_v25  ;;  %4886 = vmatpush3.bf16.msra.mxu0 %v4883_v24  ;;  %s5375_s4 = smov 96   ;;  %s5376_s26 = smov 48   ;;  %v5651_v29 = vld [vmem:[%s6585_s11] ss:$0 sm:$0xff]  ;;  %vm1752_vm8 = vcmask 91200   ;;  %vm1766_vm13 = vcmask 25600  }
   0xf   :  { %4896 = vmatpush3.bf16.msra.mxu1 %v5532_v26  ;;  %4888 = vmatprep.subr.bf16.mxu0 %v4887_v32  ;;  %v5584_v43 = vsel %vm383_vm5, %v5576_v42, %v381_v41  ;;  %v5594_v51 = vand.u32 127, %v372_v50  ;;  %s5377_s27 = smov 32   ;;  %s5385_s24 = smov 120   ;;  %vm1846_vm14 = vcmask 60416   ;;  %vm1890_vm15 = vcmask 1041409  }
  0x10   :  { %4903 = vmatprep.subr.bf16.mxu1 %v5368_v18  ;;  %5109 = vset.pattern.permute.xlu1 %v5371_v34  ;;  %v5379_v34 = vmov 6   ;;  %s5386_s25 = smov 8   ;;  %s5388_s28 = smov 40  }
  0x11   :  { %4531 = vmatmul.mubr.msk.f32.gmra.mrb[2].mxu0 %vm78_vm2, %v66_v33  ;;  %v5378_v33 = vmov 1   ;;  %vm1573_vm9 = vcmp.ge.s32.totalorder %v5594_v51, 4  ;;  %vm1574_vm10 = vcmp.lt.s32.totalorder %v5594_v51, 8  ;;  %vm1577_vm12 = vcmp.ge.s32.totalorder %v5594_v51, 8  ;;  %s5389_s29 = smov 16  }
  0x12   :  { %4560 = vmatmul.mubr.f32.vlgmr.msra.gmra.mrb[2].mxu1 %v5370_v27  ;;  %4890 = vmatpush3.bf16.msra.mxu0 %v4887_v32  ;;  %vm1575_vm11 = vmand %vm1573_vm9, %vm1574_vm10  ;;  %vm1514_vm9 = vcmask 1042432   ;;  %vm1516_vm10 = vcmask 1043456  }
  0x13   :  { %4905 = vmatpush3.bf16.msra.mxu1 %v5508_v12  ;;  %4581 = vmatprep.mubr.msk.f32.mxu1 %vm5369_vm3, %v5370_v27 }
  0x14   :  { %4906 = vmatprep.subr.bf16.mxu1 %v5368_v18  ;;  %4897 = vmatprep.subr.bf16.mxu0 %v5368_v18 }
  0x17   :  { %4908 = vmatpush3.bf16.msra.mxu1 %v5532_v26 }
  0x18   :  { %4915 = vmatprep.subr.bf16.mxu1 %v5368_v18 }
  0x85   :  { %v376_v53 = vpop.permute.xlu0 %375 }
  0x86   :  { %vm377_vm6 = vcmp.lt.s32.totalorder %v5594_v51, %v376_v53 }
  0x87   :  { %v5602_v55 = vsel %vm377_vm6, 1.0, %v5370_v27  ;;  %vm1512_vm6 = vcmask 1041408  }
  0xdd   :  { %v4539_v37 = vpop.f32.mrb[0].mxu1 }
  0xde   :  { %v5568_v38 = vadd.f32 %v4539_v37, %v4294_v35  ;;  %v263_v39 = vpop.f32.mrb[1].mxu1 }
  0xdf   :  { %v5570_v40 = vadd.f32 %v4294_v35, %v263_v39  ;;  %v511_v35 = vrot.slane %v5566_v36, 2 }
  0xe0   :  { %v4529_v56 = vpop.f32.mrb[0].mxu0 }
  0xe1   :  { %4548 = vmatprep.mubr.msk.f32.mxu0 %vm283_vm4, %v5570_v40  ;;  %v161_v58 = vadd.f32 %v4529_v56, %v4289_v57  ;;  %v155_v59 = vpop.f32.mrb[1].mxu0  ;;  %v5661_v37 = vsel %vm383_vm5, %v5576_v42, %v511_v35 }
  0xe2   :  { %4549 = vmatmul.mubr.msk.f32.vlgmr.msra.gmra.mrb[4].mxu0 %vm283_vm4, %v5568_v38  ;;  %v156_v60 = vadd.f32 %v4289_v57, %v155_v59 }
  0xe3   :  { %4899 = vmatpush3.bf16.msra.mxu0 %v5508_v12  ;;  %4570 = vmatprep.mubr.msk.f32.mxu0 %vm5369_vm3, %v5370_v27  ;;  %176 = vst.msk [vmem:[%s6588_s14 + $0x8] sm:$0xff] %vm6592_vm7, %v161_v58 }
  0xe4   :  { %4900 = vmatprep.subr.bf16.mxu0 %v5368_v18  ;;  %175 = vst.msk [vmem:[%s6588_s14] sm:$0xff] %vm6592_vm7, %v156_v60  ;;  %v4532_v61 = vpop.f32.mrb[2].mxu0 }
  0xe5   :  { %v464_v44 = vpop.f32.mrb[2].mxu1  ;;  %v171_v62 = vadd.f32 %v4532_v61, %v4289_v57  ;;  %v165_v63 = vpop.f32.mrb[3].mxu0 }
  0xe6   :  { %v468_v45 = vadd.f32 %v464_v44, %v5584_v43  ;;  %v4561_v46 = vpop.f32.mrb[3].mxu1  ;;  %v166_v0 = vadd.f32 %v4289_v57, %v165_v63 }
  0xe7   :  { %4902 = vmatpush3.bf16.msra.mxu0 %v5532_v26  ;;  %178 = vst.msk [vmem:[%s6588_s14 + $0x18] sm:$0xff] %vm6592_vm7, %v171_v62 }
  0xe8   :  { %v4301_v47 = vmul.f32 -1.442695, %v468_v45  ;;  %4909 = vmatprep.subr.bf16.mxu0 %v5368_v18  ;;  %177 = vst.msk [vmem:[%s6588_s14 + $0x10] sm:$0xff] %vm6592_vm7, %v166_v0  ;;  %vm1522_vm7 = vcmask 1046528  }
  0xea   :  { %5117 = vpow2.f32 %v4301_v47 }
  0xf4   :  { %v5118_v48 = vpop.eup %5117 }
  0xf5   :  { %v472_v49 = vadd.f32 1.0, %v5118_v48 }
  0xf7   :  { %5119 = vrcp.f32 %v472_v49 }
  0xf8   :  { %5121 = vtanh.f32 %v468_v45 }
 0x101   :  { %v5120_v52 = vpop.eup %5119 }
 0x102   :  { %481 = vrot.lane.b32.xlu1 %v5120_v52, %s5372_s2  ;;  %477 = vrot.lane.b32.xlu0 %v5120_v52, %s5373_s7  ;;  %v5122_v54 = vpop.eup %5121 }
 0x106   :  { %484 = vrot.lane.b32.xlu1 %v5120_v52, %s5374_s3  ;;  %489 = vrot.lane.b32.xlu0 %v5122_v54, %s5375_s4 }
 0x10a   :  { %492 = vrot.lane.b32.xlu1 %v5122_v54, %s5376_s26  ;;  %387 = vperm.xlu0 %5108, %v5602_v55  }
 0x10e   :  { %391 = vperm.xlu1 %5109, %v5602_v55   ;;  %496 = vrot.lane.b32.xlu0 %v5120_v52, %s5377_s27 }
 0x10f   :  { %5110 = vset.pattern.permute.xlu0 %v5378_v33 }
 0x112   :  { %5111 = vset.pattern.permute.xlu1 %v5379_v34 }
 0x174   :  { %v482_v1 = vpop.permute.xlu1 %481  ;;  %v478_v2 = vpop.permute.xlu0 %477 }
 0x175   :  { %v480_v7 = vsel %vm190_vm0, %v5120_v52, %v478_v2 }
 0x178   :  { %v485_v3 = vpop.permute.xlu1 %484  ;;  %v490_v5 = vpop.permute.xlu0 %489 }
 0x179   :  { %v487_v4 = vsel %vm190_vm0, %v482_v1, %v485_v3 }
 0x17a   :  { %v500_v9 = vmul.f32 0.0, %v487_v4 }
 0x17c   :  { %v493_v6 = vpop.permute.xlu1 %492 }
 0x17d   :  { %v495_v8 = vsel %vm190_vm0, %v490_v5, %v493_v6 }
 0x17e   :  { %v501_v10 = vmul.f32 %v495_v8, %v480_v7 }
 0x180   :  { %v502_v11 = vadd.f32 %v501_v10, %v500_v9 }
 0x182   :  { %5123 = vtanh.f32 %v502_v11 }
 0x189   :  { %v5630_v13 = vpop.permute.xlu0 %387 }
 0x18c   :  { %v5124_v16 = vpop.eup %5123 }
 0x18d   :  { %v5632_v14 = vpop.permute.xlu1 %391  ;;  %v497_v15 = vpop.permute.xlu0 %496 }
 0x18e   :  { %v394_v17 = vsel %vm190_vm0, %v5630_v13, %v5632_v14  ;;  %v499_v19 = vsel %vm190_vm0, %v478_v2, %v497_v15 }
 0x18f   :  { %v506_v20 = vsub.f32 1.0, %v394_v17  ;;  %v509_v21 = vmul.f32 %v502_v11, %v394_v17  ;;  %v504_v22 = vmul.f32 %v5124_v16, %v499_v19 }
 0x191   :  { %v507_v23 = vmul.f32 0.0, %v506_v20  ;;  %v5638_v24 = vmul.f32 %v504_v22, %v394_v17 }
 0x193   :  { %v508_v25 = vadd.f32 %v507_v23, %v5638_v24  ;;  %v510_v28 = vadd.f32 %v509_v21, %v507_v23 }
 0x195   :  { %4571 = vmatmul.mubr.msk.f32.vlgmr.msra.gmra.mrb[6].mxu0 %vm283_vm4, %v508_v25  ;;  %v632_v62 = vrot.slane %v510_v28, 6 }
 0x196   :  { %4911 = vmatpush3.bf16.msra.mxu0 %v5508_v12  ;;  %4592 = vmatprep.mubr.msk.f32.mxu0 %vm5369_vm3, %v5370_v27 }
 0x197   :  { %4912 = vmatprep.subr.bf16.mxu0 %v5368_v18 }
 0x19a   :  { %4914 = vmatpush3.bf16.msra.mxu0 %v5532_v26 }
 0x19b   :  { %4921 = vmatprep.subr.bf16.mxu0 %v5368_v18 }
 0x1b5   :  { %v4550_v30 = vpop.f32.mrb[4].mxu0 }
 0x1b6   :  { %v5654_v31 = vadd.f32 %v4550_v30, %v5651_v29  ;;  %v5656_v32 = vpop.f32.mrb[5].mxu0 }
 0x268   :  { %v592_v39 = vpop.f32.mrb[6].mxu0 }
 0x269   :  { %v597_v41 = vrot.slane %v592_v39, 6  ;;  %v4572_v44 = vpop.f32.mrb[7].mxu0 }
 0x26b   :  { %v599_v45 = vadd.f32 %v597_v41, %v5661_v37 }
 0x26d   :  { %v4303_v46 = vmul.f32 -1.442695, %v599_v45 }
 0x26f   :  { %5125 = vpow2.f32 %v4303_v46 }
 0x279   :  { %v5126_v47 = vpop.eup %5125 }
 0x27a   :  { %v603_v48 = vadd.f32 1.0, %v5126_v47 }
 0x27c   :  { %5127 = vrcp.f32 %v603_v48 }
 0x27d   :  { %5129 = vtanh.f32 %v599_v45 }
 0x286   :  { %v5128_v49 = vpop.eup %5127 }
 0x287   :  { %612 = vrot.lane.b32.xlu0 %v5128_v49, %s5372_s2  ;;  %608 = vrot.lane.b32.xlu1 %v5128_v49, %s5373_s7  ;;  %v5130_v52 = vpop.eup %5129 }
 0x28b   :  { %620 = vrot.lane.b32.xlu0 %v5130_v52, %s5375_s4  ;;  %615 = vrot.lane.b32.xlu1 %v5128_v49, %s5374_s3 }
 0x28f   :  { %515 = vperm.xlu0 %5110, %v5602_v55   ;;  %623 = vrot.lane.b32.xlu1 %v5130_v52, %s5376_s26 }
 0x293   :  { %519 = vperm.xlu1 %5111, %v5602_v55  }
 0x297   :  { %627 = vrot.lane.b32.xlu1 %v5128_v49, %s5377_s27 }
 0x2f9   :  { %v609_v53 = vpop.permute.xlu1 %608  ;;  %v613_v54 = vpop.permute.xlu0 %612 }
 0x2fa   :  { %v611_v60 = vsel %vm190_vm0, %v5128_v49, %v609_v53 }
 0x2fd   :  { %v616_v56 = vpop.permute.xlu1 %615  ;;  %v621_v57 = vpop.permute.xlu0 %620 }
 0x2fe   :  { %v618_v61 = vsel %vm190_vm0, %v613_v54, %v616_v56 }
 0x2ff   :  { %v634_v0 = vmul.f32 %v632_v62, %v618_v61 }
 0x301   :  { %v624_v58 = vpop.permute.xlu1 %623 }
 0x302   :  { %v626_v59 = vsel %vm190_vm0, %v621_v57, %v624_v58 }
 0x303   :  { %v635_v63 = vmul.f32 %v626_v59, %v611_v60 }
 0x305   :  { %v636_v1 = vadd.f32 %v635_v63, %v634_v0 }
 0x307   :  { %5131 = vtanh.f32 %v636_v1  ;;  %v650_v2 = vrot.slane %v636_v1, 2 }
 0x30e   :  { %v5675_v3 = vpop.permute.xlu0 %515 }
 0x311   :  { %v5132_v11 = vpop.eup %5131 }
 0x312   :  { %v5677_v4 = vpop.permute.xlu1 %519 }
 0x313   :  { %v522_v5 = vsel %vm190_vm0, %v5675_v3, %v5677_v4 }
 0x314   :  { %v643_v6 = vsub.f32 1.0, %v522_v5  ;;  %v652_v7 = vmul.f32 %v650_v2, %v522_v5  ;;  %v640_v16 = vrot.slane %v522_v5, 6 }
 0x316   :  { %v644_v8 = vmul.f32 %v643_v6, %v508_v25  ;;  %v653_v9 = vmul.f32 %v643_v6, %v510_v28  ;;  %v628_v10 = vpop.permute.xlu1 %627  ;;  %v5380_v25 = vmov 2   ;;  %v5381_v28 = vmov 5  }
 0x317   :  { %v630_v15 = vsel %vm190_vm0, %v609_v53, %v628_v10  ;;  %5112 = vset.pattern.permute.xlu1 %v5380_v25  ;;  %5113 = vset.pattern.permute.xlu0 %v5381_v28 }
 0x318   :  { %v638_v17 = vmul.f32 %v5132_v11, %v630_v15  ;;  %v654_v19 = vadd.f32 %v653_v9, %v652_v7  ;;  %v646_v20 = vrot.slane %v644_v8, 6 }
 0x31a   :  { %v5683_v21 = vmul.f32 %v640_v16, %v638_v17  ;;  %v774_v53 = vrot.slane %v654_v19, 4 }
 0x31c   :  { %v648_v22 = vadd.f32 %v646_v20, %v5683_v21 }
 0x31e   :  { %v665_v23 = vrot.slane %v648_v22, 2 }
 0x320   :  { %4582 = vmatmul.mubr.msk.f32.vlgmr.msra.gmra.mrb[4].mxu1 %vm283_vm4, %v665_v23 }
 0x321   :  { %4917 = vmatpush3.bf16.msra.mxu1 %v5508_v12  ;;  %4603 = vmatprep.mubr.msk.f32.mxu1 %vm5369_vm3, %v5370_v27 }
 0x322   :  { %4918 = vmatprep.subr.bf16.mxu1 %v5368_v18 }
 0x325   :  { %4920 = vmatpush3.bf16.msra.mxu1 %v5532_v26 }
 0x326   :  { %4927 = vmatprep.subr.bf16.mxu1 %v5368_v18 }
 0x3f3   :  { %v734_v30 = vpop.f32.mrb[4].mxu1 }
 0x3f4   :  { %v739_v33 = vrot.slane %v734_v30, 4  ;;  %v4583_v34 = vpop.f32.mrb[5].mxu1 }
 0x3f6   :  { %v741_v35 = vadd.f32 %v739_v33, %v5584_v43 }
 0x3f8   :  { %v4305_v39 = vmul.f32 -1.442695, %v741_v35 }
 0x3fa   :  { %5133 = vpow2.f32 %v4305_v39 }
 0x404   :  { %v5134_v41 = vpop.eup %5133 }
 0x405   :  { %v745_v44 = vadd.f32 1.0, %v5134_v41 }
 0x407   :  { %5135 = vrcp.f32 %v745_v44 }
 0x408   :  { %5137 = vtanh.f32 %v741_v35 }
 0x411   :  { %v5136_v45 = vpop.eup %5135 }
 0x412   :  { %754 = vrot.lane.b32.xlu1 %v5136_v45, %s5372_s2  ;;  %750 = vrot.lane.b32.xlu0 %v5136_v45, %s5373_s7  ;;  %v5138_v46 = vpop.eup %5137 }
 0x416   :  { %762 = vrot.lane.b32.xlu1 %v5138_v46, %s5375_s4  ;;  %757 = vrot.lane.b32.xlu0 %v5136_v45, %s5374_s3 }
 0x41a   :  { %656 = vperm.xlu1 %5112, %v5602_v55   ;;  %765 = vrot.lane.b32.xlu0 %v5138_v46, %s5376_s26 }
 0x41e   :  { %769 = vrot.lane.b32.xlu1 %v5136_v45, %s5377_s27  ;;  %660 = vperm.xlu0 %5113, %v5602_v55  }
 0x484   :  { %v751_v43 = vpop.permute.xlu0 %750  ;;  %v755_v47 = vpop.permute.xlu1 %754 }
 0x485   :  { %v753_v56 = vsel %vm190_vm0, %v5136_v45, %v751_v43 }
 0x488   :  { %v758_v48 = vpop.permute.xlu0 %757  ;;  %v763_v52 = vpop.permute.xlu1 %762 }
 0x489   :  { %v760_v49 = vsel %vm190_vm0, %v755_v47, %v758_v48 }
 0x48a   :  { %v776_v58 = vmul.f32 %v774_v53, %v760_v49 }
 0x48c   :  { %v766_v54 = vpop.permute.xlu0 %765 }
 0x48d   :  { %v768_v57 = vsel %vm190_vm0, %v763_v52, %v766_v54 }
 0x48e   :  { %v777_v59 = vmul.f32 %v768_v57, %v753_v56 }
 0x490   :  { %v778_v60 = vadd.f32 %v777_v59, %v776_v58 }
 0x492   :  { %5139 = vtanh.f32 %v778_v60  ;;  %v793_v62 = vrot.slane %v778_v60, 4 }
 0x499   :  { %v5705_v61 = vpop.permute.xlu1 %656 }
 0x49c   :  { %v5140_v1 = vpop.eup %5139 }
 0x49d   :  { %v770_v63 = vpop.permute.xlu1 %769  ;;  %v5707_v0 = vpop.permute.xlu0 %660 }
 0x49e   :  { %v772_v2 = vsel %vm190_vm0, %v751_v43, %v770_v63  ;;  %v663_v5 = vsel %vm190_vm0, %v5705_v61, %v5707_v0 }
 0x49f   :  { %v780_v6 = vmul.f32 %v5140_v1, %v772_v2  ;;  %v782_v7 = vrot.slane %v663_v5, 4  ;;  %v785_v8 = vsub.f32 1.0, %v663_v5  ;;  %v795_v9 = vmul.f32 %v793_v62, %v663_v5 }
 0x4a1   :  { %v787_v10 = vmul.f32 %v785_v8, %v665_v23  ;;  %v796_v11 = vmul.f32 %v785_v8, %v654_v19  ;;  %v5713_v15 = vmul.f32 %v782_v7, %v780_v6  ;;  %v5382_v19 = vmov 3  }
 0x4a2   :  { %5114 = vset.pattern.permute.xlu0 %v5382_v19  ;;  %v5383_v23 = vmov 4  }
 0x4a3   :  { %v789_v16 = vrot.slane %v787_v10, 4  ;;  %v797_v17 = vadd.f32 %v796_v11, %v795_v9  ;;  %5115 = vset.pattern.permute.xlu1 %v5383_v23 }
 0x4a5   :  { %v791_v20 = vadd.f32 %v789_v16, %v5713_v15  ;;  %v917_v53 = vrot.slane %v797_v17, 2 }
 0x4a7   :  { %v808_v22 = vrot.slane %v791_v20, 4 }
 0x4a9   :  { %4593 = vmatmul.mubr.msk.f32.vlgmr.msra.gmra.mrb[8].mxu0 %vm283_vm4, %v808_v22 }
 0x4aa   :  { %4923 = vmatpush3.bf16.msra.mxu0 %v5508_v12  ;;  %4614 = vmatprep.mubr.msk.f32.mxu0 %vm5369_vm3, %v5370_v27 }
 0x4ab   :  { %4924 = vmatprep.subr.bf16.mxu0 %v5368_v18 }
 0x4ae   :  { %4926 = vmatpush3.bf16.msra.mxu0 %v5532_v26 }
 0x4af   :  { %4933 = vmatprep.subr.bf16.mxu0 %v5368_v18 }
 0x57c   :  { %v877_v25 = vpop.f32.mrb[8].mxu0 }
 0x57d   :  { %v882_v28 = vrot.slane %v877_v25, 2  ;;  %v4594_v30 = vpop.f32.mrb[9].mxu0 }
 0x57f   :  { %v884_v33 = vadd.f32 %v882_v28, %v5661_v37 }
 0x581   :  { %v4307_v34 = vmul.f32 -1.442695, %v884_v33 }
 0x583   :  { %5141 = vpow2.f32 %v4307_v34 }
 0x58d   :  { %v5142_v35 = vpop.eup %5141 }
 0x58e   :  { %v888_v39 = vadd.f32 1.0, %v5142_v35 }
 0x590   :  { %5143 = vrcp.f32 %v888_v39 }
 0x591   :  { %5145 = vtanh.f32 %v884_v33 }
 0x59a   :  { %v5144_v41 = vpop.eup %5143 }
 0x59b   :  { %897 = vrot.lane.b32.xlu0 %v5144_v41, %s5372_s2  ;;  %893 = vrot.lane.b32.xlu1 %v5144_v41, %s5373_s7  ;;  %v5146_v44 = vpop.eup %5145 }
 0x59f   :  { %905 = vrot.lane.b32.xlu0 %v5146_v44, %s5375_s4  ;;  %900 = vrot.lane.b32.xlu1 %v5144_v41, %s5374_s3 }
 0x5a3   :  { %799 = vperm.xlu0 %5114, %v5602_v55   ;;  %908 = vrot.lane.b32.xlu1 %v5146_v44, %s5376_s26 }
 0x5a7   :  { %803 = vperm.xlu1 %5115, %v5602_v55   ;;  %5116 = vset.pattern.permute.xlu0 %v5383_v23 }
 0x5ab   :  { %912 = vrot.lane.b32.xlu1 %v5144_v41, %s5377_s27 }
 0x60d   :  { %v894_v37 = vpop.permute.xlu1 %893  ;;  %v898_v45 = vpop.permute.xlu0 %897 }
 0x60e   :  { %v896_v49 = vsel %vm190_vm0, %v5144_v41, %v894_v37 }
 0x611   :  { %v901_v46 = vpop.permute.xlu1 %900  ;;  %v906_v43 = vpop.permute.xlu0 %905 }
 0x612   :  { %v903_v52 = vsel %vm190_vm0, %v898_v45, %v901_v46 }
 0x613   :  { %v919_v56 = vmul.f32 %v917_v53, %v903_v52 }
 0x615   :  { %v909_v47 = vpop.permute.xlu1 %908 }
 0x616   :  { %v911_v48 = vsel %vm190_vm0, %v906_v43, %v909_v47 }
 0x617   :  { %v920_v54 = vmul.f32 %v911_v48, %v896_v49 }
 0x619   :  { %v921_v57 = vadd.f32 %v920_v54, %v919_v56 }
 0x61b   :  { %5147 = vtanh.f32 %v921_v57  ;;  %v936_v55 = vrot.slane %v921_v57, 6  ;;  %v5766_v57 = vsel %vm190_vm0, %v5707_v0, %v5705_v61  ;;  %v1065_v61 = vrot.slane %v5576_v42, 2 }
 0x61d   :  { %v5783_v0 = vsel %vm383_vm5, %v5566_v36, %v1065_v61 }
 0x622   :  { %v800_v58 = vpop.permute.xlu0 %799 }
 0x625   :  { %v5148_v6 = vpop.eup %5147 }
 0x626   :  { %v804_v59 = vpop.permute.xlu1 %803 }
 0x627   :  { %v806_v60 = vsel %vm190_vm0, %v800_v58, %v804_v59  ;;  %v945_v47 = vsel %vm190_vm0, %v804_v59, %v800_v58 }
 0x628   :  { %v928_v62 = vsub.f32 1.0, %v806_v60  ;;  %v938_v63 = vmul.f32 %v936_v55, %v806_v60  ;;  %v925_v8 = vrot.slane %v806_v60, 2  ;;  %v1058_v54 = vsub.f32 1.0, %v945_v47 }
 0x62a   :  { %v930_v1 = vmul.f32 %v928_v62, %v808_v22  ;;  %v913_v2 = vpop.permute.xlu1 %912  ;;  %v939_v5 = vmul.f32 %v928_v62, %v797_v17  ;;  %v942_v17 = vrot.slane %v5576_v42, 6  ;;  %v1189_v62 = vsub.f32 1.0, %v5766_v57 }
 0x62b   :  { %v915_v7 = vsel %vm190_vm0, %v894_v37, %v913_v2 }
 0x62c   :  { %v923_v9 = vmul.f32 %v5148_v6, %v915_v7  ;;  %v940_v10 = vadd.f32 %v939_v5, %v938_v63  ;;  %v932_v11 = vrot.slane %v930_v1, 2  ;;  %v5750_v22 = vsel %vm383_vm5, %v5566_v36, %v942_v17 }
 0x62e   :  { %v5737_v16 = vmul.f32 %v925_v8, %v923_v9  ;;  %v1063_v55 = vmul.f32 %v1058_v54, %v940_v10 }
 0x630   :  { %v934_v20 = vadd.f32 %v932_v11, %v5737_v16 }
 0x632   :  { %v947_v19 = vrot.slane %v934_v20, 6 }
 0x634   :  { %4604 = vmatmul.mubr.msk.f32.vlgmr.msra.gmra.mrb[6].mxu1 %vm283_vm4, %v947_v19  ;;  %v1060_v6 = vmul.f32 %v1058_v54, %v947_v19 }
 0x635   :  { %4929 = vmatpush3.bf16.msra.mxu1 %v5508_v12  ;;  %4625 = vmatprep.mubr.msk.f32.mxu1 %vm5369_vm3, %v5370_v27 }
 0x636   :  { %4930 = vmatprep.subr.bf16.mxu1 %v5368_v18 }
 0x639   :  { %4932 = vmatpush3.bf16.msra.mxu1 %v5532_v26 }
 0x63a   :  { %4939 = vmatprep.subr.bf16.mxu1 %v5368_v18 }
 0x707   :  { %v1016_v23 = vpop.f32.mrb[6].mxu1 }
 0x708   :  { %v1020_v25 = vadd.f32 %v1016_v23, %v5750_v22  ;;  %v4605_v28 = vpop.f32.mrb[7].mxu1 }
 0x70a   :  { %v4309_v30 = vmul.f32 -1.442695, %v1020_v25 }
 0x70c   :  { %5149 = vpow2.f32 %v4309_v30 }
 0x716   :  { %v5150_v33 = vpop.eup %5149 }
 0x717   :  { %v1024_v34 = vadd.f32 1.0, %v5150_v33 }
 0x719   :  { %5151 = vrcp.f32 %v1024_v34 }
 0x71a   :  { %5153 = vtanh.f32 %v1020_v25 }
 0x723   :  { %v5152_v35 = vpop.eup %5151 }
 0x724   :  { %1033 = vrot.lane.b32.xlu1 %v5152_v35, %s5372_s2  ;;  %1029 = vrot.lane.b32.xlu0 %v5152_v35, %s5373_s7  ;;  %v5154_v39 = vpop.eup %5153 }
 0x728   :  { %1041 = vrot.lane.b32.xlu1 %v5154_v39, %s5375_s4  ;;  %1036 = vrot.lane.b32.xlu0 %v5152_v35, %s5374_s3 }
 0x72c   :  { %1048 = vrot.lane.b32.xlu1 %v5152_v35, %s5377_s27  ;;  %1044 = vrot.lane.b32.xlu0 %v5154_v39, %s5376_s26 }
 0x796   :  { %v1030_v41 = vpop.permute.xlu0 %1029  ;;  %v1034_v44 = vpop.permute.xlu1 %1033 }
 0x797   :  { %v1032_v48 = vsel %vm190_vm0, %v5152_v35, %v1030_v41 }
 0x79a   :  { %v1037_v37 = vpop.permute.xlu0 %1036  ;;  %v1042_v46 = vpop.permute.xlu1 %1041 }
 0x79b   :  { %v1039_v45 = vsel %vm190_vm0, %v1034_v44, %v1037_v37 }
 0x79c   :  { %v1052_v52 = vmul.f32 %v1039_v45, %v940_v10 }
 0x79e   :  { %v1045_v43 = vpop.permute.xlu0 %1044  ;;  %v1049_v59 = vpop.permute.xlu1 %1048 }
 0x79f   :  { %v1047_v49 = vsel %vm190_vm0, %v1042_v46, %v1045_v43  ;;  %v1051_v2 = vsel %vm190_vm0, %v1030_v41, %v1049_v59  ;;  %v5798_v46 = vsel %vm190_vm0, %v5677_v4, %v5675_v3 }
 0x7a0   :  { %v1053_v53 = vmul.f32 %v1047_v49, %v1032_v48 }
 0x7a2   :  { %v1054_v56 = vadd.f32 %v1053_v53, %v1052_v52 }
 0x7a4   :  { %5155 = vtanh.f32 %v1054_v56  ;;  %v1062_v60 = vmul.f32 %v1054_v56, %v945_v47 }
 0x7a6   :  { %v1064_v63 = vadd.f32 %v1063_v55, %v1062_v60  ;;  %v1186_v55 = vrot.slane %v5766_v57, 6 }
 0x7a8   :  { %v1199_v58 = vmul.f32 %v1189_v62, %v1064_v63  ;;  %v1178_v33 = vrot.slane %v1064_v63, 6  ;;  %v1546_v63 = vld [vmem:[%s6584_s10] sm:$0xff] }
 0x7ae   :  { %v5156_v1 = vpop.eup %5155 }
 0x7af   :  { %v1056_v5 = vmul.f32 %v5156_v1, %v1051_v2  ;;  %v1549_v2 = vld [vmem:[%s6584_s10 + $0x18] sm:$0xff] }
 0x7b1   :  { %v5770_v7 = vmul.f32 %v1056_v5, %v945_v47  ;;  %v1323_v47 = vsub.f32 1.0, %v5798_v46 }
 0x7b3   :  { %v1061_v8 = vadd.f32 %v1060_v6, %v5770_v7  ;;  %v1550_v6 = vld [vmem:[%s6584_s10 + $0x20] sm:$0xff] }
 0x7b5   :  { %4615 = vmatmul.mubr.msk.f32.vlgmr.msra.gmra.mrb[10].mxu0 %vm283_vm4, %v1061_v8  ;;  %v1190_v53 = vmul.f32 %v1189_v62, %v1061_v8  ;;  %v1551_v8 = vld [vmem:[%s6584_s10 + $0x28] sm:$0xff] }
 0x7b6   :  { %4935 = vmatpush3.bf16.msra.mxu0 %v5508_v12  ;;  %4636 = vmatprep.mubr.msk.f32.mxu0 %vm5369_vm3, %v5370_v27  ;;  %v5847_v61 = vpack.c.bf16 %v1551_v8, %v1550_v6 }
 0x7b7   :  { %4936 = vmatprep.subr.bf16.mxu0 %v5368_v18  ;;  %v1192_v60 = vrot.slane %v1190_v53, 6  ;;  %v1554_v53 = vld [vmem:[%s6586_s12] sm:$0xff] }
 0x7ba   :  { %4938 = vmatpush3.bf16.msra.mxu0 %v5532_v26 }
 0x7bb   :  { %4951 = vmatprep.subr.bf16.mxu0 %v5368_v18 }
 0x888   :  { %v1138_v9 = vpop.f32.mrb[10].mxu0 }
 0x889   :  { %v1143_v10 = vrot.slane %v1138_v9, 6  ;;  %v4616_v11 = vpop.f32.mrb[11].mxu0  ;;  %v1552_v9 = vld [vmem:[%s6584_s10 + $0x30] sm:$0xff] }
 0x88b   :  { %v1145_v12 = vadd.f32 %v1143_v10, %v5783_v0  ;;  %v1553_v10 = vld [vmem:[%s6584_s10 + $0x38] sm:$0xff] }
 0x88c   :  { %v5857_v11 = vpack.c.bf16 %v1553_v10, %v1552_v9 }
 0x88d   :  { %v4311_v20 = vmul.f32 -1.442695, %v1145_v12 }
 0x88f   :  { %5157 = vpow2.f32 %v4311_v20 }
 0x899   :  { %v5158_v19 = vpop.eup %5157 }
 0x89a   :  { %v1149_v17 = vadd.f32 1.0, %v5158_v19  ;;  %v5867_v19 = vadd.f32 %v5651_v29, %v5656_v32 }
 0x89c   :  { %5159 = vrcp.f32 %v1149_v17 }
 0x89d   :  { %5161 = vtanh.f32 %v1145_v12 }
 0x8a6   :  { %v5160_v26 = vpop.eup %5159 }
 0x8a7   :  { %1158 = vrot.lane.b32.xlu1 %v5160_v26, %s5372_s2  ;;  %1154 = vrot.lane.b32.xlu0 %v5160_v26, %s5373_s7  ;;  %v5162_v42 = vpop.eup %5161 }
 0x8ab   :  { %1166 = vrot.lane.b32.xlu1 %v5162_v42, %s5375_s4  ;;  %1161 = vrot.lane.b32.xlu0 %v5160_v26, %s5374_s3 }
 0x8af   :  { %1173 = vrot.lane.b32.xlu1 %v5160_v26, %s5377_s27  ;;  %1169 = vrot.lane.b32.xlu0 %v5162_v42, %s5376_s26 }
 0x919   :  { %v1155_v36 = vpop.permute.xlu0 %1154  ;;  %v1159_v23 = vpop.permute.xlu1 %1158 }
 0x91a   :  { %v1157_v35 = vsel %vm190_vm0, %v5160_v26, %v1155_v36 }
 0x91d   :  { %v1162_v25 = vpop.permute.xlu0 %1161  ;;  %v1167_v30 = vpop.permute.xlu1 %1166 }
 0x91e   :  { %v1164_v28 = vsel %vm190_vm0, %v1159_v23, %v1162_v25 }
 0x91f   :  { %v1180_v41 = vmul.f32 %v1178_v33, %v1164_v28 }
 0x921   :  { %v1170_v34 = vpop.permute.xlu0 %1169  ;;  %v1174_v52 = vpop.permute.xlu1 %1173 }
 0x922   :  { %v1172_v39 = vsel %vm190_vm0, %v1167_v30, %v1170_v34  ;;  %v1176_v56 = vsel %vm190_vm0, %v1155_v36, %v1174_v52 }
 0x923   :  { %v1181_v44 = vmul.f32 %v1172_v39, %v1157_v35 }
 0x925   :  { %v1182_v37 = vadd.f32 %v1181_v44, %v1180_v41 }
 0x927   :  { %5163 = vtanh.f32 %v1182_v37  ;;  %v1196_v45 = vrot.slane %v1182_v37, 2 }
 0x929   :  { %v1198_v43 = vmul.f32 %v1196_v45, %v5766_v57  ;;  %v1548_v57 = vld [vmem:[%s6584_s10 + $0x10] sm:$0xff] }
 0x92a   :  { %v5835_v5 = vpack.c.bf16 %v1549_v2, %v1548_v57 }
 0x92b   :  { %v5802_v48 = vadd.f32 %v1199_v58, %v1198_v43  ;;  %v1547_v58 = vld [vmem:[%s6584_s10 + $0x8] sm:$0xff] }
 0x92c   :  { %v5822_v62 = vpack.c.bf16 %v1547_v58, %v1546_v63 }
 0x92d   :  { %v5807_v49 = vmul.f32 %v1323_v47, %v5802_v48  ;;  %v1312_v10 = vrot.slane %v5802_v48, 4 }
 0x931   :  { %v5164_v54 = vpop.eup %5163 }
 0x932   :  { %v1184_v3 = vmul.f32 %v5164_v54, %v1176_v56  ;;  %v1555_v54 = vld [vmem:[%s6586_s12 + $0x8] sm:$0xff] }
 0x933   :  { %v5889_v56 = vpack.c.bf16 %v1555_v54, %v1554_v53  ;;  %v5957_v54 = vsel %vm1577_vm12, 1.0, %v5370_v27  ;;  %vm1520_vm12 = vcmask 1045504  }
 0x934   :  { %v5811_v4 = vmul.f32 %v1186_v55, %v1184_v3  ;;  %v1556_v55 = vld [vmem:[%s6586_s12 + $0x10] sm:$0xff]  ;;  %v1557_v3 = vld [vmem:[%s6586_s12 + $0x18] sm:$0xff] }
 0x936   :  { %v5820_v59 = vadd.f32 %v1192_v60, %v5811_v4  ;;  %v5899_v60 = vpack.c.bf16 %v1557_v3, %v1556_v55 }
 0x938   :  { %v1203_v1 = vrot.slane %v5820_v59, 2  ;;  %v5947_v59 = vld [vmem:[%s6587_s13] ss:$0 sm:$0xff] }
 0x93a   :  { %4626 = vmatmul.mubr.msk.f32.vlgmr.msra.gmra.mrb[8].mxu1 %vm283_vm4, %v1203_v1  ;;  %v1325_v48 = vmul.f32 %v1323_v47, %v1203_v1 }
 0x93b   :  { %4941 = vmatpush3.bf16.msra.mxu1 %v5822_v62  ;;  %4655 = vmatprep.mubr.msk.f32.mxu1 %vm5369_vm3, %v5370_v27 }
 0x93c   :  { %4942 = vmatprep.subr.bf16.mxu1 %v5368_v18 }
 0x93f   :  { %4944 = vmatpush3.bf16.msra.mxu1 %v5835_v5 }
 0x940   :  { %4945 = vmatprep.subr.bf16.mxu1 %v5368_v18 }
 0x943   :  { %4947 = vmatpush3.bf16.msra.mxu1 %v5847_v61 }
 0x944   :  { %4948 = vmatprep.subr.bf16.mxu1 %v5368_v18 }
 0x947   :  { %4950 = vmatpush3.bf16.msra.mxu1 %v5857_v11 }
 0x948   :  { %4969 = vmatprep.subr.bf16.mxu1 %v5368_v18 }
 0x94a   :  { %4656 = vmatmul.mubr.f32.vlgmr.msra.gmra.mrb[10].mxu1 %v5370_v27 }
 0x94b   :  { %4696 = vmatprep.mubr.msk.f32.mxu1 %vm5369_vm3, %v5370_v27  ;;  %4971 = vmatpush3.bf16.msra.mxu1 %v5889_v56 }
 0x94c   :  { %4972 = vmatprep.subr.bf16.mxu1 %v5368_v18 }
 0x94f   :  { %4974 = vmatpush3.bf16.msra.mxu1 %v5899_v60 }
 0x950   :  { %4975 = vmatprep.subr.bf16.mxu1 %v5368_v18 }
 0xa0d   :  { %v1272_v12 = vpop.f32.mrb[8].mxu1 }
 0xa0e   :  { %v4627_v20 = vpop.f32.mrb[9].mxu1  ;;  %v1277_v23 = vrot.slane %v1272_v12, 4 }
 0xa10   :  { %v1279_v28 = vadd.f32 %v1277_v23, %v5750_v22 }
 0xa12   :  { %v4313_v30 = vmul.f32 -1.442695, %v1279_v28 }
 0xa1d   :  { %v1648_v17 = vpop.f32.mrb[10].mxu1 }
 0xa1e   :  { %v1652_v26 = vadd.f32 %v1648_v17, %v5867_v19  ;;  %v4657_v42 = vpop.f32.mrb[11].mxu1 }
 0xa20   :  { %5165 = vtanh.f32 %v1652_v26  ;;  %v4318_v25 = vmul.f32 -1.442695, %v1652_v26 }
 0xa22   :  { %5167 = vpow2.f32 %v4318_v25 }
 0xa23   :  { %5169 = vpow2.f32 %v4313_v30 }
 0xa2a   :  { %v5166_v36 = vpop.eup %5165 }
 0xa2b   :  { %1662 = vrot.lane.b32.xlu0 %v5166_v36, %s5374_s3 }
 0xa2c   :  { %v5168_v33 = vpop.eup %5167 }
 0xa2d   :  { %v1656_v34 = vadd.f32 1.0, %v5168_v33  ;;  %v5170_v35 = vpop.eup %5169 }
 0xa2e   :  { %v1283_v29 = vadd.f32 1.0, %v5170_v35  ;;  %v1320_v35 = vrot.slane %v5798_v46, 4 }
 0xa2f   :  { %5171 = vrcp.f32 %v1656_v34 }
 0xa30   :  { %5173 = vrcp.f32 %v1283_v29 }
 0xa31   :  { %5175 = vtanh.f32 %v1279_v28 }
 0xa39   :  { %v5172_v32 = vpop.eup %5171 }
 0xa3a   :  { %v5174_v44 = vpop.eup %5173  ;;  %v1660_v37 = vmul.f32 0.0, %v5172_v32 }
 0xa3b   :  { %v5176_v22 = vpop.eup %5175 }
 0xa9d   :  { %v1663_v39 = vpop.permute.xlu0 %1662 }
 0xa9e   :  { %v1665_v41 = vmul.f32 %v5172_v32, %v1663_v39 }
 0xaa0   :  { %1667 = vrot.lane.b32.xlu1 %v1665_v41, %s5377_s27 }
 0xaa4   :  { %1288 = vrot.lane.b32.xlu1 %v5174_v44, %s5373_s7 }
 0xaa8   :  { %1295 = vrot.lane.b32.xlu1 %v5174_v44, %s5374_s3 }
 0xaac   :  { %1303 = vrot.lane.b32.xlu1 %v5176_v22, %s5376_s26 }
 0xb12   :  { %v1668_v45 = vpop.permute.xlu1 %1667 }
 0xb13   :  { %v5876_v43 = vadd.f32 %v1668_v45, %v1660_v37 }
 0xb15   :  { %5177 = vtanh.f32 %v5876_v43 }
 0xb16   :  { %v1289_v63 = vpop.permute.xlu1 %1288 }
 0xb17   :  { %v1291_v20 = vsel %vm190_vm0, %v5174_v44, %v1289_v63 }
 0xb1a   :  { %v1296_v2 = vpop.permute.xlu1 %1295 }
 0xb1e   :  { %v1304_v9 = vpop.permute.xlu1 %1303 }
 0xb1f   :  { %v5178_v52 = vpop.eup %5177 }
 0xb20   :  { %1673 = vrot.lane.b32.xlu0 %v5178_v52, %s5374_s3  ;;  %v5384_v52 = vmov 1.0  }
 0xb21   :  { %v5954_v53 = vsel %vm1575_vm11, -1.0, %v5384_v52  ;;  %vm1518_vm11 = vcmask 1044480  }
 0xb24   :  { %1292 = vrot.lane.b32.xlu0 %v5174_v44, %s5372_s2 }
 0xb28   :  { %1300 = vrot.lane.b32.xlu0 %v5176_v22, %s5375_s4 }
 0xb2c   :  { %1307 = vrot.lane.b32.xlu0 %v5174_v44, %s5377_s27 }
 0xb92   :  { %v1674_v58 = vpop.permute.xlu0 %1673 }
 0xb93   :  { %v5903_v57 = vmul.f32 %v5172_v32, %v1674_v58  ;;  %v1327_v32 = vrot.slane %v1325_v48, 4 }
 0xb95   :  { %1678 = vrot.lane.b32.xlu1 %v5903_v57, %s5377_s27 }
 0xb96   :  { %v1293_v6 = vpop.permute.xlu0 %1292 }
 0xb97   :  { %v1298_v8 = vsel %vm190_vm0, %v1293_v6, %v1296_v2  ;;  %v1565_v6 = vcvt.s32.f32 %v5594_v51 }
 0xb98   :  { %v1314_v26 = vmul.f32 %v1312_v10, %v1298_v8  ;;  %v1773_v8 = vshrl.u32 %v372_v50, 7 }
 0xb99   :  { %v1567_v10 = vadd.f32 0.5, %v1565_v6 }
 0xb9a   :  { %v1301_v12 = vpop.permute.xlu0 %1300 }
 0xb9b   :  { %v1306_v17 = vsel %vm190_vm0, %v1301_v12, %v1304_v9  ;;  %v5967_v12 = vsub.s32 0, %v1773_v8 }
 0xb9c   :  { %v1315_v42 = vmul.f32 %v1306_v17, %v1291_v20  ;;  %v5970_v20 = vsub.s32 1, %v1773_v8 }
 0xb9e   :  { %v1316_v36 = vadd.f32 %v1315_v42, %v1314_v26  ;;  %v1308_v30 = vpop.permute.xlu0 %1307 }
 0xb9f   :  { %v1310_v34 = vsel %vm190_vm0, %v1289_v63, %v1308_v30 }
 0xba0   :  { %5179 = vtanh.f32 %v1316_v36  ;;  %v1331_v23 = vrot.slane %v1316_v36, 4  ;;  %v1566_v36 = vadd.f32 1.5, %v1565_v6 }
 0xba2   :  { %v1333_v25 = vmul.f32 %v1331_v23, %v5798_v46 }
 0xba4   :  { %v5913_v28 = vadd.f32 %v5807_v49, %v1333_v25 }
 0xbaa   :  { %v5180_v33 = vpop.eup %5179 }
 0xbab   :  { %v1318_v29 = vmul.f32 %v5180_v33, %v1310_v34 }
 0xbad   :  { %v5921_v39 = vmul.f32 %v1320_v35, %v1318_v29 }
 0xbaf   :  { %v1329_v41 = vadd.f32 %v1327_v32, %v5921_v39 }
 0xbb1   :  { %v1338_v44 = vrot.slane %v1329_v41, 4 }
 0xbb3   :  { %4637 = vmatmul.mubr.msk.f32.vlgmr.msra.gmra.mrb[12].mxu0 %vm283_vm4, %v1338_v44 }
 0xbb4   :  { %4953 = vmatpush3.bf16.msra.mxu0 %v5889_v56  ;;  %4666 = vmatprep.mubr.msk.f32.mxu0 %vm5369_vm3, %v5370_v27 }
 0xbb5   :  { %4954 = vmatprep.subr.bf16.mxu0 %v5368_v18 }
 0xbb8   :  { %4956 = vmatpush3.bf16.msra.mxu0 %v5899_v60 }
 0xbb9   :  { %4957 = vmatprep.subr.bf16.mxu0 %v5368_v18 }
 0xc07   :  { %v1679_v46 = vpop.permute.xlu1 %1678 }
 0xc08   :  { %4667 = vmatmul.mubr.msk.f32.vlgmr.msra.gmra.mrb[14].mxu0 %vm283_vm4, %v1679_v46 }
 0xc09   :  { %4959 = vmatpush3.bf16.msra.mxu0 %v5822_v62  ;;  %4685 = vmatprep.mubr.msk.f32.mxu0 %vm5369_vm3, %v5370_v27 }
 0xc0a   :  { %4960 = vmatprep.subr.bf16.mxu0 %v5368_v18 }
 0xc0d   :  { %4962 = vmatpush3.bf16.msra.mxu0 %v5835_v5 }
 0xc0e   :  { %4963 = vmatprep.subr.bf16.mxu0 %v5368_v18 }
 0xc11   :  { %4965 = vmatpush3.bf16.msra.mxu0 %v5847_v61 }
 0xc12   :  { %4966 = vmatprep.subr.bf16.mxu0 %v5368_v18 }
 0xc15   :  { %4968 = vmatpush3.bf16.msra.mxu0 %v5857_v11 }
 0xc16   :  { %4987 = vmatprep.subr.bf16.mxu0 %v5368_v18 }
 0xc86   :  { %v5942_v47 = vpop.f32.mrb[12].mxu0 }
 0xc87   :  { %v4638_v49 = vpop.f32.mrb[13].mxu0  ;;  %v1412_v52 = vrot.slane %v5942_v47, 2 }
 0xcdb   :  { %v1748_v1 = vpop.f32.mrb[14].mxu0 }
 0xcdc   :  { %v1749_v22 = vadd.f32 %v5947_v59, %v1748_v1  ;;  %v4668_v37 = vpop.f32.mrb[15].mxu0 }
 0xcde   :  { %v1753_v45 = vsel %vm1752_vm8, %v1749_v22, -inf  ;;  %v1756_v3 = vmul.f32 %v1749_v22, %v5954_v53 }
 0xcdf   :  { %1754 = vmax.xlane.f32.xlu0 %v1753_v45 }
 0xd6c   :  { %v1755_v55 = vpop.xlane.xlu0 %1754 }
 0xd6d   :  { %v1757_v63 = vmul.f32 %v5957_v54, %v1755_v55  ;;  %v1414_v55 = vadd.f32 %v1412_v52, %v5783_v0 }
 0xd6f   :  { %v1758_v58 = vsub.f32 %v1756_v3, %v1757_v63  ;;  %v4315_v3 = vmul.f32 -1.442695, %v1414_v55 }
 0xd71   :  { %v1759_v2 = vmul.f32 1.442695, %v1758_v58 }
 0xd73   :  { %5181 = vpow2.f32 %v1759_v2 }
 0xd7d   :  { %v5963_v9 = vpop.eup %5181 }
 0xd7e   :  { %1763 = vrot.lane.b32.xlu1 %v5963_v9, %s5385_s24  ;;  %v1775_v17 = vrot.slane %v5963_v9, %v5967_v12  ;;  %v1782_v50 = vrot.slane %v5963_v9, %v5970_v20 }
 0xd82   :  { %1569 = vrot.lane.b32.xlu1 %v1567_v10, %s5386_s25 }
 0xd86   :  { %1777 = vbcast.lane.b32.xlu1 %v1775_v17, 256 }
 0xd8a   :  { %1784 = vbcast.lane.b32.xlu1 %v1782_v50, 256 }
 0xd8e   :  { %1794 = vbcast.lane.b32.xlu1 %v1775_v17, 260 }
 0xd92   :  { %1802 = vbcast.lane.b32.xlu1 %v1782_v50, 260 }
 0xdf0   :  { %v1764_v51 = vpop.permute.xlu1 %1763 }
 0xdf1   :  { %v1767_v26 = vsel %vm1766_vm13, %v1764_v51, 0.0 }
 0xdf2   :  { %1768 = vadd.xlane.f32.xlu1 %v1767_v26 }
 0xdf4   :  { %v1570_v42 = vpop.permute.xlu1 %1569 }
 0xdf5   :  { %v5978_v25 = vsel %vm78_vm2, %v1566_v36, %v1570_v42 }
 0xdf8   :  { %v1778_v23 = vpop.permute.xlu1 %1777 }
 0xdf9   :  { %v1786_v48 = vsub.f32 %v5978_v25, %v1778_v23 }
 0xdfc   :  { %v1785_v30 = vpop.permute.xlu1 %1784 }
 0xdfd   :  { %v1787_v35 = vsub.f32 %v5978_v25, %v1785_v30 }
 0xe00   :  { %v1795_v33 = vpop.permute.xlu1 %1794 }
 0xe01   :  { %v1804_v34 = vmul.f32 %v1795_v33, %v1786_v48 }
 0xe03   :  { %v4320_v29 = vmul.f32 -1.442695, %v1804_v34 }
 0xe04   :  { %v1803_v32 = vpop.permute.xlu1 %1802 }
 0xe05   :  { %5183 = vpow2.f32 %v4320_v29  ;;  %v1805_v41 = vmul.f32 %v1803_v32, %v1787_v35 }
 0xe07   :  { %v4321_v44 = vmul.f32 -1.442695, %v1805_v41 }
 0xe09   :  { %5185 = vpow2.f32 %v4321_v44 }
 0xe0f   :  { %v5184_v46 = vpop.eup %5183 }
 0xe10   :  { %v1812_v49 = vadd.f32 1.0, %v5184_v46 }
 0xe12   :  { %5187 = vrcp.f32 %v1812_v49 }
 0xe13   :  { %v5186_v1 = vpop.eup %5185 }
 0xe14   :  { %v1813_v22 = vadd.f32 1.0, %v5186_v1 }
 0xe16   :  { %5189 = vrcp.f32 %v1813_v22 }
 0xe17   :  { %5191 = vpow2.f32 %v4315_v3 }
 0xe1c   :  { %v5188_v37 = vpop.eup %5187 }
 0xe1d   :  { %1836 = vrot.lane.b32.xlu0 %v5188_v37, %s5385_s24 }
 0xe20   :  { %v5190_v45 = vpop.eup %5189 }
 0xe21   :  { %1838 = vrot.lane.b32.xlu0 %v5190_v45, %s5385_s24  ;;  %v5192_v58 = vpop.eup %5191 }
 0xe22   :  { %v1418_v2 = vadd.f32 1.0, %v5192_v58 }
 0xe7f   :  { %v1769_v63 = vpop.xlane.xlu1 %1768 }
 0xe80   :  { %5193 = vrcp.f32 %v1769_v63 }
 0xe81   :  { %5195 = vrcp.f32 %v1418_v2 }
 0xe82   :  { %5197 = vtanh.f32 %v1414_v55 }
 0xe8a   :  { %v5194_v6 = vpop.eup %5193 }
 0xe8b   :  { %v1771_v8 = vmul.f32 %v5194_v6, %v5963_v9  ;;  %v5196_v50 = vpop.eup %5195 }
 0xe8c   :  { %v5198_v0 = vpop.eup %5197 }
 0xe8d   :  { %v1829_v10 = vrot.slane %v1771_v8, %v5970_v20  ;;  %v1821_v17 = vrot.slane %v1771_v8, %v5967_v12  ;;  %v1447_v8 = vrot.slane %v5913_v28, 2  ;;  %v1463_v28 = vrot.slane %v5921_v39, 2 }
 0xe8f   :  { %1832 = vbcast.lane.b32.xlu1 %v1829_v10, 264  ;;  %1824 = vbcast.lane.b32.xlu0 %v1821_v17, 264  ;;  %v1837_v47 = vpop.permute.xlu0 %1836 }
 0xe90   :  { %v1842_v26 = vsub.f32 %v5188_v37, %v1837_v47 }
 0xe93   :  { %1442 = vrot.lane.b32.xlu1 %v5196_v50, %s5377_s27  ;;  %1423 = vrot.lane.b32.xlu0 %v5196_v50, %s5373_s7  ;;  %v1839_v51 = vpop.permute.xlu0 %1838 }
 0xe94   :  { %v1843_v42 = vsub.f32 %v5190_v45, %v1839_v51 }
 0xe97   :  { %1427 = vrot.lane.b32.xlu0 %v5196_v50, %s5372_s2 }
 0xe9b   :  { %1430 = vrot.lane.b32.xlu0 %v5196_v50, %s5374_s3 }
 0xe9f   :  { %1435 = vrot.lane.b32.xlu0 %v5198_v0, %s5375_s4 }
 0xea3   :  { %1438 = vrot.lane.b32.xlu0 %v5198_v0, %s5376_s26 }
 0xf01   :  { %v1833_v36 = vpop.permute.xlu1 %1832  ;;  %v1825_v23 = vpop.permute.xlu0 %1824 }
 0xf02   :  { %v1845_v30 = vmul.f32 %v1843_v42, %v1833_v36  ;;  %v1844_v48 = vmul.f32 %v1842_v26, %v1825_v23  ;;  %v1336_v36 = vsel %vm190_vm0, %v5632_v14, %v5630_v13  ;;  %v1471_v23 = vrot.slane %v5770_v7, 2 }
 0xf03   :  { %v1465_v13 = vsel %vm190_vm0, %v5683_v21, %v1463_v28 }
 0xf04   :  { %v1854_v33 = vsel %vm1846_vm14, %v1845_v30, 0.0  ;;  %v1847_v34 = vsel %vm1846_vm14, %v1844_v48, 0.0 }
 0xf05   :  { %v1855_v35 = vrot.slane %v1854_v33, 4  ;;  %v1848_v29 = vrot.slane %v1847_v34, 4  ;;  %v1424_v32 = vpop.permute.xlu0 %1423  ;;  %v1443_v42 = vpop.permute.xlu1 %1442 }
 0xf06   :  { %v1426_v17 = vsel %vm190_vm0, %v5196_v50, %v1424_v32  ;;  %v1467_v50 = vrot.slane %v5811_v4, 6  ;;  %v1445_v48 = vsel %vm190_vm0, %v1424_v32, %v1443_v42 }
 0xf07   :  { %v1856_v41 = vadd.f32 %v1855_v35, %v1854_v33  ;;  %v1849_v44 = vadd.f32 %v1848_v29, %v1847_v34  ;;  %v1455_v33 = vrot.slane %v1336_v36, 2  ;;  %v1473_v35 = vsel %vm190_vm0, %v5737_v16, %v1471_v23 }
 0xf08   :  { %v1469_v32 = vsel %vm190_vm0, %v5713_v15, %v1467_v50 }
 0xf09   :  { %v1428_v46 = vpop.permute.xlu0 %1427  ;;  %v1857_v49 = vrot.slane %v1856_v41, 2  ;;  %v1850_v1 = vrot.slane %v1849_v44, 2 }
 0xf0b   :  { %v1858_v22 = vadd.f32 %v1857_v49, %v1856_v41  ;;  %v1851_v37 = vadd.f32 %v1850_v1, %v1849_v44  ;;  %v1487_v41 = vrot.slane %v5638_v24, 2  ;;  %v1483_v44 = vrot.slane %v5683_v21, 6 }
 0xf0c   :  { %v1497_v49 = vrot.slane %v1473_v35, 3 }
 0xf0d   :  { %v1431_v45 = vpop.permute.xlu0 %1430  ;;  %v1859_v52 = vrot.slane %v1858_v22, 1  ;;  %v1852_v55 = vrot.slane %v1851_v37, 1 }
 0xf0e   :  { %v1433_v6 = vsel %vm190_vm0, %v1428_v46, %v1431_v45  ;;  %v1479_v46 = vrot.slane %v5713_v15, 2  ;;  %v1491_v45 = vrot.slane %v1465_v13, 1 }
 0xf0f   :  { %v1860_v3 = vadd.f32 %v1859_v52, %v1858_v22  ;;  %v1853_v63 = vadd.f32 %v1852_v55, %v1851_v37  ;;  %v1449_v47 = vmul.f32 %v1447_v8, %v1433_v6  ;;  %v1531_v37 = vrot.slane %v1473_v35, 4 }
 0xf10   :  { %v1494_v52 = vrot.slane %v1469_v32, 2  ;;  %v1485_v55 = vsel %vm190_vm0, %v5921_v39, %v1483_v44 }
 0xf11   :  { %1865 = vbcast.lane.b32.xlu1 %v1860_v3, 256  ;;  %1862 = vbcast.lane.b32.xlu0 %v1853_v63, 256  ;;  %v1436_v58 = vpop.permute.xlu0 %1435  ;;  %v5998_v2 = vsel %vm1890_vm15, %v1860_v3, %v1853_v63  ;;  %v1527_v3 = vrot.slane %v1465_v13, 2  ;;  %v1537_v36 = vrot.slane %v1485_v55, 7 }
 0xf15   :  { %1893 = vrot.lane.b32.xlu0 %v5903_v57, %s5374_s3  ;;  %v1439_v10 = vpop.permute.xlu0 %1438  ;;  %v1475_v57 = vrot.slane %v5737_v16, 6 }
 0xf16   :  { %v1441_v0 = vsel %vm190_vm0, %v1436_v58, %v1439_v10  ;;  %v1529_v58 = vrot.slane %v1469_v32, 3 }
 0xf17   :  { %v1450_v51 = vmul.f32 %v1441_v0, %v1426_v17  ;;  %v1477_v29 = vsel %vm190_vm0, %v5770_v7, %v1475_v57  ;;  %v1481_v7 = vsel %vm190_vm0, %v5811_v4, %v1479_v46  ;;  %v1506_v17 = vrot.slane %v1485_v55, 6 }
 0xf18   :  { %v1500_v1 = vrot.slane %v1477_v29, 4  ;;  %v1533_v22 = vrot.slane %v1477_v29, 5  ;;  %v1503_v8 = vrot.slane %v1481_v7, 5  ;;  %v1883_v55 = vrot.slane %v5570_v40, 1 }
 0xf19   :  { %v1451_v26 = vadd.f32 %v1450_v51, %v1449_v47  ;;  %v1535_v47 = vrot.slane %v1481_v7, 6 }
 0xf1b   :  { %5199 = vtanh.f32 %v1451_v26 }
 0xf25   :  { %v5200_v30 = vpop.eup %5199 }
 0xf26   :  { %v1453_v34 = vmul.f32 %v5200_v30, %v1445_v48 }
 0xf28   :  { %v1457_v14 = vmul.f32 %v1455_v33, %v1453_v34 }
 0xf2a   :  { %v1459_v16 = vrot.slane %v1457_v14, 6  ;;  %v1489_v6 = vsel %vm190_vm0, %v1457_v14, %v1487_v41 }
 0xf2b   :  { %v1509_v51 = vrot.slane %v1489_v6, 7 }
 0xf2c   :  { %v1461_v21 = vsel %vm190_vm0, %v5638_v24, %v1459_v16 }
 0xf2d   :  { %v1511_v15 = vsel %vm57_vm1, %v1461_v21, %v1491_v45  ;;  %v1525_v63 = vrot.slane %v1461_v21, 1 }
 0xf2e   :  { %v1513_v4 = vsel %vm1512_vm6, %v1511_v15, %v1494_v52 }
 0xf2f   :  { %v1539_v10 = vsel %vm57_vm1, %v1525_v63, %v1527_v3  ;;  %v1515_v39 = vsel %vm1514_vm9, %v1513_v4, %v1497_v49  ;;  %vm4256_vm1 = vcmask 195584  }
 0xf30   :  { %v1540_v24 = vsel %vm1512_vm6, %v1539_v10, %v1529_v58  ;;  %v1517_v0 = vsel %vm1516_vm10, %v1515_v39, %v1500_v1 }
 0xf31   :  { %v1541_v26 = vsel %vm1514_vm9, %v1540_v24, %v1531_v37  ;;  %v1519_v42 = vsel %vm1518_vm11, %v1517_v0, %v1503_v8 }
 0xf32   :  { %v1542_v23 = vsel %vm1516_vm10, %v1541_v26, %v1533_v22  ;;  %v1521_v28 = vsel %vm1520_vm12, %v1519_v42, %v1506_v17 }
 0xf33   :  { %v1543_v30 = vsel %vm1518_vm11, %v1542_v23, %v1535_v47  ;;  %v6042_v57 = vsel %vm1522_vm7, %v1521_v28, %v1509_v51  ;;  %v1982_v23 = vrot.slane %v5876_v43, 6 }
 0xf34   :  { %v1544_v50 = vsel %vm1520_vm12, %v1543_v30, %v1537_v36 }
 0xf35   :  { %v6044_v48 = vsel %vm1522_vm7, %v1544_v50, %v1489_v6 }
 0xf83   :  { %v1866_v33 = vpop.permute.xlu1 %1865  ;;  %v1863_v34 = vpop.permute.xlu0 %1862 }
 0xf84   :  { %v1868_v35 = vmul.f32 %v1866_v33, %v6044_v48  ;;  %v1867_v29 = vmul.f32 %v1863_v34, %v6042_v57 }
 0xf86   :  { %v1876_v13 = vsel %vm283_vm4, %v1868_v35, 0.0  ;;  %v1869_v14 = vsel %vm283_vm4, %v1867_v29, 0.0 }
 0xf87   :  { %v1877_v41 = vrot.slane %v1876_v13, 4  ;;  %v1870_v44 = vrot.slane %v1869_v14, 4  ;;  %v1894_v3 = vpop.permute.xlu0 %1893 }
 0xf89   :  { %v1878_v46 = vadd.f32 %v1877_v41, %v1876_v13  ;;  %v1871_v32 = vadd.f32 %v1870_v44, %v1869_v14 }
 0xf8b   :  { %v1879_v49 = vrot.slane %v1878_v46, 2  ;;  %v1872_v1 = vrot.slane %v1871_v32, 2 }
 0xf8d   :  { %v1880_v22 = vadd.f32 %v1879_v49, %v1878_v46  ;;  %v1873_v16 = vadd.f32 %v1872_v1, %v1871_v32 }
 0xf8f   :  { %v1881_v37 = vrot.slane %v1880_v22, 1  ;;  %v1874_v7 = vrot.slane %v1873_v16, 1 }
 0xf91   :  { %v1875_v45 = vadd.f32 %v1874_v7, %v1873_v16  ;;  %v1882_v52 = vadd.f32 %v1881_v37, %v1880_v22 }
 0xf93   :  { %v1891_v21 = vsel %vm1890_vm15, %v1882_v52, %v1875_v45  ;;  %v1887_v15 = vadd.f32 %v1883_v55, %v1882_v52  ;;  %v1886_v58 = vadd.f32 %v1875_v45, %v5570_v40 }
 0xf94   :  { %v1896_v63 = vsel %vm283_vm4, %v1891_v21, %v1894_v3 }
 0xf95   :  { %4686 = vmatmul.mubr.msk.f32.vlgmr.msra.gmra.mrb[16].mxu0 %vm383_vm5, %v1896_v63  ;;  %v4140_v6 = vrot.slane %v1887_v15, 7 }
 0xf96   :  { %4989 = vmatpush3.bf16.msra.mxu0 %v5889_v56  ;;  %4726 = vmatprep.mubr.msk.f32.mxu0 %vm5369_vm3, %v5370_v27 }
 0xf97   :  { %4990 = vmatprep.subr.bf16.mxu0 %v5368_v18  ;;  %v6060_v4 = vsel %vm1890_vm15, %v4140_v6, %v1886_v58 }
 0xf9a   :  { %4992 = vmatpush3.bf16.msra.mxu0 %v5899_v60 }
 0xf9b   :  { %4993 = vmatprep.subr.bf16.mxu0 %v5368_v18 }
0x1068   :  { %v1966_v8 = vpop.f32.mrb[16].mxu0 }
0x1069   :  { %v1971_v10 = vrot.slane %v1966_v8, 6  ;;  %v4687_v39 = vpop.f32.mrb[17].mxu0 }
0x106b   :  { %v1973_v17 = vadd.f32 %v1971_v10, %v5867_v19 }
0x106d   :  { %5201 = vtanh.f32 %v1973_v17  ;;  %v4323_v0 = vmul.f32 -1.442695, %v1973_v17 }
0x106f   :  { %5203 = vpow2.f32 %v4323_v0 }
0x1077   :  { %v5202_v24 = vpop.eup %5201 }
0x1078   :  { %1986 = vrot.lane.b32.xlu1 %v5202_v24, %s5374_s3 }
0x1079   :  { %v5204_v47 = vpop.eup %5203 }
0x107a   :  { %v1977_v51 = vadd.f32 1.0, %v5204_v47 }
0x107c   :  { %5205 = vrcp.f32 %v1977_v51 }
0x1086   :  { %v5206_v26 = vpop.eup %5205 }
0x1087   :  { %v1984_v28 = vmul.f32 %v5206_v26, %v1982_v23 }
0x10ea   :  { %v1987_v42 = vpop.permute.xlu1 %1986 }
0x10eb   :  { %v1989_v36 = vmul.f32 %v5206_v26, %v1987_v42 }
0x10ed   :  { %1991 = vrot.lane.b32.xlu0 %v1989_v36, %s5377_s27 }
0x115f   :  { %v1992_v30 = vpop.permute.xlu0 %1991 }
0x1160   :  { %v6068_v50 = vadd.f32 %v1992_v30, %v1984_v28 }
0x1162   :  { %5207 = vtanh.f32 %v6068_v50 }
0x116c   :  { %v5208_v33 = vpop.eup %5207 }
0x116d   :  { %1997 = vrot.lane.b32.xlu1 %v5208_v33, %s5374_s3 }
0x11df   :  { %v1998_v34 = vpop.permute.xlu1 %1997 }
0x11e0   :  { %v6072_v35 = vmul.f32 %v5206_v26, %v1998_v34 }
0x11e2   :  { %v2002_v29 = vrot.slane %v6072_v35, 2 }
0x11e4   :  { %2003 = vrot.lane.b32.xlu0 %v2002_v29, %s5377_s27 }
0x1256   :  { %v2004_v13 = vpop.permute.xlu0 %2003 }
0x1257   :  { %4697 = vmatmul.mubr.msk.f32.vlgmr.msra.gmra.mrb[12].mxu1 %vm283_vm4, %v2004_v13 }
0x1258   :  { %4977 = vmatpush3.bf16.msra.mxu1 %v5822_v62  ;;  %4715 = vmatprep.mubr.msk.f32.mxu1 %vm5369_vm3, %v5370_v27 }
0x1259   :  { %4978 = vmatprep.subr.bf16.mxu1 %v5368_v18 }
0x125c   :  { %4980 = vmatpush3.bf16.msra.mxu1 %v5835_v5 }
0x125d   :  { %4981 = vmatprep.subr.bf16.mxu1 %v5368_v18 }
0x1260   :  { %4983 = vmatpush3.bf16.msra.mxu1 %v5847_v61 }
0x1261   :  { %4984 = vmatprep.subr.bf16.mxu1 %v5368_v18 }
0x1264   :  { %4986 = vmatpush3.bf16.msra.mxu1 %v5857_v11 }
0x1265   :  { %5005 = vmatprep.subr.bf16.mxu1 %v5368_v18 }
0x132a   :  { %v2073_v43 = vpop.f32.mrb[12].mxu1 }
0x132b   :  { %v2074_v14 = vadd.f32 %v5947_v59, %v2073_v43  ;;  %v4698_v41 = vpop.f32.mrb[13].mxu1 }
0x132d   :  { %v2077_v44 = vsel %vm1752_vm8, %v2074_v14, -inf  ;;  %v2080_v32 = vmul.f32 %v2074_v14, %v5954_v53 }
0x132e   :  { %2078 = vmax.xlane.f32.xlu1 %v2077_v44 }
0x13bb   :  { %v2079_v46 = vpop.xlane.xlu1 %2078 }
0x13bc   :  { %v2081_v49 = vmul.f32 %v5957_v54, %v2079_v46 }
0x13be   :  { %v2082_v1 = vsub.f32 %v2080_v32, %v2081_v49 }
0x13c0   :  { %v2083_v22 = vmul.f32 1.442695, %v2082_v1 }
0x13c2   :  { %5209 = vpow2.f32 %v2083_v22 }
0x13cc   :  { %v5210_v16 = vpop.eup %5209 }
0x13cd   :  { %2087 = vrot.lane.b32.xlu0 %v5210_v16, %s5385_s24  ;;  %v2114_v37 = vrot.slane %v5210_v16, %v5967_v12  ;;  %v2122_v7 = vrot.slane %v5210_v16, %v5970_v20  ;;  %v6097_v45 = vadd.f32 %v5210_v16, %v5963_v9 }
0x13cf   :  { %v2098_v52 = vrot.slane %v6097_v45, %v5967_v12  ;;  %v2105_v55 = vrot.slane %v6097_v45, %v5970_v20 }
0x13d1   :  { %2117 = vbcast.lane.b32.xlu0 %v2114_v37, 260 }
0x13d5   :  { %2125 = vbcast.lane.b32.xlu0 %v2122_v7, 260 }
0x13d9   :  { %2100 = vbcast.lane.b32.xlu0 %v2098_v52, 256 }
0x13dd   :  { %2107 = vbcast.lane.b32.xlu0 %v2105_v55, 256 }
0x143f   :  { %v2088_v21 = vpop.permute.xlu0 %2087 }
0x1440   :  { %v2090_v3 = vsel %vm1766_vm13, %v2088_v21, 0.0 }
0x1441   :  { %2091 = vadd.xlane.f32.xlu0 %v2090_v3 }
0x1443   :  { %v2118_v15 = vpop.permute.xlu0 %2117 }
0x1447   :  { %v2126_v63 = vpop.permute.xlu0 %2125 }
0x144b   :  { %v2101_v58 = vpop.permute.xlu0 %2100 }
0x144c   :  { %v2109_v6 = vsub.f32 %v5978_v25, %v2101_v58 }
0x144e   :  { %v2127_v9 = vmul.f32 %v2118_v15, %v2109_v6 }
0x144f   :  { %v2108_v8 = vpop.permute.xlu0 %2107 }
0x1450   :  { %v4325_v10 = vmul.f32 -1.442695, %v2127_v9  ;;  %v2110_v39 = vsub.f32 %v5978_v25, %v2108_v8 }
0x1452   :  { %5211 = vpow2.f32 %v4325_v10  ;;  %v2128_v17 = vmul.f32 %v2126_v63, %v2110_v39 }
0x1454   :  { %v4326_v24 = vmul.f32 -1.442695, %v2128_v17 }
0x1456   :  { %5213 = vpow2.f32 %v4326_v24 }
0x145c   :  { %v5212_v0 = vpop.eup %5211 }
0x145d   :  { %v2135_v47 = vadd.f32 1.0, %v5212_v0 }
0x145f   :  { %5215 = vrcp.f32 %v2135_v47 }
0x1460   :  { %v5214_v51 = vpop.eup %5213 }
0x1461   :  { %v2136_v26 = vadd.f32 1.0, %v5214_v51 }
0x1463   :  { %5217 = vrcp.f32 %v2136_v26 }
0x1469   :  { %v5216_v42 = vpop.eup %5215 }
0x146a   :  { %2159 = vrot.lane.b32.xlu1 %v5216_v42, %s5385_s24 }
0x146d   :  { %v5218_v36 = vpop.eup %5217 }
0x146e   :  { %2161 = vrot.lane.b32.xlu1 %v5218_v36, %s5385_s24 }
0x14ce   :  { %v2092_v23 = vpop.xlane.xlu0 %2091 }
0x14cf   :  { %5219 = vrcp.f32 %v2092_v23 }
0x14d9   :  { %v5220_v28 = vpop.eup %5219 }
0x14da   :  { %v2094_v30 = vmul.f32 %v5220_v28, %v5210_v16 }
0x14dc   :  { %v2152_v33 = vrot.slane %v2094_v30, %v5970_v20  ;;  %v2144_v34 = vrot.slane %v2094_v30, %v5967_v12  ;;  %v2160_v13 = vpop.permute.xlu1 %2159 }
0x14dd   :  { %v2165_v14 = vsub.f32 %v5216_v42, %v2160_v13 }
0x14de   :  { %2155 = vbcast.lane.b32.xlu1 %v2152_v33, 264  ;;  %2147 = vbcast.lane.b32.xlu0 %v2144_v34, 264 }
0x14e0   :  { %v2162_v43 = vpop.permute.xlu1 %2161 }
0x14e1   :  { %v2166_v41 = vsub.f32 %v5218_v36, %v2162_v43  ;;  %v2206_v43 = vrot.slane %v5570_v40, 3 }
0x1550   :  { %v2156_v44 = vpop.permute.xlu1 %2155  ;;  %v2148_v46 = vpop.permute.xlu0 %2147 }
0x1551   :  { %v2168_v32 = vmul.f32 %v2166_v41, %v2156_v44  ;;  %v2167_v49 = vmul.f32 %v2165_v14, %v2148_v46  ;;  %v2205_v44 = vrot.slane %v5570_v40, 2 }
0x1553   :  { %v2176_v1 = vsel %vm1846_vm14, %v2168_v32, 0.0  ;;  %v2169_v22 = vsel %vm1846_vm14, %v2167_v49, 0.0 }
0x1554   :  { %v2177_v37 = vrot.slane %v2176_v1, 4  ;;  %v2170_v16 = vrot.slane %v2169_v22, 4 }
0x1556   :  { %v2178_v7 = vadd.f32 %v2177_v37, %v2176_v1  ;;  %v2171_v52 = vadd.f32 %v2170_v16, %v2169_v22 }
0x1558   :  { %v2172_v55 = vrot.slane %v2171_v52, 2  ;;  %v2179_v21 = vrot.slane %v2178_v7, 2 }
0x155a   :  { %v2173_v3 = vadd.f32 %v2172_v55, %v2171_v52  ;;  %v2180_v15 = vadd.f32 %v2179_v21, %v2178_v7 }
0x155c   :  { %v2174_v63 = vrot.slane %v2173_v3, 1  ;;  %v2181_v58 = vrot.slane %v2180_v15, 1 }
0x155e   :  { %v2175_v6 = vadd.f32 %v2174_v63, %v2173_v3  ;;  %v2182_v9 = vadd.f32 %v2181_v58, %v2180_v15 }
0x1560   :  { %2184 = vbcast.lane.b32.xlu1 %v2175_v6, 256  ;;  %v6113_v8 = vsel %vm1890_vm15, %v2182_v9, %v2175_v6 }
0x1564   :  { %2187 = vbcast.lane.b32.xlu1 %v2182_v9, 256  ;;  %v2304_v9 = vrot.slane %v6068_v50, 6 }
0x1568   :  { %2215 = vrot.lane.b32.xlu1 %v2002_v29, %s5374_s3 }
0x15d2   :  { %v2185_v10 = vpop.permute.xlu1 %2184 }
0x15d3   :  { %v2189_v39 = vmul.f32 %v2185_v10, %v6042_v57 }
0x15d5   :  { %v2191_v17 = vsel %vm283_vm4, %v2189_v39, 0.0 }
0x15d6   :  { %v2192_v24 = vrot.slane %v2191_v17, 4  ;;  %v2188_v0 = vpop.permute.xlu1 %2187 }
0x15d7   :  { %v2190_v47 = vmul.f32 %v2188_v0, %v6044_v48 }
0x15d8   :  { %v2193_v51 = vadd.f32 %v2192_v24, %v2191_v17 }
0x15d9   :  { %v2198_v26 = vsel %vm283_vm4, %v2190_v47, 0.0 }
0x15da   :  { %v2194_v42 = vrot.slane %v2193_v51, 2  ;;  %v2199_v36 = vrot.slane %v2198_v26, 4  ;;  %v2216_v41 = vpop.permute.xlu1 %2215 }
0x15dc   :  { %v2195_v23 = vadd.f32 %v2194_v42, %v2193_v51  ;;  %v2200_v28 = vadd.f32 %v2199_v36, %v2198_v26 }
0x15de   :  { %v2201_v30 = vrot.slane %v2200_v28, 2  ;;  %v2196_v33 = vrot.slane %v2195_v23, 1 }
0x15e0   :  { %v2202_v35 = vadd.f32 %v2201_v30, %v2200_v28  ;;  %v2197_v34 = vadd.f32 %v2196_v33, %v2195_v23 }
0x15e2   :  { %v2203_v29 = vrot.slane %v2202_v35, 1  ;;  %v2209_v49 = vadd.f32 %v2205_v44, %v2197_v34 }
0x15e4   :  { %v2204_v13 = vadd.f32 %v2203_v29, %v2202_v35 }
0x15e6   :  { %v2213_v14 = vsel %vm1890_vm15, %v2204_v13, %v2197_v34  ;;  %v2210_v46 = vadd.f32 %v2206_v43, %v2204_v13 }
0x15e7   :  { %v2218_v32 = vsel %vm283_vm4, %v2213_v14, %v2216_v41 }
0x15e8   :  { %4716 = vmatmul.mubr.msk.f32.vlgmr.msra.gmra.mrb[14].mxu1 %vm383_vm5, %v2218_v32  ;;  %v4145_v1 = vrot.slane %v2210_v46, 7 }
0x15e9   :  { %5007 = vmatpush3.bf16.msra.mxu1 %v5889_v56  ;;  %4756 = vmatprep.mubr.msk.f32.mxu1 %vm5369_vm3, %v5370_v27 }
0x15ea   :  { %5008 = vmatprep.subr.bf16.mxu1 %v5368_v18  ;;  %v6132_v22 = vsel %vm1890_vm15, %v4145_v1, %v2209_v49 }
0x15ed   :  { %5010 = vmatpush3.bf16.msra.mxu1 %v5899_v60 }
0x15ee   :  { %5011 = vmatprep.subr.bf16.mxu1 %v5368_v18 }
0x16bb   :  { %v2288_v37 = vpop.f32.mrb[14].mxu1 }
0x16bc   :  { %v2293_v16 = vrot.slane %v2288_v37, 4  ;;  %v4717_v7 = vpop.f32.mrb[15].mxu1 }
0x16be   :  { %v2295_v52 = vadd.f32 %v2293_v16, %v5867_v19 }
0x16c0   :  { %5221 = vtanh.f32 %v2295_v52  ;;  %v4328_v21 = vmul.f32 -1.442695, %v2295_v52 }
0x16c2   :  { %5223 = vpow2.f32 %v4328_v21 }
0x16ca   :  { %v5222_v55 = vpop.eup %5221 }
0x16cb   :  { %2308 = vrot.lane.b32.xlu1 %v5222_v55, %s5374_s3 }
0x16cc   :  { %v5224_v3 = vpop.eup %5223 }
0x16cd   :  { %v2299_v15 = vadd.f32 1.0, %v5224_v3 }
0x16cf   :  { %5225 = vrcp.f32 %v2299_v15 }
0x16d9   :  { %v5226_v63 = vpop.eup %5225 }
0x16da   :  { %v2306_v10 = vmul.f32 %v5226_v63, %v2304_v9 }
0x173d   :  { %v2309_v58 = vpop.permute.xlu1 %2308 }
0x173e   :  { %v2311_v6 = vmul.f32 %v5226_v63, %v2309_v58 }
0x1740   :  { %2313 = vrot.lane.b32.xlu0 %v2311_v6, %s5377_s27 }
0x17b2   :  { %v2314_v39 = vpop.permute.xlu0 %2313 }
0x17b3   :  { %v6140_v17 = vadd.f32 %v2314_v39, %v2306_v10 }
0x17b5   :  { %5227 = vtanh.f32 %v6140_v17 }
0x17bf   :  { %v5228_v24 = vpop.eup %5227 }
0x17c0   :  { %2319 = vrot.lane.b32.xlu1 %v5228_v24, %s5374_s3 }
0x1832   :  { %v2320_v0 = vpop.permute.xlu1 %2319 }
0x1833   :  { %v6144_v47 = vmul.f32 %v5226_v63, %v2320_v0 }
0x1835   :  { %v2324_v51 = vrot.slane %v6144_v47, 4 }
0x1837   :  { %2325 = vrot.lane.b32.xlu0 %v2324_v51, %s5377_s27 }
0x18a9   :  { %v2326_v26 = vpop.permute.xlu0 %2325 }
0x18aa   :  { %4727 = vmatmul.mubr.msk.f32.vlgmr.msra.gmra.mrb[18].mxu0 %vm283_vm4, %v2326_v26 }
0x18ab   :  { %4995 = vmatpush3.bf16.msra.mxu0 %v5822_v62  ;;  %4745 = vmatprep.mubr.msk.f32.mxu0 %vm5369_vm3, %v5370_v27 }
0x18ac   :  { %4996 = vmatprep.subr.bf16.mxu0 %v5368_v18 }
0x18af   :  { %4998 = vmatpush3.bf16.msra.mxu0 %v5835_v5 }
0x18b0   :  { %4999 = vmatprep.subr.bf16.mxu0 %v5368_v18 }
0x18b3   :  { %5001 = vmatpush3.bf16.msra.mxu0 %v5847_v61 }
0x18b4   :  { %5002 = vmatprep.subr.bf16.mxu0 %v5368_v18 }
0x18b7   :  { %5004 = vmatpush3.bf16.msra.mxu0 %v5857_v11 }
0x18b8   :  { %5023 = vmatprep.subr.bf16.mxu0 %v5368_v18 }
0x197d   :  { %v2395_v50 = vpop.f32.mrb[18].mxu0 }
0x197e   :  { %v2396_v42 = vadd.f32 %v5947_v59, %v2395_v50  ;;  %v4728_v36 = vpop.f32.mrb[19].mxu0 }
0x1980   :  { %v2399_v23 = vsel %vm1752_vm8, %v2396_v42, -inf  ;;  %v2402_v30 = vmul.f32 %v2396_v42, %v5954_v53 }
0x1981   :  { %2400 = vmax.xlane.f32.xlu1 %v2399_v23 }
0x1a0e   :  { %v2401_v28 = vpop.xlane.xlu1 %2400 }
0x1a0f   :  { %v2403_v33 = vmul.f32 %v5957_v54, %v2401_v28 }
0x1a11   :  { %v2404_v35 = vsub.f32 %v2402_v30, %v2403_v33 }
0x1a13   :  { %v2405_v29 = vmul.f32 1.442695, %v2404_v35 }
0x1a15   :  { %5229 = vpow2.f32 %v2405_v29 }
0x1a1f   :  { %v5230_v34 = vpop.eup %5229 }
0x1a20   :  { %2409 = vrot.lane.b32.xlu0 %v5230_v34, %s5385_s24  ;;  %v2436_v13 = vrot.slane %v5230_v34, %v5967_v12  ;;  %v2444_v59 = vrot.slane %v5230_v34, %v5970_v20  ;;  %v6169_v43 = vadd.f32 %v5230_v34, %v6097_v45 }
0x1a22   :  { %v2420_v14 = vrot.slane %v6169_v43, %v5967_v12  ;;  %v2427_v41 = vrot.slane %v6169_v43, %v5970_v20 }
0x1a24   :  { %2439 = vbcast.lane.b32.xlu0 %v2436_v13, 260 }
0x1a28   :  { %2447 = vbcast.lane.b32.xlu0 %v2444_v59, 260 }
0x1a2c   :  { %2422 = vbcast.lane.b32.xlu0 %v2420_v14, 256 }
0x1a30   :  { %2429 = vbcast.lane.b32.xlu0 %v2427_v41, 256 }
0x1a92   :  { %v2410_v44 = vpop.permute.xlu0 %2409 }
0x1a93   :  { %v2412_v46 = vsel %vm1766_vm13, %v2410_v44, 0.0 }
0x1a94   :  { %2413 = vadd.xlane.f32.xlu0 %v2412_v46 }
0x1a96   :  { %v2440_v32 = vpop.permute.xlu0 %2439 }
0x1a9a   :  { %v2448_v49 = vpop.permute.xlu0 %2447 }
0x1a9e   :  { %v2423_v1 = vpop.permute.xlu0 %2422 }
0x1a9f   :  { %v2431_v37 = vsub.f32 %v5978_v25, %v2423_v1 }
0x1aa1   :  { %v2449_v45 = vmul.f32 %v2440_v32, %v2431_v37 }
0x1aa2   :  { %v2430_v16 = vpop.permute.xlu0 %2429 }
0x1aa3   :  { %v4330_v7 = vmul.f32 -1.442695, %v2449_v45  ;;  %v2432_v52 = vsub.f32 %v5978_v25, %v2430_v16 }
0x1aa5   :  { %5231 = vpow2.f32 %v4330_v7  ;;  %v2450_v55 = vmul.f32 %v2448_v49, %v2432_v52 }
0x1aa7   :  { %v4331_v21 = vmul.f32 -1.442695, %v2450_v55 }
0x1aa9   :  { %5233 = vpow2.f32 %v4331_v21 }
0x1aaf   :  { %v5232_v3 = vpop.eup %5231 }
0x1ab0   :  { %v2457_v15 = vadd.f32 1.0, %v5232_v3 }
0x1ab2   :  { %5235 = vrcp.f32 %v2457_v15 }
0x1ab3   :  { %v5234_v63 = vpop.eup %5233 }
0x1ab4   :  { %v2458_v58 = vadd.f32 1.0, %v5234_v63 }
0x1ab6   :  { %5237 = vrcp.f32 %v2458_v58 }
0x1abc   :  { %v5236_v6 = vpop.eup %5235 }
0x1abd   :  { %2481 = vrot.lane.b32.xlu1 %v5236_v6, %s5385_s24 }
0x1ac0   :  { %v5238_v9 = vpop.eup %5237 }
0x1ac1   :  { %2483 = vrot.lane.b32.xlu1 %v5238_v9, %s5385_s24 }
0x1b21   :  { %v2414_v10 = vpop.xlane.xlu0 %2413 }
0x1b22   :  { %5239 = vrcp.f32 %v2414_v10 }
0x1b2c   :  { %v5240_v39 = vpop.eup %5239 }
0x1b2d   :  { %v2416_v24 = vmul.f32 %v5240_v39, %v5230_v34 }
0x1b2f   :  { %v2474_v0 = vrot.slane %v2416_v24, %v5970_v20  ;;  %v2466_v26 = vrot.slane %v2416_v24, %v5967_v12  ;;  %v2482_v50 = vpop.permute.xlu1 %2481 }
0x1b30   :  { %v2487_v36 = vsub.f32 %v5236_v6, %v2482_v50 }
0x1b31   :  { %2477 = vbcast.lane.b32.xlu1 %v2474_v0, 264  ;;  %2469 = vbcast.lane.b32.xlu0 %v2466_v26, 264 }
0x1b33   :  { %v2484_v42 = vpop.permute.xlu1 %2483 }
0x1b34   :  { %v2488_v23 = vsub.f32 %v5238_v9, %v2484_v42 }
0x1ba3   :  { %v2478_v28 = vpop.permute.xlu1 %2477  ;;  %v2470_v30 = vpop.permute.xlu0 %2469 }
0x1ba4   :  { %v2490_v33 = vmul.f32 %v2488_v23, %v2478_v28  ;;  %v2489_v35 = vmul.f32 %v2487_v36, %v2470_v30  ;;  %v2528_v36 = vrot.slane %v5570_v40, 5  ;;  %v2527_v30 = vrot.slane %v5570_v40, 4 }
0x1ba6   :  { %v2498_v29 = vsel %vm1846_vm14, %v2490_v33, 0.0  ;;  %v2491_v13 = vsel %vm1846_vm14, %v2489_v35, 0.0 }
0x1ba7   :  { %v2499_v59 = vrot.slane %v2498_v29, 4  ;;  %v2492_v34 = vrot.slane %v2491_v13, 4 }
0x1ba9   :  { %v2500_v14 = vadd.f32 %v2499_v59, %v2498_v29  ;;  %v2493_v41 = vadd.f32 %v2492_v34, %v2491_v13 }
0x1bab   :  { %v2501_v44 = vrot.slane %v2500_v14, 2  ;;  %v2494_v46 = vrot.slane %v2493_v41, 2 }
0x1bad   :  { %v2495_v32 = vadd.f32 %v2494_v46, %v2493_v41  ;;  %v2502_v49 = vadd.f32 %v2501_v44, %v2500_v14 }
0x1baf   :  { %v2496_v1 = vrot.slane %v2495_v32, 1  ;;  %v2503_v37 = vrot.slane %v2502_v49, 1 }
0x1bb1   :  { %v2497_v45 = vadd.f32 %v2496_v1, %v2495_v32  ;;  %v2504_v16 = vadd.f32 %v2503_v37, %v2502_v49 }
0x1bb3   :  { %2506 = vbcast.lane.b32.xlu1 %v2497_v45, 256  ;;  %v6185_v7 = vsel %vm1890_vm15, %v2504_v16, %v2497_v45 }
0x1bb7   :  { %2509 = vbcast.lane.b32.xlu1 %v2504_v16, 256 }
0x1bbb   :  { %2537 = vrot.lane.b32.xlu1 %v2324_v51, %s5374_s3 }
0x1c25   :  { %v2507_v52 = vpop.permute.xlu1 %2506 }
0x1c26   :  { %v2511_v55 = vmul.f32 %v2507_v52, %v6042_v57  ;;  %v2626_v52 = vrot.slane %v6140_v17, 6 }
0x1c28   :  { %v2513_v21 = vsel %vm283_vm4, %v2511_v55, 0.0 }
0x1c29   :  { %v2514_v3 = vrot.slane %v2513_v21, 4  ;;  %v2510_v15 = vpop.permute.xlu1 %2509 }
0x1c2a   :  { %v2512_v63 = vmul.f32 %v2510_v15, %v6044_v48 }
0x1c2b   :  { %v2515_v58 = vadd.f32 %v2514_v3, %v2513_v21 }
0x1c2c   :  { %v2520_v6 = vsel %vm283_vm4, %v2512_v63, 0.0 }
0x1c2d   :  { %v2516_v9 = vrot.slane %v2515_v58, 2  ;;  %v2521_v10 = vrot.slane %v2520_v6, 4  ;;  %v2538_v28 = vpop.permute.xlu1 %2537 }
0x1c2f   :  { %v2517_v39 = vadd.f32 %v2516_v9, %v2515_v58  ;;  %v2522_v24 = vadd.f32 %v2521_v10, %v2520_v6  ;;  %v6236_v9 = vld [vmem:[%s6587_s13] ss:$0 sm:$0xff] }
0x1c31   :  { %v2523_v0 = vrot.slane %v2522_v24, 2  ;;  %v2518_v26 = vrot.slane %v2517_v39, 1 }
0x1c33   :  { %v2524_v47 = vadd.f32 %v2523_v0, %v2522_v24  ;;  %v2519_v50 = vadd.f32 %v2518_v26, %v2517_v39 }
0x1c35   :  { %v2525_v51 = vrot.slane %v2524_v47, 1  ;;  %v2531_v29 = vadd.f32 %v2527_v30, %v2519_v50 }
0x1c37   :  { %v2526_v42 = vadd.f32 %v2525_v51, %v2524_v47 }
0x1c39   :  { %v2535_v23 = vsel %vm1890_vm15, %v2526_v42, %v2519_v50  ;;  %v2532_v33 = vadd.f32 %v2528_v36, %v2526_v42 }
0x1c3a   :  { %v2540_v35 = vsel %vm283_vm4, %v2535_v23, %v2538_v28 }
0x1c3b   :  { %4746 = vmatmul.mubr.msk.f32.vlgmr.msra.gmra.mrb[20].mxu0 %vm383_vm5, %v2540_v35  ;;  %v4152_v13 = vrot.slane %v2532_v33, 7 }
0x1c3c   :  { %5025 = vmatpush3.bf16.msra.mxu0 %v5889_v56  ;;  %4786 = vmatprep.mubr.msk.f32.mxu0 %vm5369_vm3, %v5370_v27 }
0x1c3d   :  { %5026 = vmatprep.subr.bf16.mxu0 %v5368_v18  ;;  %v6204_v59 = vsel %vm1890_vm15, %v4152_v13, %v2531_v29 }
0x1c40   :  { %5028 = vmatpush3.bf16.msra.mxu0 %v5899_v60 }
0x1c41   :  { %5029 = vmatprep.subr.bf16.mxu0 %v5368_v18 }
0x1d0e   :  { %v2610_v34 = vpop.f32.mrb[20].mxu0 }
0x1d0f   :  { %v2615_v14 = vrot.slane %v2610_v34, 2  ;;  %v4747_v41 = vpop.f32.mrb[21].mxu0 }
0x1d11   :  { %v2617_v44 = vadd.f32 %v2615_v14, %v5867_v19 }
0x1d13   :  { %5241 = vtanh.f32 %v2617_v44  ;;  %v4333_v32 = vmul.f32 -1.442695, %v2617_v44 }
0x1d15   :  { %5243 = vpow2.f32 %v4333_v32 }
0x1d1d   :  { %v5242_v46 = vpop.eup %5241 }
0x1d1e   :  { %2630 = vrot.lane.b32.xlu1 %v5242_v46, %s5374_s3 }
0x1d1f   :  { %v5244_v49 = vpop.eup %5243 }
0x1d20   :  { %v2621_v1 = vadd.f32 1.0, %v5244_v49 }
0x1d22   :  { %5245 = vrcp.f32 %v2621_v1 }
0x1d2c   :  { %v5246_v37 = vpop.eup %5245 }
0x1d2d   :  { %v2628_v55 = vmul.f32 %v5246_v37, %v2626_v52 }
0x1d90   :  { %v2631_v45 = vpop.permute.xlu1 %2630 }
0x1d91   :  { %v2633_v16 = vmul.f32 %v5246_v37, %v2631_v45 }
0x1d93   :  { %2635 = vrot.lane.b32.xlu0 %v2633_v16, %s5377_s27 }
0x1e05   :  { %v2636_v21 = vpop.permute.xlu0 %2635 }
0x1e06   :  { %v6212_v3 = vadd.f32 %v2636_v21, %v2628_v55 }
0x1e08   :  { %5247 = vtanh.f32 %v6212_v3 }
0x1e12   :  { %v5248_v19 = vpop.eup %5247 }
0x1e13   :  { %2641 = vrot.lane.b32.xlu1 %v5248_v19, %s5374_s3 }
0x1e85   :  { %v2642_v15 = vpop.permute.xlu1 %2641 }
0x1e86   :  { %v6216_v63 = vmul.f32 %v5246_v37, %v2642_v15 }
0x1e88   :  { %v2646_v58 = vrot.slane %v6216_v63, 6 }
0x1e8a   :  { %2647 = vrot.lane.b32.xlu0 %v2646_v58, %s5377_s27 }
0x1efc   :  { %v2648_v6 = vpop.permute.xlu0 %2647 }
0x1efd   :  { %4757 = vmatmul.mubr.msk.f32.vlgmr.msra.gmra.mrb[16].mxu1 %vm283_vm4, %v2648_v6 }
0x1efe   :  { %5013 = vmatpush3.bf16.msra.mxu1 %v5822_v62  ;;  %4775 = vmatprep.mubr.msk.f32.mxu1 %vm5369_vm3, %v5370_v27 }
0x1eff   :  { %5014 = vmatprep.subr.bf16.mxu1 %v5368_v18 }
0x1f02   :  { %5016 = vmatpush3.bf16.msra.mxu1 %v5835_v5 }
0x1f03   :  { %5017 = vmatprep.subr.bf16.mxu1 %v5368_v18 }
0x1f06   :  { %5019 = vmatpush3.bf16.msra.mxu1 %v5847_v61 }
0x1f07   :  { %5020 = vmatprep.subr.bf16.mxu1 %v5368_v18 }
0x1f0a   :  { %5022 = vmatpush3.bf16.msra.mxu1 %v5857_v11 }
0x1f0b   :  { %5041 = vmatprep.subr.bf16.mxu1 %v5368_v18 }
0x1fd0   :  { %v2717_v17 = vpop.f32.mrb[16].mxu1 }
0x1fd1   :  { %v2718_v10 = vadd.f32 %v6236_v9, %v2717_v17  ;;  %v4758_v39 = vpop.f32.mrb[17].mxu1 }
0x1fd3   :  { %v2721_v24 = vsel %vm1752_vm8, %v2718_v10, -inf  ;;  %v2724_v26 = vmul.f32 %v2718_v10, %v5954_v53 }
0x1fd4   :  { %2722 = vmax.xlane.f32.xlu1 %v2721_v24 }
0x2061   :  { %v2723_v0 = vpop.xlane.xlu1 %2722 }
0x2062   :  { %v2725_v47 = vmul.f32 %v5957_v54, %v2723_v0 }
0x2064   :  { %v2726_v51 = vsub.f32 %v2724_v26, %v2725_v47 }
0x2066   :  { %v2727_v50 = vmul.f32 1.442695, %v2726_v51 }
0x2068   :  { %5249 = vpow2.f32 %v2727_v50 }
0x2072   :  { %v5250_v42 = vpop.eup %5249 }
0x2073   :  { %2731 = vrot.lane.b32.xlu0 %v5250_v42, %s5385_s24  ;;  %v2758_v36 = vrot.slane %v5250_v42, %v5967_v12  ;;  %v2766_v23 = vrot.slane %v5250_v42, %v5970_v20  ;;  %v6246_v28 = vadd.f32 %v5250_v42, %v6169_v43 }
0x2075   :  { %v2742_v30 = vrot.slane %v6246_v28, %v5967_v12  ;;  %v2749_v33 = vrot.slane %v6246_v28, %v5970_v20 }
0x2077   :  { %2761 = vbcast.lane.b32.xlu0 %v2758_v36, 260 }
0x207b   :  { %2769 = vbcast.lane.b32.xlu0 %v2766_v23, 260 }
0x207f   :  { %2744 = vbcast.lane.b32.xlu0 %v2742_v30, 256 }
0x2083   :  { %2751 = vbcast.lane.b32.xlu0 %v2749_v33, 256 }
0x20e5   :  { %v2732_v35 = vpop.permute.xlu0 %2731 }
0x20e6   :  { %v2734_v29 = vsel %vm1766_vm13, %v2732_v35, 0.0 }
0x20e7   :  { %2735 = vadd.xlane.f32.xlu0 %v2734_v29 }
0x20e9   :  { %v2762_v13 = vpop.permute.xlu0 %2761 }
0x20ed   :  { %v2770_v34 = vpop.permute.xlu0 %2769 }
0x20f1   :  { %v2745_v14 = vpop.permute.xlu0 %2744 }
0x20f2   :  { %v2753_v41 = vsub.f32 %v5978_v25, %v2745_v14 }
0x20f4   :  { %v2771_v43 = vmul.f32 %v2762_v13, %v2753_v41 }
0x20f5   :  { %v2752_v44 = vpop.permute.xlu0 %2751 }
0x20f6   :  { %v4335_v46 = vmul.f32 -1.442695, %v2771_v43  ;;  %v2754_v32 = vsub.f32 %v5978_v25, %v2752_v44 }
0x20f8   :  { %5251 = vpow2.f32 %v4335_v46  ;;  %v2772_v49 = vmul.f32 %v2770_v34, %v2754_v32 }
0x20fa   :  { %v4336_v1 = vmul.f32 -1.442695, %v2772_v49 }
0x20fc   :  { %5253 = vpow2.f32 %v4336_v1 }
0x2102   :  { %v5252_v37 = vpop.eup %5251 }
0x2103   :  { %v2779_v45 = vadd.f32 1.0, %v5252_v37 }
0x2105   :  { %5255 = vrcp.f32 %v2779_v45 }
0x2106   :  { %v5254_v16 = vpop.eup %5253 }
0x2107   :  { %v2780_v52 = vadd.f32 1.0, %v5254_v16 }
0x2109   :  { %5257 = vrcp.f32 %v2780_v52 }
0x210f   :  { %v5256_v55 = vpop.eup %5255 }
0x2110   :  { %2803 = vrot.lane.b32.xlu1 %v5256_v55, %s5385_s24 }
0x2113   :  { %v5258_v21 = vpop.eup %5257 }
0x2114   :  { %2805 = vrot.lane.b32.xlu1 %v5258_v21, %s5385_s24 }
0x2174   :  { %v2736_v19 = vpop.xlane.xlu0 %2735 }
0x2175   :  { %5259 = vrcp.f32 %v2736_v19 }
0x217f   :  { %v5260_v15 = vpop.eup %5259 }
0x2180   :  { %v2738_v6 = vmul.f32 %v5260_v15, %v5250_v42 }
0x2182   :  { %v2796_v17 = vrot.slane %v2738_v6, %v5970_v20  ;;  %v2788_v10 = vrot.slane %v2738_v6, %v5967_v12  ;;  %v2804_v39 = vpop.permute.xlu1 %2803 }
0x2183   :  { %v2809_v0 = vsub.f32 %v5256_v55, %v2804_v39 }
0x2184   :  { %2799 = vbcast.lane.b32.xlu1 %v2796_v17, 264  ;;  %2791 = vbcast.lane.b32.xlu0 %v2788_v10, 264 }
0x2186   :  { %v2806_v24 = vpop.permute.xlu1 %2805 }
0x2187   :  { %v2810_v26 = vsub.f32 %v5258_v21, %v2806_v24 }
0x21f6   :  { %v2800_v47 = vpop.permute.xlu1 %2799  ;;  %v2792_v51 = vpop.permute.xlu0 %2791 }
0x21f7   :  { %v2812_v50 = vmul.f32 %v2810_v26, %v2800_v47  ;;  %v2811_v36 = vmul.f32 %v2809_v0, %v2792_v51  ;;  %v2850_v47 = vrot.slane %v5570_v40, 7 }
0x21f9   :  { %v2820_v23 = vsel %vm1846_vm14, %v2812_v50, 0.0  ;;  %v2813_v30 = vsel %vm1846_vm14, %v2811_v36, 0.0  ;;  %v2849_v36 = vrot.slane %v5570_v40, 6 }
0x21fa   :  { %v2821_v33 = vrot.slane %v2820_v23, 4  ;;  %v2814_v42 = vrot.slane %v2813_v30, 4 }
0x21fc   :  { %v2822_v35 = vadd.f32 %v2821_v33, %v2820_v23  ;;  %v2815_v29 = vadd.f32 %v2814_v42, %v2813_v30 }
0x21fe   :  { %v2823_v13 = vrot.slane %v2822_v35, 2  ;;  %v2816_v34 = vrot.slane %v2815_v29, 2 }
0x2200   :  { %v2824_v14 = vadd.f32 %v2823_v13, %v2822_v35  ;;  %v2817_v41 = vadd.f32 %v2816_v34, %v2815_v29 }
0x2202   :  { %v2818_v43 = vrot.slane %v2817_v41, 1  ;;  %v2825_v44 = vrot.slane %v2824_v14, 1 }
0x2204   :  { %v2819_v46 = vadd.f32 %v2818_v43, %v2817_v41  ;;  %v2826_v32 = vadd.f32 %v2825_v44, %v2824_v14 }
0x2206   :  { %2828 = vbcast.lane.b32.xlu1 %v2819_v46, 256  ;;  %v6262_v49 = vsel %vm1890_vm15, %v2826_v32, %v2819_v46 }
0x220a   :  { %2831 = vbcast.lane.b32.xlu1 %v2826_v32, 256 }
0x220e   :  { %2859 = vrot.lane.b32.xlu1 %v2646_v58, %s5374_s3 }
0x2278   :  { %v2829_v1 = vpop.permute.xlu1 %2828 }
0x2279   :  { %v2833_v37 = vmul.f32 %v2829_v1, %v6042_v57  ;;  %v2945_v1 = vrot.slane %v6212_v3, 6 }
0x227b   :  { %v2835_v45 = vsel %vm283_vm4, %v2833_v37, 0.0 }
0x227c   :  { %v2836_v16 = vrot.slane %v2835_v45, 4  ;;  %v2832_v52 = vpop.permute.xlu1 %2831 }
0x227d   :  { %v2834_v55 = vmul.f32 %v2832_v52, %v6044_v48 }
0x227e   :  { %v2837_v21 = vadd.f32 %v2836_v16, %v2835_v45 }
0x227f   :  { %v2842_v19 = vsel %vm283_vm4, %v2834_v55, 0.0 }
0x2280   :  { %v2838_v15 = vrot.slane %v2837_v21, 2  ;;  %v2843_v6 = vrot.slane %v2842_v19, 4  ;;  %v2860_v50 = vpop.permute.xlu1 %2859 }
0x2282   :  { %v2839_v17 = vadd.f32 %v2838_v15, %v2837_v21  ;;  %v2844_v10 = vadd.f32 %v2843_v6, %v2842_v19 }
0x2284   :  { %v2845_v39 = vrot.slane %v2844_v10, 2  ;;  %v2840_v24 = vrot.slane %v2839_v17, 1 }
0x2286   :  { %v2846_v63 = vadd.f32 %v2845_v39, %v2844_v10  ;;  %v2841_v0 = vadd.f32 %v2840_v24, %v2839_v17 }
0x2288   :  { %v2847_v58 = vrot.slane %v2846_v63, 1  ;;  %v2853_v33 = vadd.f32 %v2849_v36, %v2841_v0 }
0x228a   :  { %v2848_v26 = vadd.f32 %v2847_v58, %v2846_v63 }
0x228c   :  { %v2857_v51 = vsel %vm1890_vm15, %v2848_v26, %v2841_v0  ;;  %v2854_v23 = vadd.f32 %v2850_v47, %v2848_v26 }
0x228d   :  { %v2862_v30 = vsel %vm283_vm4, %v2857_v51, %v2860_v50 }
0x228e   :  { %4776 = vmatmul.mubr.msk.f32.vlgmr.msra.gmra.mrb[18].mxu1 %vm383_vm5, %v2862_v30  ;;  %v4159_v42 = vrot.slane %v2854_v23, 7 }
0x228f   :  { %5043 = vmatpush3.bf16.msra.mxu1 %v5889_v56  ;;  %4816 = vmatprep.mubr.msk.f32.mxu1 %vm5369_vm3, %v5370_v27 }
0x2290   :  { %5044 = vmatprep.subr.bf16.mxu1 %v5368_v18  ;;  %v6281_v35 = vsel %vm1890_vm15, %v4159_v42, %v2853_v33 }
0x2293   :  { %5046 = vmatpush3.bf16.msra.mxu1 %v5899_v60 }
0x2294   :  { %5047 = vmatprep.subr.bf16.mxu1 %v5368_v18 }
0x2361   :  { %v2932_v40 = vpop.f32.mrb[18].mxu1 }
0x2362   :  { %v2936_v29 = vadd.f32 %v2932_v40, %v5654_v31  ;;  %v4777_v13 = vpop.f32.mrb[19].mxu1 }
0x2364   :  { %5261 = vtanh.f32 %v2936_v29  ;;  %v4338_v14 = vmul.f32 -1.442695, %v2936_v29 }
0x2366   :  { %5263 = vpow2.f32 %v4338_v14 }
0x236e   :  { %v5262_v34 = vpop.eup %5261 }
0x236f   :  { %2949 = vrot.lane.b32.xlu1 %v5262_v34, %s5374_s3 }
0x2370   :  { %v5264_v41 = vpop.eup %5263 }
0x2371   :  { %v2940_v43 = vadd.f32 1.0, %v5264_v41 }
0x2373   :  { %5265 = vrcp.f32 %v2940_v43 }
0x237d   :  { %v5266_v44 = vpop.eup %5265 }
0x237e   :  { %v2947_v37 = vmul.f32 %v5266_v44, %v2945_v1 }
0x23e1   :  { %v2950_v46 = vpop.permute.xlu1 %2949 }
0x23e2   :  { %v2952_v32 = vmul.f32 %v5266_v44, %v2950_v46 }
0x23e4   :  { %2954 = vrot.lane.b32.xlu0 %v2952_v32, %s5377_s27 }
0x2456   :  { %v2955_v45 = vpop.permute.xlu0 %2954 }
0x2457   :  { %v6289_v16 = vadd.f32 %v2955_v45, %v2947_v37 }
0x2459   :  { %5267 = vtanh.f32 %v6289_v16 }
0x2463   :  { %v5268_v52 = vpop.eup %5267 }
0x2464   :  { %2960 = vrot.lane.b32.xlu1 %v5268_v52, %s5374_s3 }
0x24d6   :  { %v2961_v55 = vpop.permute.xlu1 %2960 }
0x24d7   :  { %v6293_v21 = vmul.f32 %v5266_v44, %v2961_v55 }
0x24d9   :  { %2965 = vrot.lane.b32.xlu0 %v6293_v21, %s5377_s27 }
0x254b   :  { %v2966_v19 = vpop.permute.xlu0 %2965 }
0x254c   :  { %4787 = vmatmul.mubr.msk.f32.vlgmr.msra.gmra.mrb[22].mxu0 %vm283_vm4, %v2966_v19 }
0x254d   :  { %5031 = vmatpush3.bf16.msra.mxu0 %v5822_v62  ;;  %4805 = vmatprep.mubr.msk.f32.mxu0 %vm5369_vm3, %v5370_v27 }
0x254e   :  { %5032 = vmatprep.subr.bf16.mxu0 %v5368_v18 }
0x2551   :  { %5034 = vmatpush3.bf16.msra.mxu0 %v5835_v5 }
0x2552   :  { %5035 = vmatprep.subr.bf16.mxu0 %v5368_v18 }
0x2555   :  { %5037 = vmatpush3.bf16.msra.mxu0 %v5847_v61 }
0x2556   :  { %5038 = vmatprep.subr.bf16.mxu0 %v5368_v18 }
0x2559   :  { %5040 = vmatpush3.bf16.msra.mxu0 %v5857_v11 }
0x255a   :  { %5059 = vmatprep.subr.bf16.mxu0 %v5368_v18 }
0x261f   :  { %v3035_v3 = vpop.f32.mrb[22].mxu0 }
0x2620   :  { %v3036_v15 = vadd.f32 %v6236_v9, %v3035_v3  ;;  %v4788_v6 = vpop.f32.mrb[23].mxu0 }
0x2622   :  { %v3039_v17 = vsel %vm1752_vm8, %v3036_v15, -inf  ;;  %v3042_v39 = vmul.f32 %v3036_v15, %v5954_v53 }
0x2623   :  { %3040 = vmax.xlane.f32.xlu1 %v3039_v17 }
0x26b0   :  { %v3041_v10 = vpop.xlane.xlu1 %3040 }
0x26b1   :  { %v3043_v24 = vmul.f32 %v5957_v54, %v3041_v10 }
0x26b3   :  { %v3044_v63 = vsub.f32 %v3042_v39, %v3043_v24 }
0x26b5   :  { %v3045_v58 = vmul.f32 1.442695, %v3044_v63 }
0x26b7   :  { %5269 = vpow2.f32 %v3045_v58 }
0x26c1   :  { %v5270_v0 = vpop.eup %5269 }
0x26c2   :  { %3049 = vrot.lane.b32.xlu0 %v5270_v0, %s5385_s24  ;;  %v3076_v26 = vrot.slane %v5270_v0, %v5967_v12  ;;  %v3084_v47 = vrot.slane %v5270_v0, %v5970_v20  ;;  %v6316_v51 = vadd.f32 %v5270_v0, %v6246_v28 }
0x26c4   :  { %v3060_v50 = vrot.slane %v6316_v51, %v5967_v12  ;;  %v3067_v36 = vrot.slane %v6316_v51, %v5970_v20 }
0x26c6   :  { %3079 = vbcast.lane.b32.xlu0 %v3076_v26, 260 }
0x26ca   :  { %3087 = vbcast.lane.b32.xlu0 %v3084_v47, 260 }
0x26ce   :  { %3062 = vbcast.lane.b32.xlu0 %v3060_v50, 256 }
0x26d2   :  { %3069 = vbcast.lane.b32.xlu0 %v3067_v36, 256 }
0x2734   :  { %v3050_v23 = vpop.permute.xlu0 %3049 }
0x2735   :  { %v3052_v30 = vsel %vm1766_vm13, %v3050_v23, 0.0 }
0x2736   :  { %3053 = vadd.xlane.f32.xlu0 %v3052_v30 }
0x2738   :  { %v3080_v33 = vpop.permute.xlu0 %3079 }
0x273c   :  { %v3088_v42 = vpop.permute.xlu0 %3087 }
0x2740   :  { %v3063_v40 = vpop.permute.xlu0 %3062 }
0x2741   :  { %v3071_v29 = vsub.f32 %v5978_v25, %v3063_v40 }
0x2743   :  { %v3089_v28 = vmul.f32 %v3080_v33, %v3071_v29 }
0x2744   :  { %v3070_v13 = vpop.permute.xlu0 %3069 }
0x2745   :  { %v4340_v34 = vmul.f32 -1.442695, %v3089_v28  ;;  %v3072_v14 = vsub.f32 %v5978_v25, %v3070_v13 }
0x2747   :  { %5271 = vpow2.f32 %v4340_v34  ;;  %v3090_v41 = vmul.f32 %v3088_v42, %v3072_v14 }
0x2749   :  { %v4341_v43 = vmul.f32 -1.442695, %v3090_v41 }
0x274b   :  { %5273 = vpow2.f32 %v4341_v43 }
0x2751   :  { %v5272_v44 = vpop.eup %5271 }
0x2752   :  { %v3097_v46 = vadd.f32 1.0, %v5272_v44 }
0x2754   :  { %5275 = vrcp.f32 %v3097_v46 }
0x2755   :  { %v5274_v32 = vpop.eup %5273 }
0x2756   :  { %v3098_v1 = vadd.f32 1.0, %v5274_v32 }
0x2758   :  { %5277 = vrcp.f32 %v3098_v1 }
0x275e   :  { %v5276_v37 = vpop.eup %5275 }
0x275f   :  { %3121 = vrot.lane.b32.xlu1 %v5276_v37, %s5385_s24 }
0x2762   :  { %v5278_v45 = vpop.eup %5277 }
0x2763   :  { %3123 = vrot.lane.b32.xlu1 %v5278_v45, %s5385_s24 }
0x27c3   :  { %v3054_v52 = vpop.xlane.xlu0 %3053 }
0x27c4   :  { %5279 = vrcp.f32 %v3054_v52 }
0x27ce   :  { %v5280_v55 = vpop.eup %5279 }
0x27cf   :  { %v3056_v19 = vmul.f32 %v5280_v55, %v5270_v0 }
0x27d1   :  { %v3114_v3 = vrot.slane %v3056_v19, %v5970_v20  ;;  %v3106_v15 = vrot.slane %v3056_v19, %v5967_v12  ;;  %v3122_v6 = vpop.permute.xlu1 %3121 }
0x27d2   :  { %v3127_v10 = vsub.f32 %v5276_v37, %v3122_v6 }
0x27d3   :  { %3117 = vbcast.lane.b32.xlu1 %v3114_v3, 264  ;;  %3109 = vbcast.lane.b32.xlu0 %v3106_v15, 264 }
0x27d5   :  { %v3124_v17 = vpop.permute.xlu1 %3123 }
0x27d6   :  { %v3128_v39 = vsub.f32 %v5278_v45, %v3124_v17 }
0x2845   :  { %v3118_v24 = vpop.permute.xlu1 %3117  ;;  %v3110_v63 = vpop.permute.xlu0 %3109 }
0x2846   :  { %v3130_v58 = vmul.f32 %v3128_v39, %v3118_v24  ;;  %v3129_v26 = vmul.f32 %v3127_v10, %v3110_v63  ;;  %v3167_v63 = vrot.slane %v5568_v38, 1 }
0x2848   :  { %v3138_v47 = vsel %vm1846_vm14, %v3130_v58, 0.0  ;;  %v3131_v50 = vsel %vm1846_vm14, %v3129_v26, 0.0 }
0x2849   :  { %v3139_v36 = vrot.slane %v3138_v47, 4  ;;  %v3132_v0 = vrot.slane %v3131_v50, 4 }
0x284b   :  { %v3140_v23 = vadd.f32 %v3139_v36, %v3138_v47  ;;  %v3133_v30 = vadd.f32 %v3132_v0, %v3131_v50 }
0x284d   :  { %v3141_v33 = vrot.slane %v3140_v23, 2  ;;  %v3134_v42 = vrot.slane %v3133_v30, 2 }
0x284f   :  { %v3142_v40 = vadd.f32 %v3141_v33, %v3140_v23  ;;  %v3135_v29 = vadd.f32 %v3134_v42, %v3133_v30 }
0x2851   :  { %v3136_v28 = vrot.slane %v3135_v29, 1  ;;  %v3143_v13 = vrot.slane %v3142_v40, 1 }
0x2853   :  { %v3137_v34 = vadd.f32 %v3136_v28, %v3135_v29  ;;  %v3144_v14 = vadd.f32 %v3143_v13, %v3142_v40 }
0x2855   :  { %3146 = vbcast.lane.b32.xlu1 %v3137_v34, 256  ;;  %v6332_v41 = vsel %vm1890_vm15, %v3144_v14, %v3137_v34 }
0x2859   :  { %3149 = vbcast.lane.b32.xlu1 %v3144_v14, 256 }
0x285d   :  { %3176 = vrot.lane.b32.xlu1 %v6293_v21, %s5374_s3 }
0x28c7   :  { %v3147_v43 = vpop.permute.xlu1 %3146 }
0x28c8   :  { %v3151_v44 = vmul.f32 %v3147_v43, %v6042_v57 }
0x28ca   :  { %v3153_v46 = vsel %vm283_vm4, %v3151_v44, 0.0 }
0x28cb   :  { %v3154_v32 = vrot.slane %v3153_v46, 4  ;;  %v3150_v1 = vpop.permute.xlu1 %3149 }
0x28cc   :  { %v3152_v37 = vmul.f32 %v3150_v1, %v6044_v48 }
0x28cd   :  { %v3155_v45 = vadd.f32 %v3154_v32, %v3153_v46  ;;  %v3265_v46 = vrot.slane %v6289_v16, 6 }
0x28ce   :  { %v3160_v52 = vsel %vm283_vm4, %v3152_v37, 0.0 }
0x28cf   :  { %v3156_v55 = vrot.slane %v3155_v45, 2  ;;  %v3161_v19 = vrot.slane %v3160_v52, 4  ;;  %v3177_v26 = vpop.permute.xlu1 %3176 }
0x28d1   :  { %v3157_v3 = vadd.f32 %v3156_v55, %v3155_v45  ;;  %v3162_v15 = vadd.f32 %v3161_v19, %v3160_v52 }
0x28d3   :  { %v3163_v6 = vrot.slane %v3162_v15, 2  ;;  %v3158_v17 = vrot.slane %v3157_v3, 1 }
0x28d5   :  { %v3164_v10 = vadd.f32 %v3163_v6, %v3162_v15  ;;  %v3159_v39 = vadd.f32 %v3158_v17, %v3157_v3 }
0x28d7   :  { %v3165_v21 = vrot.slane %v3164_v10, 1  ;;  %v3170_v36 = vadd.f32 %v3159_v39, %v5568_v38 }
0x28d9   :  { %v3166_v24 = vadd.f32 %v3165_v21, %v3164_v10 }
0x28db   :  { %v3174_v58 = vsel %vm1890_vm15, %v3166_v24, %v3159_v39  ;;  %v3171_v47 = vadd.f32 %v3167_v63, %v3166_v24 }
0x28dc   :  { %v3179_v50 = vsel %vm283_vm4, %v3174_v58, %v3177_v26 }
0x28dd   :  { %4806 = vmatmul.mubr.msk.f32.vlgmr.msra.gmra.mrb[24].mxu0 %vm383_vm5, %v3179_v50  ;;  %v4166_v0 = vrot.slane %v3171_v47, 7 }
0x28de   :  { %5061 = vmatpush3.bf16.msra.mxu0 %v5889_v56  ;;  %4846 = vmatprep.mubr.msk.f32.mxu0 %vm5369_vm3, %v5370_v27 }
0x28df   :  { %5062 = vmatprep.subr.bf16.mxu0 %v5368_v18  ;;  %v6350_v23 = vsel %vm1890_vm15, %v4166_v0, %v3170_v36 }
0x28e2   :  { %5064 = vmatpush3.bf16.msra.mxu0 %v5899_v60 }
0x28e3   :  { %5065 = vmatprep.subr.bf16.mxu0 %v5368_v18 }
0x29b0   :  { %v3249_v30 = vpop.f32.mrb[24].mxu0 }
0x29b1   :  { %v3254_v33 = vrot.slane %v3249_v30, 6  ;;  %v4807_v42 = vpop.f32.mrb[25].mxu0 }
0x29b3   :  { %v3256_v40 = vadd.f32 %v3254_v33, %v5654_v31 }
0x29b5   :  { %5281 = vtanh.f32 %v3256_v40  ;;  %v4343_v28 = vmul.f32 -1.442695, %v3256_v40 }
0x29b7   :  { %5283 = vpow2.f32 %v4343_v28 }
0x29bf   :  { %v5282_v29 = vpop.eup %5281 }
0x29c0   :  { %3269 = vrot.lane.b32.xlu1 %v5282_v29, %s5374_s3 }
0x29c1   :  { %v5284_v13 = vpop.eup %5283 }
0x29c2   :  { %v3260_v34 = vadd.f32 1.0, %v5284_v13 }
0x29c4   :  { %5285 = vrcp.f32 %v3260_v34 }
0x29ce   :  { %v5286_v14 = vpop.eup %5285 }
0x29cf   :  { %v3267_v32 = vmul.f32 %v5286_v14, %v3265_v46 }
0x2a32   :  { %v3270_v43 = vpop.permute.xlu1 %3269 }
0x2a33   :  { %v3272_v44 = vmul.f32 %v5286_v14, %v3270_v43 }
0x2a35   :  { %3274 = vrot.lane.b32.xlu0 %v3272_v44, %s5377_s27 }
0x2aa7   :  { %v3275_v1 = vpop.permute.xlu0 %3274 }
0x2aa8   :  { %v6358_v37 = vadd.f32 %v3275_v1, %v3267_v32 }
0x2aaa   :  { %5287 = vtanh.f32 %v6358_v37 }
0x2ab4   :  { %v5288_v45 = vpop.eup %5287 }
0x2ab5   :  { %3280 = vrot.lane.b32.xlu1 %v5288_v45, %s5374_s3 }
0x2b27   :  { %v3281_v52 = vpop.permute.xlu1 %3280 }
0x2b28   :  { %v6362_v55 = vmul.f32 %v5286_v14, %v3281_v52 }
0x2b2a   :  { %v3285_v19 = vrot.slane %v6362_v55, 2 }
0x2b2c   :  { %3286 = vrot.lane.b32.xlu0 %v3285_v19, %s5377_s27 }
0x2b9e   :  { %v3287_v3 = vpop.permute.xlu0 %3286 }
0x2b9f   :  { %4817 = vmatmul.mubr.msk.f32.vlgmr.msra.gmra.mrb[20].mxu1 %vm283_vm4, %v3287_v3 }
0x2ba0   :  { %5049 = vmatpush3.bf16.msra.mxu1 %v5822_v62  ;;  %4835 = vmatprep.mubr.msk.f32.mxu1 %vm5369_vm3, %v5370_v27 }
0x2ba1   :  { %5050 = vmatprep.subr.bf16.mxu1 %v5368_v18 }
0x2ba4   :  { %5052 = vmatpush3.bf16.msra.mxu1 %v5835_v5 }
0x2ba5   :  { %5053 = vmatprep.subr.bf16.mxu1 %v5368_v18 }
0x2ba8   :  { %5055 = vmatpush3.bf16.msra.mxu1 %v5847_v61 }
0x2ba9   :  { %5056 = vmatprep.subr.bf16.mxu1 %v5368_v18 }
0x2bac   :  { %5058 = vmatpush3.bf16.msra.mxu1 %v5857_v11 }
0x2bad   :  { %5077 = vmatprep.subr.bf16.mxu1 %v5368_v18 }
0x2c72   :  { %v3356_v16 = vpop.f32.mrb[20].mxu1 }
0x2c73   :  { %v3357_v15 = vadd.f32 %v6236_v9, %v3356_v16  ;;  %v4818_v6 = vpop.f32.mrb[21].mxu1 }
0x2c75   :  { %v3360_v17 = vsel %vm1752_vm8, %v3357_v15, -inf  ;;  %v3363_v21 = vmul.f32 %v3357_v15, %v5954_v53 }
0x2c76   :  { %3361 = vmax.xlane.f32.xlu1 %v3360_v17 }
0x2d03   :  { %v3362_v10 = vpop.xlane.xlu1 %3361 }
0x2d04   :  { %v3364_v39 = vmul.f32 %v5957_v54, %v3362_v10 }
0x2d06   :  { %v3365_v24 = vsub.f32 %v3363_v21, %v3364_v39 }
0x2d08   :  { %v3366_v63 = vmul.f32 1.442695, %v3365_v24 }
0x2d0a   :  { %5289 = vpow2.f32 %v3366_v63 }
0x2d14   :  { %v5290_v58 = vpop.eup %5289 }
0x2d15   :  { %3370 = vrot.lane.b32.xlu0 %v5290_v58, %s5385_s24  ;;  %v3397_v26 = vrot.slane %v5290_v58, %v5967_v12  ;;  %v3405_v47 = vrot.slane %v5290_v58, %v5970_v20  ;;  %v6387_v50 = vadd.f32 %v5290_v58, %v6316_v51 }
0x2d17   :  { %v3381_v36 = vrot.slane %v6387_v50, %v5967_v12  ;;  %v3388_v0 = vrot.slane %v6387_v50, %v5970_v20 }
0x2d19   :  { %3400 = vbcast.lane.b32.xlu0 %v3397_v26, 260 }
0x2d1d   :  { %3408 = vbcast.lane.b32.xlu0 %v3405_v47, 260 }
0x2d21   :  { %3383 = vbcast.lane.b32.xlu0 %v3381_v36, 256 }
0x2d25   :  { %3390 = vbcast.lane.b32.xlu0 %v3388_v0, 256 }
0x2d87   :  { %v3371_v30 = vpop.permute.xlu0 %3370 }
0x2d88   :  { %v3373_v33 = vsel %vm1766_vm13, %v3371_v30, 0.0 }
0x2d89   :  { %3374 = vadd.xlane.f32.xlu0 %v3373_v33 }
0x2d8b   :  { %v3401_v42 = vpop.permute.xlu0 %3400 }
0x2d8f   :  { %v3409_v40 = vpop.permute.xlu0 %3408 }
0x2d93   :  { %v3384_v29 = vpop.permute.xlu0 %3383 }
0x2d94   :  { %v3392_v28 = vsub.f32 %v5978_v25, %v3384_v29 }
0x2d96   :  { %v3410_v51 = vmul.f32 %v3401_v42, %v3392_v28 }
0x2d97   :  { %v3391_v13 = vpop.permute.xlu0 %3390 }
0x2d98   :  { %v4345_v34 = vmul.f32 -1.442695, %v3410_v51  ;;  %v3393_v14 = vsub.f32 %v5978_v25, %v3391_v13 }
0x2d9a   :  { %5291 = vpow2.f32 %v4345_v34  ;;  %v3411_v43 = vmul.f32 %v3409_v40, %v3393_v14 }
0x2d9c   :  { %v4346_v44 = vmul.f32 -1.442695, %v3411_v43 }
0x2d9e   :  { %5293 = vpow2.f32 %v4346_v44 }
0x2da4   :  { %v5292_v46 = vpop.eup %5291 }
0x2da5   :  { %v3418_v32 = vadd.f32 1.0, %v5292_v46 }
0x2da7   :  { %5295 = vrcp.f32 %v3418_v32 }
0x2da8   :  { %v5294_v1 = vpop.eup %5293 }
0x2da9   :  { %v3419_v45 = vadd.f32 1.0, %v5294_v1 }
0x2dab   :  { %5297 = vrcp.f32 %v3419_v45 }
0x2db1   :  { %v5296_v52 = vpop.eup %5295 }
0x2db2   :  { %3442 = vrot.lane.b32.xlu1 %v5296_v52, %s5385_s24 }
0x2db5   :  { %v5298_v3 = vpop.eup %5297 }
0x2db6   :  { %3444 = vrot.lane.b32.xlu1 %v5298_v3, %s5385_s24 }
0x2e16   :  { %v3375_v16 = vpop.xlane.xlu0 %3374 }
0x2e17   :  { %5299 = vrcp.f32 %v3375_v16 }
0x2e21   :  { %v5300_v15 = vpop.eup %5299 }
0x2e22   :  { %v3377_v6 = vmul.f32 %v5300_v15, %v5290_v58 }
0x2e24   :  { %v3435_v17 = vrot.slane %v3377_v6, %v5970_v20  ;;  %v3427_v10 = vrot.slane %v3377_v6, %v5967_v12  ;;  %v3443_v21 = vpop.permute.xlu1 %3442 }
0x2e25   :  { %v3448_v24 = vsub.f32 %v5296_v52, %v3443_v21 }
0x2e26   :  { %3438 = vbcast.lane.b32.xlu1 %v3435_v17, 264  ;;  %3430 = vbcast.lane.b32.xlu0 %v3427_v10, 264 }
0x2e28   :  { %v3445_v39 = vpop.permute.xlu1 %3444 }
0x2e29   :  { %v3449_v63 = vsub.f32 %v5298_v3, %v3445_v39 }
0x2e98   :  { %v3439_v26 = vpop.permute.xlu1 %3438  ;;  %v3431_v47 = vpop.permute.xlu0 %3430 }
0x2e99   :  { %v3451_v36 = vmul.f32 %v3449_v63, %v3439_v26  ;;  %v3450_v0 = vmul.f32 %v3448_v24, %v3431_v47 }
0x2e9b   :  { %v3459_v30 = vsel %vm1846_vm14, %v3451_v36, 0.0  ;;  %v3452_v33 = vsel %vm1846_vm14, %v3450_v0, 0.0  ;;  %v3489_v0 = vrot.slane %v5568_v38, 3 }
0x2e9c   :  { %v3460_v42 = vrot.slane %v3459_v30, 4  ;;  %v3453_v58 = vrot.slane %v3452_v33, 4 }
0x2e9e   :  { %v3461_v40 = vadd.f32 %v3460_v42, %v3459_v30  ;;  %v3454_v29 = vadd.f32 %v3453_v58, %v3452_v33  ;;  %v3488_v42 = vrot.slane %v5568_v38, 2 }
0x2ea0   :  { %v3462_v28 = vrot.slane %v3461_v40, 2  ;;  %v3455_v51 = vrot.slane %v3454_v29, 2 }
0x2ea2   :  { %v3463_v13 = vadd.f32 %v3462_v28, %v3461_v40  ;;  %v3456_v34 = vadd.f32 %v3455_v51, %v3454_v29 }
0x2ea4   :  { %v3457_v14 = vrot.slane %v3456_v34, 1  ;;  %v3464_v43 = vrot.slane %v3463_v13, 1 }
0x2ea6   :  { %v3458_v44 = vadd.f32 %v3457_v14, %v3456_v34  ;;  %v3465_v46 = vadd.f32 %v3464_v43, %v3463_v13 }
0x2ea8   :  { %3467 = vbcast.lane.b32.xlu1 %v3458_v44, 256  ;;  %v6403_v32 = vsel %vm1890_vm15, %v3465_v46, %v3458_v44 }
0x2eac   :  { %3470 = vbcast.lane.b32.xlu1 %v3465_v46, 256 }
0x2eb0   :  { %3498 = vrot.lane.b32.xlu1 %v3285_v19, %s5374_s3 }
0x2f1a   :  { %v3468_v1 = vpop.permute.xlu1 %3467 }
0x2f1b   :  { %v3472_v45 = vmul.f32 %v3468_v1, %v6042_v57 }
0x2f1d   :  { %v3474_v52 = vsel %vm283_vm4, %v3472_v45, 0.0 }
0x2f1e   :  { %v3475_v3 = vrot.slane %v3474_v52, 4  ;;  %v3471_v16 = vpop.permute.xlu1 %3470 }
0x2f1f   :  { %v3473_v15 = vmul.f32 %v3471_v16, %v6044_v48 }
0x2f20   :  { %v3476_v6 = vadd.f32 %v3475_v3, %v3474_v52 }
0x2f21   :  { %v3481_v17 = vsel %vm283_vm4, %v3473_v15, 0.0 }
0x2f22   :  { %v3477_v10 = vrot.slane %v3476_v6, 2  ;;  %v3482_v21 = vrot.slane %v3481_v17, 4  ;;  %v3499_v33 = vpop.permute.xlu1 %3498 }
0x2f24   :  { %v3478_v39 = vadd.f32 %v3477_v10, %v3476_v6  ;;  %v3483_v24 = vadd.f32 %v3482_v21, %v3481_v17 }
0x2f26   :  { %v3484_v63 = vrot.slane %v3483_v24, 2  ;;  %v3479_v26 = vrot.slane %v3478_v39, 1 }
0x2f28   :  { %v3485_v55 = vadd.f32 %v3484_v63, %v3483_v24  ;;  %v3480_v47 = vadd.f32 %v3479_v26, %v3478_v39 }
0x2f2a   :  { %v3486_v19 = vrot.slane %v3485_v55, 1  ;;  %v3492_v29 = vadd.f32 %v3488_v42, %v3480_v47 }
0x2f2c   :  { %v3487_v36 = vadd.f32 %v3486_v19, %v3485_v55 }
0x2f2e   :  { %v3496_v30 = vsel %vm1890_vm15, %v3487_v36, %v3480_v47  ;;  %v3493_v58 = vadd.f32 %v3489_v0, %v3487_v36 }
0x2f2f   :  { %v3501_v40 = vsel %vm283_vm4, %v3496_v30, %v3499_v33 }
0x2f30   :  { %4836 = vmatmul.mubr.msk.f32.vlgmr.msra.gmra.mrb[22].mxu1 %vm383_vm5, %v3501_v40  ;;  %v4171_v28 = vrot.slane %v3493_v58, 7 }
0x2f31   :  { %5079 = vmatpush3.bf16.msra.mxu1 %v5889_v56  ;;  %4876 = vmatprep.mubr.msk.f32.mxu1 %vm5369_vm3, %v5370_v27 }
0x2f32   :  { %5080 = vmatprep.subr.bf16.mxu1 %v5368_v18  ;;  %v6422_v51 = vsel %vm1890_vm15, %v4171_v28, %v3492_v29 }
0x2f35   :  { %5082 = vmatpush3.bf16.msra.mxu1 %v5899_v60  ;;  %v3587_v60 = vrot.slane %v6358_v37, 6 }
0x3003   :  { %v3571_v13 = vpop.f32.mrb[22].mxu1 }
0x3004   :  { %v3576_v34 = vrot.slane %v3571_v13, 4  ;;  %v4837_v14 = vpop.f32.mrb[23].mxu1 }
0x3006   :  { %v3578_v43 = vadd.f32 %v3576_v34, %v5654_v31 }
0x3008   :  { %5301 = vtanh.f32 %v3578_v43  ;;  %v4348_v56 = vmul.f32 -1.442695, %v3578_v43 }
0x300a   :  { %5303 = vpow2.f32 %v4348_v56 }
0x3012   :  { %v5302_v44 = vpop.eup %5301 }
0x3013   :  { %3591 = vrot.lane.b32.xlu1 %v5302_v44, %s5374_s3 }
0x3014   :  { %v5304_v46 = vpop.eup %5303 }
0x3015   :  { %v3582_v1 = vadd.f32 1.0, %v5304_v46 }
0x3017   :  { %5305 = vrcp.f32 %v3582_v1 }
0x3021   :  { %v5306_v45 = vpop.eup %5305 }
0x3022   :  { %v3589_v16 = vmul.f32 %v5306_v45, %v3587_v60 }
0x3085   :  { %v3592_v52 = vpop.permute.xlu1 %3591 }
0x3086   :  { %v3594_v3 = vmul.f32 %v5306_v45, %v3592_v52 }
0x3088   :  { %3596 = vrot.lane.b32.xlu0 %v3594_v3, %s5377_s27 }
0x30fa   :  { %v3597_v15 = vpop.permute.xlu0 %3596 }
0x30fb   :  { %v6429_v6 = vadd.f32 %v3597_v15, %v3589_v16 }
0x30fd   :  { %5307 = vtanh.f32 %v6429_v6 }
0x3107   :  { %v5308_v17 = vpop.eup %5307 }
0x3108   :  { %3602 = vrot.lane.b32.xlu1 %v5308_v17, %s5374_s3 }
0x317a   :  { %v3603_v10 = vpop.permute.xlu1 %3602 }
0x317b   :  { %v6433_v21 = vmul.f32 %v5306_v45, %v3603_v10 }
0x317d   :  { %v3607_v39 = vrot.slane %v6433_v21, 4 }
0x317f   :  { %3608 = vrot.lane.b32.xlu0 %v3607_v39, %s5377_s27 }
0x31f1   :  { %v3609_v24 = vpop.permute.xlu0 %3608 }
0x31f2   :  { %4847 = vmatmul.mubr.msk.f32.vlgmr.msra.gmra.mrb[26].mxu0 %vm283_vm4, %v3609_v24 }
0x31f3   :  { %5067 = vmatpush3.bf16.msra.mxu0 %v5822_v62  ;;  %4865 = vmatprep.mubr.msk.f32.mxu0 %vm5369_vm3, %v5370_v27  ;;  %vm6595_vm3 = vcmask 785408  }
0x31f4   :  { %5068 = vmatprep.subr.bf16.mxu0 %v5368_v18  ;;  %vm6596_vm7 = vmmov %vm6595_vm3 }
0x31f7   :  { %5070 = vmatpush3.bf16.msra.mxu0 %v5835_v5 }
0x31f8   :  { %5071 = vmatprep.subr.bf16.mxu0 %v5368_v18 }
0x31fb   :  { %5073 = vmatpush3.bf16.msra.mxu0 %v5847_v61 }
0x31fc   :  { %5074 = vmatprep.subr.bf16.mxu0 %v5368_v18 }
0x31ff   :  { %5076 = vmatpush3.bf16.msra.mxu0 %v5857_v11 }
0x32c5   :  { %v3678_v37 = vpop.f32.mrb[26].mxu0 }
0x32c6   :  { %v3679_v63 = vadd.f32 %v6236_v9, %v3678_v37  ;;  %v4848_v26 = vpop.f32.mrb[27].mxu0 }
0x32c8   :  { %v3682_v62 = vsel %vm1752_vm8, %v3679_v63, -inf  ;;  %v3685_v55 = vmul.f32 %v3679_v63, %v5954_v53 }
0x32c9   :  { %3683 = vmax.xlane.f32.xlu1 %v3682_v62 }
0x3356   :  { %v3684_v27 = vpop.xlane.xlu1 %3683 }
0x3357   :  { %v3686_v5 = vmul.f32 %v5957_v54, %v3684_v27 }
0x3359   :  { %v3687_v19 = vsub.f32 %v3685_v55, %v3686_v5 }
0x335b   :  { %v3688_v47 = vmul.f32 1.442695, %v3687_v19 }
0x335d   :  { %5309 = vpow2.f32 %v3688_v47 }
0x3367   :  { %v5310_v61 = vpop.eup %5309 }
0x3368   :  { %3692 = vrot.lane.b32.xlu0 %v5310_v61, %s5385_s24  ;;  %v3719_v18 = vrot.slane %v5310_v61, %v5967_v12  ;;  %v3727_v11 = vrot.slane %v5310_v61, %v5970_v20  ;;  %v6457_v9 = vadd.f32 %v5310_v61, %v6387_v50 }
0x336a   :  { %v3703_v36 = vrot.slane %v6457_v9, %v5967_v12  ;;  %v3710_v0 = vrot.slane %v6457_v9, %v5970_v20 }
0x336c   :  { %3722 = vbcast.lane.b32.xlu0 %v3719_v18, 260 }
0x3370   :  { %3730 = vbcast.lane.b32.xlu0 %v3727_v11, 260 }
0x3374   :  { %3705 = vbcast.lane.b32.xlu0 %v3703_v36, 256 }
0x3378   :  { %3712 = vbcast.lane.b32.xlu0 %v3710_v0, 256 }
0x33da   :  { %v3693_v30 = vpop.permute.xlu0 %3692 }
0x33db   :  { %v3695_v33 = vsel %vm1766_vm13, %v3693_v30, 0.0 }
0x33dc   :  { %3696 = vadd.xlane.f32.xlu0 %v3695_v33 }
0x33de   :  { %v3723_v42 = vpop.permute.xlu0 %3722 }
0x33e2   :  { %v3731_v58 = vpop.permute.xlu0 %3730 }
0x33e6   :  { %v3706_v40 = vpop.permute.xlu0 %3705 }
0x33e7   :  { %v3714_v29 = vsub.f32 %v5978_v25, %v3706_v40 }
0x33e9   :  { %v3732_v50 = vmul.f32 %v3723_v42, %v3714_v29 }
0x33ea   :  { %v3713_v28 = vpop.permute.xlu0 %3712 }
0x33eb   :  { %v4350_v13 = vmul.f32 -1.442695, %v3732_v50  ;;  %v3715_v34 = vsub.f32 %v5978_v25, %v3713_v28 }
0x33ed   :  { %5311 = vpow2.f32 %v4350_v13  ;;  %v3733_v14 = vmul.f32 %v3731_v58, %v3715_v34 }
0x33ef   :  { %v4351_v43 = vmul.f32 -1.442695, %v3733_v14 }
0x33f1   :  { %5313 = vpow2.f32 %v4351_v43 }
0x33f7   :  { %v5312_v44 = vpop.eup %5311 }
0x33f8   :  { %v3740_v56 = vadd.f32 1.0, %v5312_v44 }
0x33fa   :  { %5315 = vrcp.f32 %v3740_v56 }
0x33fb   :  { %v5314_v46 = vpop.eup %5313 }
0x33fc   :  { %v3741_v1 = vadd.f32 1.0, %v5314_v46 }
0x33fe   :  { %5317 = vrcp.f32 %v3741_v1 }
0x3404   :  { %v5316_v45 = vpop.eup %5315 }
0x3405   :  { %3764 = vrot.lane.b32.xlu1 %v5316_v45, %s5385_s24 }
0x3408   :  { %v5318_v52 = vpop.eup %5317 }
0x3409   :  { %3766 = vrot.lane.b32.xlu1 %v5318_v52, %s5385_s24 }
0x3469   :  { %v3697_v3 = vpop.xlane.xlu0 %3696 }
0x346a   :  { %5319 = vrcp.f32 %v3697_v3 }
0x3474   :  { %v5320_v60 = vpop.eup %5319 }
0x3475   :  { %v3699_v16 = vmul.f32 %v5320_v60, %v5310_v61 }
0x3477   :  { %v3757_v15 = vrot.slane %v3699_v16, %v5970_v20  ;;  %v3749_v17 = vrot.slane %v3699_v16, %v5967_v12  ;;  %v3765_v10 = vpop.permute.xlu1 %3764 }
0x3478   :  { %v3770_v37 = vsub.f32 %v5316_v45, %v3765_v10  ;;  %v3811_v10 = vrot.slane %v5568_v38, 5 }
0x3479   :  { %3760 = vbcast.lane.b32.xlu1 %v3757_v15, 264  ;;  %3752 = vbcast.lane.b32.xlu0 %v3749_v17, 264 }
0x347b   :  { %v3767_v24 = vpop.permute.xlu1 %3766 }
0x347c   :  { %v3771_v63 = vsub.f32 %v5318_v52, %v3767_v24 }
0x34eb   :  { %v3761_v26 = vpop.permute.xlu1 %3760  ;;  %v3753_v62 = vpop.permute.xlu0 %3752 }
0x34ec   :  { %v3773_v27 = vmul.f32 %v3771_v63, %v3761_v26  ;;  %v3772_v55 = vmul.f32 %v3770_v37, %v3753_v62  ;;  %v3810_v63 = vrot.slane %v5568_v38, 4 }
0x34ee   :  { %v3781_v5 = vsel %vm1846_vm14, %v3773_v27, 0.0  ;;  %v3774_v19 = vsel %vm1846_vm14, %v3772_v55, 0.0 }
0x34ef   :  { %v3782_v47 = vrot.slane %v3781_v5, 4  ;;  %v3775_v61 = vrot.slane %v3774_v19, 4 }
0x34f1   :  { %v3783_v18 = vadd.f32 %v3782_v47, %v3781_v5  ;;  %v3776_v11 = vadd.f32 %v3775_v61, %v3774_v19 }
0x34f3   :  { %v3784_v36 = vrot.slane %v3783_v18, 2  ;;  %v3777_v0 = vrot.slane %v3776_v11, 2 }
0x34f5   :  { %v3785_v30 = vadd.f32 %v3784_v36, %v3783_v18  ;;  %v3778_v33 = vadd.f32 %v3777_v0, %v3776_v11 }
0x34f7   :  { %v3779_v42 = vrot.slane %v3778_v33, 1  ;;  %v3786_v58 = vrot.slane %v3785_v30, 1 }
0x34f9   :  { %v3780_v40 = vadd.f32 %v3779_v42, %v3778_v33  ;;  %v3787_v29 = vadd.f32 %v3786_v58, %v3785_v30 }
0x34fb   :  { %3789 = vbcast.lane.b32.xlu1 %v3780_v40, 256  ;;  %v6473_v50 = vsel %vm1890_vm15, %v3787_v29, %v3780_v40  ;;  %v3909_v40 = vrot.slane %v6429_v6, 6  ;;  %v5342_v6 = vld [vmem:[%s6587_s13] ss:$0 sm:$0xff]  ;;  %s5387_s13 = smov 24  }
0x34ff   :  { %3792 = vbcast.lane.b32.xlu1 %v3787_v29, 256 }
0x3503   :  { %3820 = vrot.lane.b32.xlu1 %v3607_v39, %s5374_s3 }
0x356d   :  { %v3790_v28 = vpop.permute.xlu1 %3789 }
0x356e   :  { %v3794_v13 = vmul.f32 %v3790_v28, %v6042_v57 }
0x3570   :  { %v3796_v34 = vsel %vm283_vm4, %v3794_v13, 0.0 }
0x3571   :  { %v3797_v14 = vrot.slane %v3796_v34, 4  ;;  %v3793_v43 = vpop.permute.xlu1 %3792 }
0x3572   :  { %v3795_v44 = vmul.f32 %v3793_v43, %v6044_v48 }
0x3573   :  { %v3798_v56 = vadd.f32 %v3797_v14, %v3796_v34 }
0x3574   :  { %v3803_v46 = vsel %vm283_vm4, %v3795_v44, 0.0 }
0x3575   :  { %v3799_v1 = vrot.slane %v3798_v56, 2  ;;  %v3804_v45 = vrot.slane %v3803_v46, 4  ;;  %v3821_v37 = vpop.permute.xlu1 %3820 }
0x3577   :  { %v3800_v52 = vadd.f32 %v3799_v1, %v3798_v56  ;;  %v3805_v3 = vadd.f32 %v3804_v45, %v3803_v46 }
0x3579   :  { %v3806_v60 = vrot.slane %v3805_v3, 2  ;;  %v3801_v16 = vrot.slane %v3800_v52, 1 }
0x357b   :  { %v3807_v21 = vadd.f32 %v3806_v60, %v3805_v3  ;;  %v3802_v15 = vadd.f32 %v3801_v16, %v3800_v52 }
0x357d   :  { %v3808_v39 = vrot.slane %v3807_v21, 1  ;;  %v3814_v27 = vadd.f32 %v3810_v63, %v3802_v15 }
0x357f   :  { %v3809_v17 = vadd.f32 %v3808_v39, %v3807_v21 }
0x3581   :  { %v3818_v24 = vsel %vm1890_vm15, %v3809_v17, %v3802_v15  ;;  %v3815_v26 = vadd.f32 %v3811_v10, %v3809_v17 }
0x3582   :  { %v3823_v62 = vsel %vm283_vm4, %v3818_v24, %v3821_v37 }
0x3583   :  { %4866 = vmatmul.mubr.msk.f32.vlgmr.msra.gmra.mrb[28].mxu0 %vm383_vm5, %v3823_v62  ;;  %v4178_v55 = vrot.slane %v3815_v26, 7 }
0x3585   :  { %v6488_v5 = vsel %vm1890_vm15, %v4178_v55, %v3814_v27 }
0x3656   :  { %v3893_v19 = vpop.f32.mrb[28].mxu0 }
0x3657   :  { %v3898_v47 = vrot.slane %v3893_v19, 2  ;;  %v4867_v61 = vpop.f32.mrb[29].mxu0 }
0x3659   :  { %v3900_v18 = vadd.f32 %v3898_v47, %v5654_v31 }
0x365b   :  { %5321 = vtanh.f32 %v3900_v18  ;;  %v4353_v36 = vmul.f32 -1.442695, %v3900_v18 }
0x365d   :  { %5323 = vpow2.f32 %v4353_v36 }
0x3665   :  { %v5322_v11 = vpop.eup %5321 }
0x3666   :  { %3913 = vrot.lane.b32.xlu1 %v5322_v11, %s5374_s3 }
0x3667   :  { %v5324_v0 = vpop.eup %5323 }
0x3668   :  { %v3904_v30 = vadd.f32 1.0, %v5324_v0 }
0x366a   :  { %5325 = vrcp.f32 %v3904_v30 }
0x3674   :  { %v5326_v33 = vpop.eup %5325 }
0x3675   :  { %v3911_v29 = vmul.f32 %v5326_v33, %v3909_v40 }
0x36d8   :  { %v3914_v42 = vpop.permute.xlu1 %3913 }
0x36d9   :  { %v3916_v58 = vmul.f32 %v5326_v33, %v3914_v42 }
0x36db   :  { %3918 = vrot.lane.b32.xlu0 %v3916_v58, %s5377_s27 }
0x374d   :  { %v3919_v28 = vpop.permute.xlu0 %3918 }
0x374e   :  { %v3921_v13 = vadd.f32 %v3919_v28, %v3911_v29 }
0x3750   :  { %5327 = vtanh.f32 %v3921_v13 }
0x375a   :  { %v5328_v31 = vpop.eup %5327 }
0x375b   :  { %3924 = vrot.lane.b32.xlu1 %v5328_v31, %s5374_s3 }
0x37cd   :  { %v3925_v34 = vpop.permute.xlu1 %3924 }
0x37ce   :  { %v3927_v14 = vmul.f32 %v5326_v33, %v3925_v34 }
0x37d0   :  { %v3929_v43 = vrot.slane %v3927_v14, 6 }
0x37d2   :  { %3930 = vrot.lane.b32.xlu0 %v3929_v43, %s5377_s27 }
0x3844   :  { %v3931_v44 = vpop.permute.xlu0 %3930 }
0x3845   :  { %4877 = vmatmul.mubr.msk.f32.vlgmr.msra.gmra.mrb[24].mxu1 %vm283_vm4, %v3931_v44 }
0x3918   :  { %v4000_v56 = vpop.f32.mrb[24].mxu1 }
0x3919   :  { %v4001_v46 = vadd.f32 %v5342_v6, %v4000_v56  ;;  %v4878_v1 = vpop.f32.mrb[25].mxu1 }
0x391b   :  { %v4004_v45 = vsel %vm1752_vm8, %v4001_v46, -inf  ;;  %v4007_v3 = vmul.f32 %v4001_v46, %v5954_v53  ;;  %vm4263_vm8 = vcmask 457728  }
0x391c   :  { %4005 = vmax.xlane.f32.xlu1 %v4004_v45 }
0x39a9   :  { %v4006_v52 = vpop.xlane.xlu1 %4005 }
0x39aa   :  { %v4008_v60 = vmul.f32 %v5957_v54, %v4006_v52 }
0x39ac   :  { %v4009_v16 = vsub.f32 %v4007_v3, %v4008_v60 }
0x39ae   :  { %v4010_v21 = vmul.f32 1.442695, %v4009_v16 }
0x39b0   :  { %5329 = vpow2.f32 %v4010_v21 }
0x39ba   :  { %v5330_v39 = vpop.eup %5329 }
0x39bb   :  { %4014 = vrot.lane.b32.xlu0 %v5330_v39, %s5385_s24  ;;  %v4041_v15 = vrot.slane %v5330_v39, %v5967_v12  ;;  %v4049_v17 = vrot.slane %v5330_v39, %v5970_v20  ;;  %v4012_v10 = vadd.f32 %v5330_v39, %v6457_v9 }
0x39bd   :  { %4044 = vbcast.lane.b32.xlu1 %v4041_v15, 260  ;;  %v4032_v24 = vrot.slane %v4012_v10, %v5970_v20  ;;  %v4025_v53 = vrot.slane %v4012_v10, %v5967_v12 }
0x39bf   :  { %4052 = vbcast.lane.b32.xlu0 %v4049_v17, 260 }
0x39c3   :  { %4034 = vbcast.lane.b32.xlu0 %v4032_v24, 256 }
0x39c7   :  { %4027 = vbcast.lane.b32.xlu0 %v4025_v53, 256 }
0x3a2d   :  { %v4015_v54 = vpop.permute.xlu0 %4014 }
0x3a2e   :  { %v4017_v37 = vsel %vm1766_vm13, %v4015_v54, 0.0  ;;  %vm4265_vm13 = vcmask 517120  }
0x3a2f   :  { %4018 = vadd.xlane.f32.xlu0 %v4017_v37  ;;  %v4045_v47 = vpop.permute.xlu1 %4044 }
0x3a31   :  { %v4053_v63 = vpop.permute.xlu0 %4052 }
0x3a35   :  { %v4035_v26 = vpop.permute.xlu0 %4034 }
0x3a36   :  { %v4037_v62 = vsub.f32 %v5978_v25, %v4035_v26 }
0x3a38   :  { %v4055_v27 = vmul.f32 %v4053_v63, %v4037_v62  ;;  %v4133_v62 = vrot.slane %v5568_v38, 7 }
0x3a39   :  { %v4028_v55 = vpop.permute.xlu0 %4027 }
0x3a3a   :  { %v4356_v19 = vmul.f32 -1.442695, %v4055_v27  ;;  %v4036_v9 = vsub.f32 %v5978_v25, %v4028_v55 }
0x3a3c   :  { %5331 = vpow2.f32 %v4356_v19  ;;  %v4054_v61 = vmul.f32 %v4045_v47, %v4036_v9  ;;  %v4132_v19 = vrot.slane %v5568_v38, 6 }
0x3a3e   :  { %v4355_v18 = vmul.f32 -1.442695, %v4054_v61 }
0x3a40   :  { %5333 = vpow2.f32 %v4355_v18 }
0x3a46   :  { %v5332_v11 = vpop.eup %5331 }
0x3a47   :  { %v4063_v36 = vadd.f32 1.0, %v5332_v11 }
0x3a49   :  { %5335 = vrcp.f32 %v4063_v36 }
0x3a4a   :  { %v5334_v0 = vpop.eup %5333 }
0x3a4b   :  { %v4062_v30 = vadd.f32 1.0, %v5334_v0 }
0x3a4d   :  { %5337 = vrcp.f32 %v4062_v30 }
0x3a53   :  { %v5336_v33 = vpop.eup %5335 }
0x3a54   :  { %4088 = vrot.lane.b32.xlu0 %v5336_v33, %s5385_s24 }
0x3a57   :  { %v5338_v42 = vpop.eup %5337 }
0x3a58   :  { %4215 = vrot.lane.b32.xlu0 %v6113_v8, %s5386_s25  ;;  %4086 = vrot.lane.b32.xlu1 %v5338_v42, %s5385_s24 }
0x3a5c   :  { %4173 = vrot.lane.b32.xlu0 %v6422_v51, %s5377_s27 }
0x3a60   :  { %4154 = vrot.lane.b32.xlu0 %v6204_v59, %s5374_s3 }
0x3a64   :  { %4227 = vrot.lane.b32.xlu0 %v6262_v49, %s5387_s13 }
0x3a68   :  { %4239 = vrot.lane.b32.xlu0 %v6403_v32, %s5388_s28 }
0x3abc   :  { %v4019_v25 = vpop.xlane.xlu0 %4018 }
0x3abd   :  { %5339 = vrcp.f32 %v4019_v25 }
0x3ac6   :  { %v4089_v51 = vpop.permute.xlu0 %4088 }
0x3ac7   :  { %v5340_v58 = vpop.eup %5339  ;;  %v4093_v13 = vsub.f32 %v5336_v33, %v4089_v51 }
0x3ac8   :  { %v4021_v40 = vmul.f32 %v5340_v58, %v5330_v39 }
0x3aca   :  { %v4079_v8 = vrot.slane %v4021_v40, %v5970_v20  ;;  %v4071_v29 = vrot.slane %v4021_v40, %v5967_v12  ;;  %v4087_v28 = vpop.permute.xlu1 %4086  ;;  %v4216_v18 = vpop.permute.xlu0 %4215 }
0x3acb   :  { %v4092_v34 = vsub.f32 %v5338_v42, %v4087_v28  ;;  %v4254_v25 = vsel %vm78_vm2, %v5998_v2, %v4216_v18  ;;  %vm4259_vm2 = vcmask 326656  }
0x3acc   :  { %4082 = vbcast.lane.b32.xlu1 %v4079_v8, 264 }
0x3ace   :  { %v4174_v36 = vpop.permute.xlu0 %4173 }
0x3ad0   :  { %4074 = vbcast.lane.b32.xlu1 %v4071_v29, 264  ;;  %v4193_v29 = vsel %vm283_vm4, %v6350_v23, %v4174_v36 }
0x3ad2   :  { %v4155_v30 = vpop.permute.xlu0 %4154 }
0x3ad6   :  { %v4228_v42 = vpop.permute.xlu0 %4227 }
0x3ada   :  { %v4240_v58 = vpop.permute.xlu0 %4239 }
0x3b3e   :  { %v4083_v59 = vpop.permute.xlu1 %4082 }
0x3b3f   :  { %v4095_v31 = vmul.f32 %v4093_v13, %v4083_v59 }
0x3b41   :  { %v4103_v49 = vsel %vm1846_vm14, %v4095_v31, 0.0 }
0x3b42   :  { %v4104_v14 = vrot.slane %v4103_v49, 4  ;;  %v4075_v32 = vpop.permute.xlu1 %4074 }
0x3b43   :  { %v4094_v43 = vmul.f32 %v4092_v34, %v4075_v32 }
0x3b44   :  { %v4105_v44 = vadd.f32 %v4104_v14, %v4103_v49 }
0x3b45   :  { %v4096_v56 = vsel %vm1846_vm14, %v4094_v43, 0.0 }
0x3b46   :  { %v4106_v6 = vrot.slane %v4105_v44, 2  ;;  %v4097_v20 = vrot.slane %v4096_v56, 4 }
0x3b48   :  { %v4107_v46 = vadd.f32 %v4106_v6, %v4105_v44  ;;  %v4098_v1 = vadd.f32 %v4097_v20, %v4096_v56 }
0x3b4a   :  { %v4099_v12 = vrot.slane %v4098_v1, 2  ;;  %v4108_v45 = vrot.slane %v4107_v46, 1 }
0x3b4c   :  { %v4100_v52 = vadd.f32 %v4099_v12, %v4098_v1  ;;  %v4109_v3 = vadd.f32 %v4108_v45, %v4107_v46 }
0x3b4e   :  { %4114 = vbcast.lane.b32.xlu1 %v4109_v3, 256  ;;  %v4101_v60 = vrot.slane %v4100_v52, 1 }
0x3b50   :  { %v4102_v16 = vadd.f32 %v4101_v60, %v4100_v52 }
0x3b52   :  { %4111 = vbcast.lane.b32.xlu1 %v4102_v16, 256  ;;  %v4250_v21 = vsel %vm1890_vm15, %v4109_v3, %v4102_v16 }
0x3b56   :  { %4147 = vrot.lane.b32.xlu1 %v6132_v22, %s5377_s27 }
0x3b5a   :  { %4221 = vrot.lane.b32.xlu1 %v6185_v7, %s5389_s29 }
0x3b5e   :  { %4180 = vrot.lane.b32.xlu1 %v6488_v5, %s5374_s3  ;;  %s5390_s3 = smov 56  }
0x3b62   :  { %4161 = vrot.lane.b32.xlu1 %v6281_v35, %s5375_s4 }
0x3b66   :  { %4233 = vrot.lane.b32.xlu1 %v6332_v41, %s5377_s27 }
0x3b6a   :  { %4245 = vrot.lane.b32.xlu1 %v6473_v50, %s5376_s26 }
0x3bc0   :  { %v4115_v39 = vpop.permute.xlu1 %4114 }
0x3bc1   :  { %v4117_v15 = vmul.f32 %v4115_v39, %v6044_v48 }
0x3bc3   :  { %v4125_v22 = vsel %vm283_vm4, %v4117_v15, 0.0 }
0x3bc4   :  { %v4126_v17 = vrot.slane %v4125_v22, 4  ;;  %v4112_v10 = vpop.permute.xlu1 %4111 }
0x3bc5   :  { %v4116_v7 = vmul.f32 %v4112_v10, %v6042_v57 }
0x3bc6   :  { %v4127_v24 = vadd.f32 %v4126_v17, %v4125_v22 }
0x3bc7   :  { %v4118_v5 = vsel %vm283_vm4, %v4116_v7, 0.0 }
0x3bc8   :  { %v4128_v53 = vrot.slane %v4127_v24, 2  ;;  %v4119_v35 = vrot.slane %v4118_v5, 4  ;;  %v4148_v61 = vpop.permute.xlu1 %4147 }
0x3bc9   :  { %v4190_v8 = vsel %vm283_vm4, %v6060_v4, %v4148_v61 }
0x3bca   :  { %v4129_v54 = vadd.f32 %v4128_v53, %v4127_v24  ;;  %v4120_v37 = vadd.f32 %v4119_v35, %v4118_v5  ;;  %v4191_v13 = vsel %vm383_vm5, %v4190_v8, %v4155_v30 }
0x3bcc   :  { %v4130_v41 = vrot.slane %v4129_v54, 1  ;;  %v4121_v63 = vrot.slane %v4120_v37, 2  ;;  %v4222_v11 = vpop.permute.xlu1 %4221 }
0x3bcd   :  { %v4255_v40 = vsel %vm190_vm0, %v4254_v25, %v4222_v11  ;;  %vm4261_vm0 = vcmask 392192  }
0x3bce   :  { %v4131_v26 = vadd.f32 %v4130_v41, %v4129_v54  ;;  %v4122_v50 = vadd.f32 %v4121_v63, %v4120_v37  ;;  %v4257_v51 = vsel %vm4256_vm1, %v4255_v40, %v4228_v42 }
0x3bd0   :  { %v4123_v48 = vrot.slane %v4122_v50, 1  ;;  %v4137_v27 = vadd.f32 %v4133_v62, %v4131_v26  ;;  %v4181_v0 = vpop.permute.xlu1 %4180 }
0x3bd1   :  { %v4194_v28 = vsel %vm383_vm5, %v4193_v29, %v4181_v0 }
0x3bd2   :  { %v4124_v55 = vadd.f32 %v4123_v48, %v4122_v50  ;;  %v4185_v57 = vrot.slane %v4137_v27, 7 }
0x3bd4   :  { %v4136_v9 = vadd.f32 %v4132_v19, %v4124_v55  ;;  %v4162_v33 = vpop.permute.xlu1 %4161 }
0x3bd5   :  { %v4192_v31 = vsel %vm6595_vm3, %v4191_v13, %v4162_v33 }
0x3bd6   :  { %v4186_v47 = vsel %vm1890_vm15, %v4185_v57, %v4136_v9 }
0x3bd7   :  { %4187 = vrot.lane.b32.xlu0 %v4186_v47, %s5375_s4  ;;  %s5391_s4 = smov [#allocation2]  }
0x3bd8   :  { %v4234_v38 = vpop.permute.xlu1 %4233  ;;  %s4275_s26 = sshll.u32 %s5391_s4, 4  ;;  %s4276_s26 = int_to_ptr.vmem [resolvable:$true] %s4275_s26 }
0x3bd9   :  { %v4258_v2 = vsel %vm283_vm4, %v4257_v51, %v4234_v38  ;;  %s5343_s27 = scalar_lea.vmem %s4276_s26, 64  ;;  %p5348_p1 = scmp.lt.s32.totalorder %s4276_s26, %s4276_s26 }
0x3bda   :  { %v4260_v23 = vsel %vm4259_vm2, %v4258_v2, %v4240_v58  ;;  %p5344_p0 = scmp.ne.s32.totalorder %s4276_s26, %s5343_s27  ;;  %p5349_p2 = scmp.lt.s32.totalorder %s5343_s27, %s5343_s27 }
0x3bdb   :  { %4251 = vrot.lane.b32.xlu0 %v4250_v21, %s5390_s3 }
0x3bdc   :  { %v4246_v34 = vpop.permute.xlu1 %4245  ;;  %p5350_p3 = por %p5349_p2, %p5348_p1 }
0x3bdd   :  { %v4262_v14 = vsel %vm4261_vm0, %v4260_v23, %v4246_v34 }
0x3bde   :  { %p5351_p4 = pnand %p5350_p3, %p5344_p0 }
0x3c49   :  { %v4188_v59 = vpop.permute.xlu0 %4187 }
0x3c4a   :  { %v4195_v4 = vsel %vm6596_vm7, %v4194_v28, %v4188_v59 }
0x3c4b   :  { %v4198_v49 = vcombine.low %v4192_v31, %v4195_v4 }
0x3c4d   :  { %v4252_v32 = vpop.permute.xlu0 %4251  ;;  %4357 = vst.sshfl [vmem:[#allocation2] sm:$0x33 pattern:$0x76325410] %v4198_v49 }
0x3c4e   :  { %v4264_v43 = vsel %vm4263_vm8, %v4262_v14, %v4252_v32 }
0x3c4f   :  { %5354 = shalt.err (!%p5351_p4)
}
0x3c50   :  { %s5355_s17 = scalar_lea.hbm %s6589_s15, 64 }
0x3c51   :  { %p5356_p5 = scmp.ne.s32.totalorder %s6589_s15, %s5355_s17  ;;  %p5359_p6 = scmp.lt.u32.totalorder %s5355_s17, %s6589_s15 }
0x3c53   :  { %p5361_p7 = pnand %p5359_p6, %p5356_p5 }
0x3c55   :  { %5364 = shalt.err (!%p5361_p7)
}
0x3c56   :  { %4278 = dma.vmem_to_hbm [thread:$0]  %s4276_s26, 64, %s6589_s15, [#allocation3]   ;;  %4266 = vst.msk [vmem:[%s6590_s16] sm:$0x3] %vm4265_vm13, %v4264_v43 }
0x3c57   :  { %5365 = dma.done.wait [#allocation3], 64  }
0x3c58   :  { %5366 = vsyncadd [#allocation3], 4294967232 }
0x3c59   :  { %4288 = vsyncpa [#allocation3], 1 }

</bundles_post_ra>
